<compile_context>
chip_gen: v5e
topology: v5e:2x2
jax: 0.10.0
libtpu: 0.0.40
codegen_flags: <defaults>
</compile_context>

<pallas_src>
import jax
import jax.numpy as jnp
from jax import lax
from jax.experimental import pallas as pl
from jax.experimental.pallas import tpu as pltpu


# ---------------------------------------------------------------------------
# Fused kernel: both branches + one 256-wide contraction for x_new @ y_new.T.
# Single grid step; all operands are whole (padded) arrays resident in VMEM.
# ---------------------------------------------------------------------------
def _hgnn_fused_kernel(g1_ref, g2_ref, xwm_ref, xwd_ref,
                       w2m_ref, b2m_ref, w2d_ref, b2d_ref,
                       out_ref, xcat_ref, ycat_ref):
    def branch(g_ref, xw_ref, w2_ref, b2_ref, cat_ref):
        kn, n = g_ref.shape                    # flat (K*Np, Np), Np square (padded)
        k = kn // n
        n_cls = w2_ref.shape[1]

        # First hop for all K graphs in ONE MXU call: relu(G @ (x W1 + b1)).
        # (x W1 + b1 was hoisted to the wrapper as xw.)
        h1 = jnp.maximum(
            jnp.dot(g_ref[...], xw_ref[...], preferred_element_type=jnp.float32),
            0.0)
        # TODO(synk): F.dropout(p=0.5, training=True) is stochastic; identity here
        # (eval-mode semantics, matches the f32 reference below).
        t = (jnp.dot(h1.astype(jnp.bfloat16), w2_ref[...],
                     preferred_element_type=jnp.float32) + b2_ref[...]
             ).astype(jnp.bfloat16)            # (K*Np, n_cls)

        # Second hop is per-graph: x_i = G_i @ t_i.  Write each (Np, n_cls) result
        # into its column slice of the f32 concat scratch so that the final
        # contraction is K*n_cls (=256) lanes wide.
        for i in range(k):
            cat_ref[:, i * n_cls:(i + 1) * n_cls] = jnp.dot(
                g_ref[i * n:(i + 1) * n, :], t[i * n:(i + 1) * n, :],
                preferred_element_type=jnp.float32)

    branch(g1_ref, xwm_ref, w2m_ref, b2m_ref, xcat_ref)   # x_new  (N_mp, K*n_cls)
    branch(g2_ref, xwd_ref, w2d_ref, b2d_ref, ycat_ref)   # y_new  (N_dp, K*n_cls)

    # out = cat_i(x_i) @ cat_i(y_i).T : one 256-wide contraction, f32 operands.
    out_ref[...] = lax.dot_general(
        xcat_ref[...], ycat_ref[...],
        dimension_numbers=(((1,), (1,)), ((), ())),
        preferred_element_type=jnp.float32)


# ---------------------------------------------------------------------------
# Wrapper helpers
# ---------------------------------------------------------------------------
def _round_up(x, m):
    return ((x + m - 1) // m) * m


def _vmem_budget_bytes():
    # Per-generation VMEM budget with headroom: v5e/v6e physical = 128 MiB,
    # v7x only 64 MiB.  Default conservatively to v7x if the query fails.
    phys = 64 * 1024 * 1024
    try:
        info = pltpu.get_tpu_info()
        phys = int(getattr(info, "vmem_capacity_bytes", phys))
    except Exception:
        pass
    return (phys * 3) // 4


def _vmem_estimate(K, N_mp, N_dp, n_hid, n_cls):
    bf16, f32 = 2, 4
    # Pipelined inputs/output: assume 2 buffers each (Pallas default double
    # buffering; all blocks here are grid-invariant, so pl.Buffered(1) on the
    # in_specs could halve this if it ever gets tight).
    io = 2 * (bf16 * (K * N_mp * N_mp + K * N_dp * N_dp
                      + (N_mp + N_dp) * n_hid + 2 * n_hid * n_cls)
              + f32 * (2 * n_cls + N_mp * N_dp))
    # f32 concat scratches.
    scratch = f32 * (N_mp + N_dp) * K * n_cls
    # In-kernel temporaries (h1 f32, t f32+bf16 per branch), with 2x headroom
    # for spills / relayout copies.
    tmp = f32 * K * (N_mp + N_dp) * n_hid + (f32 + bf16) * K * (N_mp + N_dp) * n_cls
    return io + scratch + 2 * tmp


def prepare_graphs(g1_stack, g2_stack):
    """Hoistable preprocessing of the (static) hypergraph Laplacians.

    Casts to bf16, zero-pads node dims to multiples of 128 (lane-dense output and
    G tiles) and flattens to (K*Np, Np) so the kernel can batch the first hop of
    all K graphs into one MXU call.  Call ONCE and reuse across forward passes —
    this removes a full K*N^2 f32 HBM read + bf16 write per call.
    """
    K, N_m, _ = g1_stack.shape
    K2, N_d, _ = g2_stack.shape
    assert K == K2
    N_mp = _round_up(N_m, 128)
    N_dp = _round_up(N_d, 128)

    def prep(g, n, n_pad):
        g = g.astype(jnp.bfloat16)
        if n_pad != n:
            g = jnp.pad(g, ((0, 0), (0, n_pad - n), (0, n_pad - n)))
        return g.reshape(K * n_pad, n_pad)

    return {
        "g1": prep(g1_stack, N_m, N_mp),
        "g2": prep(g2_stack, N_d, N_dp),
        "k": K, "n_m": N_m, "n_d": N_d, "n_mp": N_mp, "n_dp": N_dp,
    }


def hgnn_forward(params, data_d, data_m, graphs):
    """data_d = input[0]['data'], data_m = input[1]['data'],
    graphs = prepare_graphs(G1_Sum[1:5], G2_Sum[1:5]).  Returns x_new @ y_new.T."""
    w1m, b1m = params["m1"]
    w2m, b2m = params["m2"]
    w1d, b1d = params["d1"]
    w2d, b2d = params["d2"]

    K = graphs["k"]
    N_m, N_d = graphs["n_m"], graphs["n_d"]
    N_mp, N_dp = graphs["n_mp"], graphs["n_dp"]
    n_hid = w1m.shape[1]
    n_cls = w2m.shape[1]

    # Hoisted loop-invariant projections (plain XLA dot + bias), row-padded to the
    # node-dim padding used for G, then cast once to bf16 for the MXU.
    xw_m = data_m @ w1m + b1m                      # (N_m, n_hid) f32
    xw_d = data_d @ w1d + b1d                      # (N_d, n_hid) f32
    if N_mp != N_m:
        xw_m = jnp.pad(xw_m, ((0, N_mp - N_m), (0, 0)))
    if N_dp != N_d:
        xw_d = jnp.pad(xw_d, ((0, N_dp - N_d), (0, 0)))
    xw_m = xw_m.astype(jnp.bfloat16)
    xw_d = xw_d.astype(jnp.bfloat16)

    budget = _vmem_budget_bytes()
    need = _vmem_estimate(K, N_mp, N_dp, n_hid, n_cls)
    if need > budget:
        # TODO(synk): row-tile G (grid over N_mp // tile, tile picked per generation
        # from get_tpu_info) and add a "parallel" row axis for v7x's second
        # TensorCore once node counts outgrow single-block VMEM.
        raise NotImplementedError(
            f"HGNN node counts too large for single-block VMEM "
            f"(need ~{need >> 20} MiB, budget {budget >> 20} MiB); row-tile G.")

    out = pl.pallas_call(
        _hgnn_fused_kernel,
        out_shape=jax.ShapeDtypeStruct((N_mp, N_dp), jnp.float32),
        grid_spec=pltpu.PrefetchScalarGridSpec(
            num_scalar_prefetch=0,
            grid=(1,),                                             # single fused step
            in_specs=[
                pl.BlockSpec((K * N_mp, N_mp), lambda i: (0, 0)),  # G1 flat (bf16)
                pl.BlockSpec((K * N_dp, N_dp), lambda i: (0, 0)),  # G2 flat (bf16)
                pl.BlockSpec((N_mp, n_hid), lambda i: (0, 0)),     # xw_m
                pl.BlockSpec((N_dp, n_hid), lambda i: (0, 0)),     # xw_d
                pl.BlockSpec((n_hid, n_cls), lambda i: (0, 0)),    # W2_m
                pl.BlockSpec((1, n_cls), lambda i: (0, 0)),        # b2_m (f32)
                pl.BlockSpec((n_hid, n_cls), lambda i: (0, 0)),    # W2_d
                pl.BlockSpec((1, n_cls), lambda i: (0, 0)),        # b2_d (f32)
            ],
            out_specs=pl.BlockSpec((N_mp, N_dp), lambda i: (0, 0)),
            scratch_shapes=[
                pltpu.VMEM((N_mp, K * n_cls), jnp.float32),        # x_new concat
                pltpu.VMEM((N_dp, K * n_cls), jnp.float32),        # y_new concat
            ],
        ),
        compiler_params=pltpu.CompilerParams(
            dimension_semantics=("arbitrary",),
            vmem_limit_bytes=int(budget),
        ),
    )(
        graphs["g1"], graphs["g2"], xw_m, xw_d,
        w2m.astype(jnp.bfloat16), b2m.reshape(1, -1).astype(jnp.float32),
        w2d.astype(jnp.bfloat16), b2d.reshape(1, -1).astype(jnp.float32),
    )
    # Padded rows/cols correspond to zero G rows -> zero output; slice them off.
    return out[:N_m, :N_d]


# ---------------------------------------------------------------------------
# Parameter init mirroring HGNN_conv.reset_parameters (uniform(-stdv, stdv))
# ---------------------------------------------------------------------------
def init_hgnn_params(key, in_ch_m, in_ch_d, n_class, n_hid):
    def conv_params(k, in_ft, out_ft):
        kw, kb = jax.random.split(k)
        stdv = 1.0 / jnp.sqrt(jnp.float32(out_ft))
        w = jax.random.uniform(kw, (in_ft, out_ft), jnp.float32, -stdv, stdv)
        b = jax.random.uniform(kb, (out_ft,), jnp.float32, -stdv, stdv)
        return w, b

    k1, k2, k3, k4 = jax.random.split(key, 4)
    return {
        "m1": conv_params(k1, in_ch_m, n_hid),
        "m2": conv_params(k2, n_hid, n_class),
        "d1": conv_params(k3, in_ch_d, n_hid),
        "d2": conv_params(k4, n_hid, n_class),
    }


# ---------------------------------------------------------------------------
# Pure-JAX f32 reference (dropout == identity) for a correctness check
# ---------------------------------------------------------------------------
def hgnn_reference(params, data_d, data_m, g1_stack, g2_stack):
    def conv(x, g, w, b):
        return g @ (x @ w + b)

    xs, ys = [], []
    for i in range(g1_stack.shape[0]):
        h = jnp.maximum(conv(data_m, g1_stack[i], *params["m1"]), 0.0)
        xs.append(conv(h, g1_stack[i], *params["m2"]))
        h = jnp.maximum(conv(data_d, g2_stack[i], *params["d1"]), 0.0)
        ys.append(conv(h, g2_stack[i], *params["d2"]))
    x_new = jnp.concatenate(xs, axis=1)
    y_new = jnp.concatenate(ys, axis=1)
    return x_new @ y_new.T


if __name__ == "__main__":
    # Small shapes consistent with the module (original: in_ch_m=495, in_ch_d=383,
    # n_hid=128, n_class=64; node counts scaled down; N_d=96 exercises the 128-pad).
    N_m, N_d = 128, 96            # miRNA / disease node counts
    in_ch_m, in_ch_d = 160, 128   # feature dims
    n_hid, n_class = 128, 64      # module defaults

    key = jax.random.PRNGKey(0)
    k_p, k_xm, k_xd, k_g1, k_g2 = jax.random.split(key, 5)

    params = init_hgnn_params(k_p, in_ch_m, in_ch_d, n_class, n_hid)

    data_m = jax.random.normal(k_xm, (N_m, in_ch_m), jnp.float32)   # input[1]['data']
    data_d = jax.random.normal(k_xd, (N_d, in_ch_d), jnp.float32)   # input[0]['data']

    # G*_Sum is indexed 1..4 in the torch code; build 5 and use slices [1:5].
    g1_sum = jax.random.normal(k_g1, (5, N_m, N_m), jnp.float32) * 0.1
    g2_sum = jax.random.normal(k_g2, (5, N_d, N_d), jnp.float32) * 0.1
    g1_stack = g1_sum[1:5]
    g2_stack = g2_sum[1:5]

    # Hoisted once (Laplacians are static in this model): bf16 cast + 128-pad + flatten.
    graphs = prepare_graphs(g1_stack, g2_stack)

    out = hgnn_forward(params, data_d, data_m, graphs)
    out = jax.block_until_ready(out)

    ref = hgnn_reference(params, data_d, data_m, g1_stack, g2_stack)
    assert out.shape == (N_m, N_d), out.shape
    # bf16 MXU feeds for G / h1 (f32 accumulation, f32 final contraction) ->
    # loosened tolerance vs. the f32 reference.
    err = float(jnp.max(jnp.abs(out - ref)))
    scale = float(jnp.max(jnp.abs(ref)))
    assert err <= 3e-2 * scale + 1e-5, (err, scale)

    print("KERNEL_OK")
</pallas_src>

<mosaic_0001>
module attributes {stable_mosaic.version = 11 : i64} {
  func.func @_hgnn_fused_kernel(%arg0: i32, %arg1: memref<512x128xbf16, #tpu.memory_space<vmem>>, %arg2: memref<512x128xbf16, #tpu.memory_space<vmem>>, %arg3: memref<128x128xbf16, #tpu.memory_space<vmem>>, %arg4: memref<128x128xbf16, #tpu.memory_space<vmem>>, %arg5: memref<128x64xbf16, #tpu.memory_space<vmem>>, %arg6: memref<1x64xf32, #tpu.memory_space<vmem>>, %arg7: memref<128x64xbf16, #tpu.memory_space<vmem>>, %arg8: memref<1x64xf32, #tpu.memory_space<vmem>>, %arg9: memref<128x128xf32, #tpu.memory_space<vmem>>, %arg10: memref<128x256xf32, #tpu.memory_space<vmem>>, %arg11: memref<128x256xf32, #tpu.memory_space<vmem>>) attributes {dimension_semantics = [#tpu.dimension_semantics<arbitrary>], iteration_bounds = array<i64: 1>, scalar_prefetch = 0 : i64, scratch_operands = 2 : i64, tpu.core_type = #tpu.core_type<tc>, window_params = [{pipeline_mode = #tpu.pipeline_mode<synchronous>, transform_indices = @transform_0, window_bounds = array<i64: 512, 128>}, {pipeline_mode = #tpu.pipeline_mode<synchronous>, transform_indices = @transform_1, window_bounds = array<i64: 512, 128>}, {pipeline_mode = #tpu.pipeline_mode<synchronous>, transform_indices = @transform_2, window_bounds = array<i64: 128, 128>}, {pipeline_mode = #tpu.pipeline_mode<synchronous>, transform_indices = @transform_3, window_bounds = array<i64: 128, 128>}, {pipeline_mode = #tpu.pipeline_mode<synchronous>, transform_indices = @transform_4, window_bounds = array<i64: 128, 64>}, {pipeline_mode = #tpu.pipeline_mode<synchronous>, transform_indices = @transform_5, window_bounds = array<i64: 1, 64>}, {pipeline_mode = #tpu.pipeline_mode<synchronous>, transform_indices = @transform_6, window_bounds = array<i64: 128, 64>}, {pipeline_mode = #tpu.pipeline_mode<synchronous>, transform_indices = @transform_7, window_bounds = array<i64: 1, 64>}, {pipeline_mode = #tpu.pipeline_mode<synchronous>, transform_indices = @transform_8, window_bounds = array<i64: 128, 128>}]} {
    %c0 = arith.constant 0 : index
    %c0_0 = arith.constant 0 : index
    %0 = vector.load %arg1[%c0, %c0_0] : memref<512x128xbf16, #tpu.memory_space<vmem>>, vector<512x128xbf16>
    %c0_1 = arith.constant 0 : index
    %c0_2 = arith.constant 0 : index
    %1 = vector.load %arg3[%c0_1, %c0_2] : memref<128x128xbf16, #tpu.memory_space<vmem>>, vector<128x128xbf16>
    %cst = arith.constant dense<0.000000e+00> : vector<512x128xf32>
    %2 = tpu.matmul %0, %1, %cst {dimension_numbers = #tpu.dot_dimension_numbers<[1], [0], [0], [1], [0, 0, 1, 1], [], []>} : vector<512x128xbf16>, vector<128x128xbf16>, vector<512x128xf32> -> vector<512x128xf32>
    %cst_3 = arith.constant 0.000000e+00 : f32
    %3 = vector.broadcast %cst_3 : f32 to vector<512x128xf32>
    %4 = arith.maximumf %2, %3 : vector<512x128xf32>
    %5 = arith.truncf %4 : vector<512x128xf32> to vector<512x128xbf16>
    %c0_4 = arith.constant 0 : index
    %c0_5 = arith.constant 0 : index
    %6 = vector.load %arg5[%c0_4, %c0_5] : memref<128x64xbf16, #tpu.memory_space<vmem>>, vector<128x64xbf16>
    %cst_6 = arith.constant dense<0.000000e+00> : vector<512x64xf32>
    %7 = tpu.matmul %5, %6, %cst_6 {dimension_numbers = #tpu.dot_dimension_numbers<[1], [0], [0], [1], [0, 0, 1, 1], [], []>} : vector<512x128xbf16>, vector<128x64xbf16>, vector<512x64xf32> -> vector<512x64xf32>
    %c0_7 = arith.constant 0 : index
    %c0_8 = arith.constant 0 : index
    %8 = vector.load %arg6[%c0_7, %c0_8] : memref<1x64xf32, #tpu.memory_space<vmem>>, vector<1x64xf32>
    %9 = vector.broadcast %8 : vector<1x64xf32> to vector<512x64xf32>
    %10 = arith.addf %7, %9 : vector<512x64xf32>
    %11 = arith.truncf %10 : vector<512x64xf32> to vector<512x64xbf16>
    %c0_9 = arith.constant 0 : index
    %c0_10 = arith.constant 0 : index
    %12 = vector.load %arg1[%c0_9, %c0_10] : memref<512x128xbf16, #tpu.memory_space<vmem>>, vector<128x128xbf16>
    %13 = vector.extract_strided_slice %11 {offsets = [0, 0], sizes = [128, 64], strides = [1, 1]} : vector<512x64xbf16> to vector<128x64xbf16>
    %cst_11 = arith.constant dense<0.000000e+00> : vector<128x64xf32>
    %14 = tpu.matmul %12, %13, %cst_11 {dimension_numbers = #tpu.dot_dimension_numbers<[1], [0], [0], [1], [0, 0, 1, 1], [], []>} : vector<128x128xbf16>, vector<128x64xbf16>, vector<128x64xf32> -> vector<128x64xf32>
    %c0_12 = arith.constant 0 : index
    %c0_13 = arith.constant 0 : index
    %15 = vector.load %arg10[%c0_12, %c0_13] : memref<128x256xf32, #tpu.memory_space<vmem>>, vector<128x64xf32>
    tpu.vector_store %arg10[%c0_12, %c0_13], %14 {strides = array<i32>} : memref<128x256xf32, #tpu.memory_space<vmem>>, vector<128x64xf32>,
    %c128 = arith.constant 128 : index
    %c0_14 = arith.constant 0 : index
    %16 = vector.load %arg1[%c128, %c0_14] : memref<512x128xbf16, #tpu.memory_space<vmem>>, vector<128x128xbf16>
    %17 = vector.extract_strided_slice %11 {offsets = [128, 0], sizes = [128, 64], strides = [1, 1]} : vector<512x64xbf16> to vector<128x64xbf16>
    %cst_15 = arith.constant dense<0.000000e+00> : vector<128x64xf32>
    %18 = tpu.matmul %16, %17, %cst_15 {dimension_numbers = #tpu.dot_dimension_numbers<[1], [0], [0], [1], [0, 0, 1, 1], [], []>} : vector<128x128xbf16>, vector<128x64xbf16>, vector<128x64xf32> -> vector<128x64xf32>
    %c0_16 = arith.constant 0 : index
    %c64 = arith.constant 64 : index
    %19 = vector.load %arg10[%c0_16, %c64] : memref<128x256xf32, #tpu.memory_space<vmem>>, vector<128x64xf32>
    tpu.vector_store %arg10[%c0_16, %c64], %18 {strides = array<i32>} : memref<128x256xf32, #tpu.memory_space<vmem>>, vector<128x64xf32>,
    %c256 = arith.constant 256 : index
    %c0_17 = arith.constant 0 : index
    %20 = vector.load %arg1[%c256, %c0_17] : memref<512x128xbf16, #tpu.memory_space<vmem>>, vector<128x128xbf16>
    %21 = vector.extract_strided_slice %11 {offsets = [256, 0], sizes = [128, 64], strides = [1, 1]} : vector<512x64xbf16> to vector<128x64xbf16>
    %cst_18 = arith.constant dense<0.000000e+00> : vector<128x64xf32>
    %22 = tpu.matmul %20, %21, %cst_18 {dimension_numbers = #tpu.dot_dimension_numbers<[1], [0], [0], [1], [0, 0, 1, 1], [], []>} : vector<128x128xbf16>, vector<128x64xbf16>, vector<128x64xf32> -> vector<128x64xf32>
    %c0_19 = arith.constant 0 : index
    %c128_20 = arith.constant 128 : index
    %23 = vector.load %arg10[%c0_19, %c128_20] : memref<128x256xf32, #tpu.memory_space<vmem>>, vector<128x64xf32>
    tpu.vector_store %arg10[%c0_19, %c128_20], %22 {strides = array<i32>} : memref<128x256xf32, #tpu.memory_space<vmem>>, vector<128x64xf32>,
    %c384 = arith.constant 384 : index
    %c0_21 = arith.constant 0 : index
    %24 = vector.load %arg1[%c384, %c0_21] : memref<512x128xbf16, #tpu.memory_space<vmem>>, vector<128x128xbf16>
    %25 = vector.extract_strided_slice %11 {offsets = [384, 0], sizes = [128, 64], strides = [1, 1]} : vector<512x64xbf16> to vector<128x64xbf16>
    %cst_22 = arith.constant dense<0.000000e+00> : vector<128x64xf32>
    %26 = tpu.matmul %24, %25, %cst_22 {dimension_numbers = #tpu.dot_dimension_numbers<[1], [0], [0], [1], [0, 0, 1, 1], [], []>} : vector<128x128xbf16>, vector<128x64xbf16>, vector<128x64xf32> -> vector<128x64xf32>
    %c0_23 = arith.constant 0 : index
    %c192 = arith.constant 192 : index
    %27 = vector.load %arg10[%c0_23, %c192] : memref<128x256xf32, #tpu.memory_space<vmem>>, vector<128x64xf32>
    tpu.vector_store %arg10[%c0_23, %c192], %26 {strides = array<i32>} : memref<128x256xf32, #tpu.memory_space<vmem>>, vector<128x64xf32>,
    %c0_24 = arith.constant 0 : index
    %c0_25 = arith.constant 0 : index
    %28 = vector.load %arg2[%c0_24, %c0_25] : memref<512x128xbf16, #tpu.memory_space<vmem>>, vector<512x128xbf16>
    %c0_26 = arith.constant 0 : index
    %c0_27 = arith.constant 0 : index
    %29 = vector.load %arg4[%c0_26, %c0_27] : memref<128x128xbf16, #tpu.memory_space<vmem>>, vector<128x128xbf16>
    %cst_28 = arith.constant dense<0.000000e+00> : vector<512x128xf32>
    %30 = tpu.matmul %28, %29, %cst_28 {dimension_numbers = #tpu.dot_dimension_numbers<[1], [0], [0], [1], [0, 0, 1, 1], [], []>} : vector<512x128xbf16>, vector<128x128xbf16>, vector<512x128xf32> -> vector<512x128xf32>
    %cst_29 = arith.constant 0.000000e+00 : f32
    %31 = vector.broadcast %cst_29 : f32 to vector<512x128xf32>
    %32 = arith.maximumf %30, %31 : vector<512x128xf32>
    %33 = arith.truncf %32 : vector<512x128xf32> to vector<512x128xbf16>
    %c0_30 = arith.constant 0 : index
    %c0_31 = arith.constant 0 : index
    %34 = vector.load %arg7[%c0_30, %c0_31] : memref<128x64xbf16, #tpu.memory_space<vmem>>, vector<128x64xbf16>
    %cst_32 = arith.constant dense<0.000000e+00> : vector<512x64xf32>
    %35 = tpu.matmul %33, %34, %cst_32 {dimension_numbers = #tpu.dot_dimension_numbers<[1], [0], [0], [1], [0, 0, 1, 1], [], []>} : vector<512x128xbf16>, vector<128x64xbf16>, vector<512x64xf32> -> vector<512x64xf32>
    %c0_33 = arith.constant 0 : index
    %c0_34 = arith.constant 0 : index
    %36 = vector.load %arg8[%c0_33, %c0_34] : memref<1x64xf32, #tpu.memory_space<vmem>>, vector<1x64xf32>
    %37 = vector.broadcast %36 : vector<1x64xf32> to vector<512x64xf32>
    %38 = arith.addf %35, %37 : vector<512x64xf32>
    %39 = arith.truncf %38 : vector<512x64xf32> to vector<512x64xbf16>
    %c0_35 = arith.constant 0 : index
    %c0_36 = arith.constant 0 : index
    %40 = vector.load %arg2[%c0_35, %c0_36] : memref<512x128xbf16, #tpu.memory_space<vmem>>, vector<128x128xbf16>
    %41 = vector.extract_strided_slice %39 {offsets = [0, 0], sizes = [128, 64], strides = [1, 1]} : vector<512x64xbf16> to vector<128x64xbf16>
    %cst_37 = arith.constant dense<0.000000e+00> : vector<128x64xf32>
    %42 = tpu.matmul %40, %41, %cst_37 {dimension_numbers = #tpu.dot_dimension_numbers<[1], [0], [0], [1], [0, 0, 1, 1], [], []>} : vector<128x128xbf16>, vector<128x64xbf16>, vector<128x64xf32> -> vector<128x64xf32>
    %c0_38 = arith.constant 0 : index
    %c0_39 = arith.constant 0 : index
    %43 = vector.load %arg11[%c0_38, %c0_39] : memref<128x256xf32, #tpu.memory_space<vmem>>, vector<128x64xf32>
    tpu.vector_store %arg11[%c0_38, %c0_39], %42 {strides = array<i32>} : memref<128x256xf32, #tpu.memory_space<vmem>>, vector<128x64xf32>,
    %c128_40 = arith.constant 128 : index
    %c0_41 = arith.constant 0 : index
    %44 = vector.load %arg2[%c128_40, %c0_41] : memref<512x128xbf16, #tpu.memory_space<vmem>>, vector<128x128xbf16>
    %45 = vector.extract_strided_slice %39 {offsets = [128, 0], sizes = [128, 64], strides = [1, 1]} : vector<512x64xbf16> to vector<128x64xbf16>
    %cst_42 = arith.constant dense<0.000000e+00> : vector<128x64xf32>
    %46 = tpu.matmul %44, %45, %cst_42 {dimension_numbers = #tpu.dot_dimension_numbers<[1], [0], [0], [1], [0, 0, 1, 1], [], []>} : vector<128x128xbf16>, vector<128x64xbf16>, vector<128x64xf32> -> vector<128x64xf32>
    %c0_43 = arith.constant 0 : index
    %c64_44 = arith.constant 64 : index
    %47 = vector.load %arg11[%c0_43, %c64_44] : memref<128x256xf32, #tpu.memory_space<vmem>>, vector<128x64xf32>
    tpu.vector_store %arg11[%c0_43, %c64_44], %46 {strides = array<i32>} : memref<128x256xf32, #tpu.memory_space<vmem>>, vector<128x64xf32>,
    %c256_45 = arith.constant 256 : index
    %c0_46 = arith.constant 0 : index
    %48 = vector.load %arg2[%c256_45, %c0_46] : memref<512x128xbf16, #tpu.memory_space<vmem>>, vector<128x128xbf16>
    %49 = vector.extract_strided_slice %39 {offsets = [256, 0], sizes = [128, 64], strides = [1, 1]} : vector<512x64xbf16> to vector<128x64xbf16>
    %cst_47 = arith.constant dense<0.000000e+00> : vector<128x64xf32>
    %50 = tpu.matmul %48, %49, %cst_47 {dimension_numbers = #tpu.dot_dimension_numbers<[1], [0], [0], [1], [0, 0, 1, 1], [], []>} : vector<128x128xbf16>, vector<128x64xbf16>, vector<128x64xf32> -> vector<128x64xf32>
    %c0_48 = arith.constant 0 : index
    %c128_49 = arith.constant 128 : index
    %51 = vector.load %arg11[%c0_48, %c128_49] : memref<128x256xf32, #tpu.memory_space<vmem>>, vector<128x64xf32>
    tpu.vector_store %arg11[%c0_48, %c128_49], %50 {strides = array<i32>} : memref<128x256xf32, #tpu.memory_space<vmem>>, vector<128x64xf32>,
    %c384_50 = arith.constant 384 : index
    %c0_51 = arith.constant 0 : index
    %52 = vector.load %arg2[%c384_50, %c0_51] : memref<512x128xbf16, #tpu.memory_space<vmem>>, vector<128x128xbf16>
    %53 = vector.extract_strided_slice %39 {offsets = [384, 0], sizes = [128, 64], strides = [1, 1]} : vector<512x64xbf16> to vector<128x64xbf16>
    %cst_52 = arith.constant dense<0.000000e+00> : vector<128x64xf32>
    %54 = tpu.matmul %52, %53, %cst_52 {dimension_numbers = #tpu.dot_dimension_numbers<[1], [0], [0], [1], [0, 0, 1, 1], [], []>} : vector<128x128xbf16>, vector<128x64xbf16>, vector<128x64xf32> -> vector<128x64xf32>
    %c0_53 = arith.constant 0 : index
    %c192_54 = arith.constant 192 : index
    %55 = vector.load %arg11[%c0_53, %c192_54] : memref<128x256xf32, #tpu.memory_space<vmem>>, vector<128x64xf32>
    tpu.vector_store %arg11[%c0_53, %c192_54], %54 {strides = array<i32>} : memref<128x256xf32, #tpu.memory_space<vmem>>, vector<128x64xf32>,
    %c0_55 = arith.constant 0 : index
    %c0_56 = arith.constant 0 : index
    %56 = vector.load %arg10[%c0_55, %c0_56] : memref<128x256xf32, #tpu.memory_space<vmem>>, vector<128x256xf32>
    %c0_57 = arith.constant 0 : index
    %c0_58 = arith.constant 0 : index
    %57 = vector.load %arg11[%c0_57, %c0_58] : memref<128x256xf32, #tpu.memory_space<vmem>>, vector<128x256xf32>
    %cst_59 = arith.constant dense<0.000000e+00> : vector<128x128xf32>
    %58 = tpu.matmul %56, %57, %cst_59 {dimension_numbers = #tpu.dot_dimension_numbers<[1], [1], [0], [0], [0, 0, 1, 0], [], []>} : vector<128x256xf32>, vector<128x256xf32>, vector<128x128xf32> -> vector<128x128xf32>
    %c0_60 = arith.constant 0 : index
    %c0_61 = arith.constant 0 : index
    %59 = vector.load %arg9[%c0_60, %c0_61] : memref<128x128xf32, #tpu.memory_space<vmem>>, vector<128x128xf32>
    tpu.vector_store %arg9[%c0_60, %c0_61], %58 {strides = array<i32>} : memref<128x128xf32, #tpu.memory_space<vmem>>, vector<128x128xf32>,
    return
  }
  func.func @transform_0(%arg0: i32) -> (i32, i32) {
    %c0_i32 = arith.constant 0 : i32
    %c0_i32_0 = arith.constant 0 : i32
    %c0_i32_1 = arith.constant 0 : i32
    return %c0_i32, %c0_i32_0 : i32, i32
  }
  func.func @transform_1(%arg0: i32) -> (i32, i32) {
    %c0_i32 = arith.constant 0 : i32
    %c0_i32_0 = arith.constant 0 : i32
    %c0_i32_1 = arith.constant 0 : i32
    return %c0_i32, %c0_i32_0 : i32, i32
  }
  func.func @transform_2(%arg0: i32) -> (i32, i32) {
    %c0_i32 = arith.constant 0 : i32
    %c0_i32_0 = arith.constant 0 : i32
    %c0_i32_1 = arith.constant 0 : i32
    return %c0_i32, %c0_i32_0 : i32, i32
  }
  func.func @transform_3(%arg0: i32) -> (i32, i32) {
    %c0_i32 = arith.constant 0 : i32
    %c0_i32_0 = arith.constant 0 : i32
    %c0_i32_1 = arith.constant 0 : i32
    return %c0_i32, %c0_i32_0 : i32, i32
  }
  func.func @transform_4(%arg0: i32) -> (i32, i32) {
    %c0_i32 = arith.constant 0 : i32
    %c0_i32_0 = arith.constant 0 : i32
    %c0_i32_1 = arith.constant 0 : i32
    return %c0_i32, %c0_i32_0 : i32, i32
  }
  func.func @transform_5(%arg0: i32) -> (i32, i32) {
    %c0_i32 = arith.constant 0 : i32
    %c0_i32_0 = arith.constant 0 : i32
    %c0_i32_1 = arith.constant 0 : i32
    return %c0_i32, %c0_i32_0 : i32, i32
  }
  func.func @transform_6(%arg0: i32) -> (i32, i32) {
    %c0_i32 = arith.constant 0 : i32
    %c0_i32_0 = arith.constant 0 : i32
    %c0_i32_1 = arith.constant 0 : i32
    return %c0_i32, %c0_i32_0 : i32, i32
  }
  func.func @transform_7(%arg0: i32) -> (i32, i32) {
    %c0_i32 = arith.constant 0 : i32
    %c0_i32_0 = arith.constant 0 : i32
    %c0_i32_1 = arith.constant 0 : i32
    return %c0_i32, %c0_i32_0 : i32, i32
  }
  func.func @transform_8(%arg0: i32) -> (i32, i32) {
    %c0_i32 = arith.constant 0 : i32
    %c0_i32_0 = arith.constant 0 : i32
    %c0_i32_1 = arith.constant 0 : i32
    return %c0_i32, %c0_i32_0 : i32, i32
  }
}

</mosaic_0001>

<bundles_post_ra>
// kernel: tpu_custom_call.1
= control target key start
LH: loop header
LB: loop body
LE: loop exit
PB: predicated region body
PF: predicated region fallthrough
CT: control target
= control target key end

     0   :  { %13 = vsyncpa [#allocation5], 0  ;;  %s5533_s0 = inlined_call_operand.hbm [shape: bf16[512,128], index: 0, kind: input, shape index: {}]   ;;  %s5534_s1 = inlined_call_operand.hbm [shape: bf16[512,128], index: 1, kind: input, shape index: {}]   ;;  %s5535_s2 = inlined_call_operand.vmem [shape: bf16[128,128], index: 2, kind: input, shape index: {}]   ;;  %s5536_s3 = inlined_call_operand.vmem [shape: bf16[128,128], index: 3, kind: input, shape index: {}]   ;;  %s5537_s4 = inlined_call_operand.vmem [shape: bf16[128,64], index: 4, kind: input, shape index: {}]   ;;  %s5538_s5 = inlined_call_operand.vmem [shape: f32[1,64], index: 5, kind: input, shape index: {}]   ;;  %s5539_s6 = inlined_call_operand.vmem [shape: bf16[128,64], index: 6, kind: input, shape index: {}]   ;;  %s5540_s7 = inlined_call_operand.vmem [shape: f32[1,64], index: 7, kind: input, shape index: {}]   ;;  %s5541_s8 = inlined_call_operand.hbm [shape: f32[128,128], index: 8, kind: output, shape index: {}]  }
   0x1   :  { %14 = vsyncpa [#allocation8], 0 }
   0x2   :  { %15 = vsyncpa [#allocation6], 0  ;;  %s20_s29 = sshll.u32 %s5533_s0, 4  ;;  %s4642_s30 = smov [#allocation4]   ;;  %s21_s29 = int_to_ptr.hbm [resolvable:$true] %s20_s29 }
   0x3   :  { %s22_s9 = sshll.u32 %s4642_s30, 4  ;;  %s33_s12 = sshll.u32 %s5534_s1, 4  ;;  %s23_s9 = int_to_ptr.vmem [resolvable:$true] %s22_s9  ;;  %s34_s12 = int_to_ptr.hbm [resolvable:$true] %s33_s12 }
   0x4   :  { %s4643_s13 = smov 64   ;;  %s4644_s14 = smov 4  }
   0x5   :  { %28 = dma.hbm_to_vmem [thread:$0]  %s21_s29, 4096, %s23_s9, [#allocation5], %s4643_s13, %s4643_s13, %s4644_s14  }
   0x6   :  { %s4645_s15 = smov [#allocation7]  }
   0x7   :  { %s35_s16 = sshll.u32 %s4645_s15, 4  ;;  %s36_s16 = int_to_ptr.vmem [resolvable:$true] %s35_s16 }
   0x8   :  { %41 = dma.hbm_to_vmem [thread:$0]  %s34_s12, 4096, %s36_s16, [#allocation8], %s4643_s13, %s4643_s13, %s4644_s14  }
   0x9   :  { %4636 = dma.done.wait [#allocation5], 4096  }
   0xa   :  { %4637 = vsyncadd [#allocation5], 4294963200 }
   0xb   :  { %4638 = dma.done.wait [#allocation8], 4096  }
   0xc   :  { %4639 = vsyncadd [#allocation8], 4294963200  ;;  %v4417_v0 = vld [vmem:[%s5535_s2 + $0x38] sm:$0xff]  ;;  %v4416_v1 = vld [vmem:[%s5535_s2 + $0x30] sm:$0xff]  ;;  %vm1109_vm0 = vcmask 523264   ;;  %vm1351_vm1 = vcmask 1048064  }
   0xd   :  { %382 = vmatpush.bf16.msra.mxu0 %v4417_v0  ;;  %4538 = vmatpush.bf16.msra.mxu2 %v4417_v0  ;;  %v4415_v2 = vld [vmem:[%s5535_s2 + $0x28] sm:$0xff]  ;;  %v4414_v3 = vld [vmem:[%s5535_s2 + $0x20] sm:$0xff]  ;;  %v4413_v4 = vld [vmem:[%s5535_s2 + $0x18] sm:$0xff]  ;;  %s3724_s11 = sshll.u32 %s5541_s8, 4  ;;  %s4648_s12 = smov 8   ;;  %s3725_s11 = int_to_ptr.hbm [resolvable:$true] %s3724_s11 }
   0xe   :  { %v4412_v5 = vld [vmem:[%s5535_s2 + $0x10] sm:$0xff]  ;;  %v4411_v6 = vld [vmem:[%s5535_s2 + $0x8] sm:$0xff]  ;;  %v4410_v7 = vld [vmem:[%s5535_s2] sm:$0xff]  ;;  %s4647_s2 = smov 128  }
   0xf   :  { %v4378_v8 = vld [vmem:[#allocation4] sm:$0xff]  ;;  %v4379_v9 = vld [vmem:[#allocation4 + $0x8] sm:$0xff]  ;;  %v4380_v10 = vld [vmem:[#allocation4 + $0x10] sm:$0xff] }
  0x10   :  { %v4381_v11 = vld [vmem:[#allocation4 + $0x18] sm:$0xff]  ;;  %v4382_v12 = vld [vmem:[#allocation4 + $0x20] sm:$0xff]  ;;  %v4424_v14 = vld [vmem:[%s5537_s4 + $0x30] sm:$0xff] }
  0x11   :  { %383 = vmatpush.bf16.msra.mxu0 %v4416_v1  ;;  %4539 = vmatpush.bf16.msra.mxu2 %v4416_v1  ;;  %v4425_v13 = vld [vmem:[%s5537_s4 + $0x38] sm:$0xff]  ;;  %v4383_v15 = vld [vmem:[#allocation4 + $0x28] sm:$0xff]  ;;  %v4422_v17 = vld [vmem:[%s5537_s4 + $0x20] sm:$0xff] }
  0x12   :  { %715 = vmatpush.bf16.msra.mxu1 %v4425_v13  ;;  %4546 = vmatpush.bf16.msra.mxu3 %v4425_v13  ;;  %v4423_v16 = vld [vmem:[%s5537_s4 + $0x28] sm:$0xff]  ;;  %v4421_v18 = vld [vmem:[%s5537_s4 + $0x18] sm:$0xff]  ;;  %v4384_v19 = vld [vmem:[#allocation4 + $0x30] sm:$0xff] }
  0x13   :  { %v4420_v20 = vld [vmem:[%s5537_s4 + $0x10] sm:$0xff]  ;;  %v4419_v21 = vld [vmem:[%s5537_s4 + $0x8] sm:$0xff]  ;;  %v4418_v22 = vld [vmem:[%s5537_s4] sm:$0xff] }
  0x14   :  { %v4385_v23 = vld [vmem:[#allocation4 + $0x38] sm:$0xff]  ;;  %v4386_v24 = vld [vmem:[#allocation4 + $0x40] sm:$0xff]  ;;  %v4387_v30 = vld [vmem:[#allocation4 + $0x48] sm:$0xff] }
  0x15   :  { %384 = vmatpush.bf16.msra.mxu0 %v4415_v2  ;;  %4540 = vmatpush.bf16.msra.mxu2 %v4415_v2  ;;  %v4388_v36 = vld [vmem:[#allocation4 + $0x50] sm:$0xff]  ;;  %v4389_v42 = vld [vmem:[#allocation4 + $0x58] sm:$0xff]  ;;  %v4390_v48 = vld [vmem:[#allocation4 + $0x60] sm:$0xff] }
  0x16   :  { %716 = vmatpush.bf16.msra.mxu1 %v4424_v14  ;;  %4547 = vmatpush.bf16.msra.mxu3 %v4424_v14  ;;  %v4391_v54 = vld [vmem:[#allocation4 + $0x68] sm:$0xff]  ;;  %v4392_v60 = vld [vmem:[#allocation4 + $0x70] sm:$0xff]  ;;  %v4393_v2 = vld [vmem:[#allocation4 + $0x78] sm:$0xff] }
  0x17   :  { %v4755_v14 = vld [vmem:[%s5538_s5] ss:$0 sm:$0xff] }
  0x19   :  { %385 = vmatpush.bf16.msra.mxu0 %v4414_v3  ;;  %4541 = vmatpush.bf16.msra.mxu2 %v4414_v3 }
  0x1a   :  { %717 = vmatpush.bf16.msra.mxu1 %v4423_v16  ;;  %4548 = vmatpush.bf16.msra.mxu3 %v4423_v16 }
  0x1d   :  { %386 = vmatpush.bf16.msra.mxu0 %v4413_v4  ;;  %4542 = vmatpush.bf16.msra.mxu2 %v4413_v4 }
  0x1e   :  { %718 = vmatpush.bf16.msra.mxu1 %v4422_v17  ;;  %4549 = vmatpush.bf16.msra.mxu3 %v4422_v17  ;;  %v4395_v17 = vld [vmem:[#allocation4 + $0x88] sm:$0xff] }
  0x21   :  { %387 = vmatpush.bf16.msra.mxu0 %v4412_v5  ;;  %4543 = vmatpush.bf16.msra.mxu2 %v4412_v5 }
  0x22   :  { %719 = vmatpush.bf16.msra.mxu1 %v4421_v18  ;;  %4550 = vmatpush.bf16.msra.mxu3 %v4421_v18 }
  0x25   :  { %388 = vmatpush.bf16.msra.mxu0 %v4411_v6  ;;  %4544 = vmatpush.bf16.msra.mxu2 %v4411_v6 }
  0x26   :  { %720 = vmatpush.bf16.msra.mxu1 %v4420_v20  ;;  %4551 = vmatpush.bf16.msra.mxu3 %v4420_v20 }
  0x29   :  { %389 = vmatpush.bf16.msra.mxu0 %v4410_v7  ;;  %4545 = vmatpush.bf16.msra.mxu2 %v4410_v7 }
  0x2a   :  { %721 = vmatpush.bf16.msra.mxu1 %v4419_v21  ;;  %4552 = vmatpush.bf16.msra.mxu3 %v4419_v21 }
  0x2c   :  { %390 = vmatmul.bf16.vlgmr.msra.gmra.mxu0 %v4378_v8  ;;  %v4394_v8 = vld [vmem:[#allocation4 + $0x80] sm:$0xff] }
  0x2e   :  { %722 = vmatpush.bf16.msra.mxu1 %v4418_v22  ;;  %4553 = vmatpush.bf16.msra.mxu3 %v4418_v22 }
  0x3c   :  { %395 = vmatmul.bf16.gmra.mxu0 %v4379_v9 }
  0x4c   :  { %400 = vmatmul.bf16.gmra.mxu0 %v4380_v10 }
  0x5c   :  { %405 = vmatmul.bf16.gmra.mxu0 %v4381_v11 }
  0x6c   :  { %410 = vmatmul.bf16.gmra.mxu0 %v4382_v12 }
  0x7c   :  { %415 = vmatmul.bf16.gmra.mxu0 %v4383_v15 }
  0x8c   :  { %420 = vmatmul.bf16.gmra.mxu0 %v4384_v19 }
  0x9c   :  { %425 = vmatmul.bf16.gmra.mxu0 %v4385_v23 }
  0xa9   :  { %v391_v25 = vpop.f32.mrf.mxu0 }
  0xaa   :  { %v551_v27 = vmax.f32 %v391_v25, 0.0 }
  0xac   :  { %430 = vmatmul.bf16.gmra.mxu0 %v4386_v24 }
  0xb1   :  { %v393_v26 = vpop.f32.mrf.mxu0 }
  0xb2   :  { %v552_v28 = vmax.f32 %v393_v26, 0.0 }
  0xb4   :  { %v615_v29 = vpack.c.bf16 %v552_v28, %v551_v27 }
  0xb6   :  { %723 = vmatmul.bf16.vlgmr.msra.gmra.mxu1 %v615_v29 }
  0xb9   :  { %v396_v31 = vpop.f32.mrf.mxu0 }
  0xba   :  { %v553_v33 = vmax.f32 %v396_v31, 0.0 }
  0xbc   :  { %435 = vmatmul.bf16.gmra.mxu0 %v4387_v30 }
  0xc1   :  { %v398_v32 = vpop.f32.mrf.mxu0 }
  0xc2   :  { %v554_v34 = vmax.f32 %v398_v32, 0.0  ;;  %v4396_v32 = vld [vmem:[#allocation4 + $0x90] sm:$0xff] }
  0xc4   :  { %v616_v35 = vpack.c.bf16 %v554_v34, %v553_v33 }
  0xc6   :  { %728 = vmatmul.bf16.gmra.mxu1 %v616_v35 }
  0xc9   :  { %v401_v37 = vpop.f32.mrf.mxu0 }
  0xca   :  { %v555_v39 = vmax.f32 %v401_v37, 0.0 }
  0xcc   :  { %440 = vmatmul.bf16.gmra.mxu0 %v4388_v36 }
  0xd1   :  { %v403_v38 = vpop.f32.mrf.mxu0 }
  0xd2   :  { %v556_v40 = vmax.f32 %v403_v38, 0.0 }
  0xd4   :  { %v617_v41 = vpack.c.bf16 %v556_v40, %v555_v39 }
  0xd6   :  { %733 = vmatmul.bf16.gmra.mxu1 %v617_v41 }
  0xd9   :  { %v406_v43 = vpop.f32.mrf.mxu0 }
  0xda   :  { %v557_v45 = vmax.f32 %v406_v43, 0.0 }
  0xdc   :  { %445 = vmatmul.bf16.gmra.mxu0 %v4389_v42 }
  0xe1   :  { %v408_v44 = vpop.f32.mrf.mxu0 }
  0xe2   :  { %v558_v46 = vmax.f32 %v408_v44, 0.0 }
  0xe4   :  { %v618_v47 = vpack.c.bf16 %v558_v46, %v557_v45 }
  0xe6   :  { %738 = vmatmul.bf16.gmra.mxu1 %v618_v47  ;;  %v4397_v47 = vld [vmem:[#allocation4 + $0x98] sm:$0xff] }
  0xe9   :  { %v411_v49 = vpop.f32.mrf.mxu0 }
  0xea   :  { %v559_v51 = vmax.f32 %v411_v49, 0.0 }
  0xec   :  { %450 = vmatmul.bf16.gmra.mxu0 %v4390_v48 }
  0xf1   :  { %v413_v50 = vpop.f32.mrf.mxu0 }
  0xf2   :  { %v560_v52 = vmax.f32 %v413_v50, 0.0 }
  0xf4   :  { %v619_v53 = vpack.c.bf16 %v560_v52, %v559_v51 }
  0xf6   :  { %743 = vmatmul.bf16.gmra.mxu1 %v619_v53 }
  0xf9   :  { %v416_v55 = vpop.f32.mrf.mxu0 }
  0xfa   :  { %v561_v57 = vmax.f32 %v416_v55, 0.0 }
  0xfc   :  { %455 = vmatmul.bf16.gmra.mxu0 %v4391_v54 }
 0x101   :  { %v418_v56 = vpop.f32.mrf.mxu0 }
 0x102   :  { %v562_v58 = vmax.f32 %v418_v56, 0.0 }
 0x104   :  { %v620_v59 = vpack.c.bf16 %v562_v58, %v561_v57 }
 0x106   :  { %748 = vmatmul.bf16.gmra.mxu1 %v620_v59 }
 0x109   :  { %v421_v61 = vpop.f32.mrf.mxu0 }
 0x10a   :  { %v563_v63 = vmax.f32 %v421_v61, 0.0 }
 0x10c   :  { %460 = vmatmul.bf16.gmra.mxu0 %v4392_v60 }
 0x111   :  { %v423_v62 = vpop.f32.mrf.mxu0 }
 0x112   :  { %v564_v0 = vmax.f32 %v423_v62, 0.0  ;;  %v4398_v62 = vld [vmem:[#allocation4 + $0xa0] sm:$0xff] }
 0x114   :  { %v621_v1 = vpack.c.bf16 %v564_v0, %v563_v63 }
 0x116   :  { %753 = vmatmul.bf16.gmra.mxu1 %v621_v1 }
 0x119   :  { %v426_v3 = vpop.f32.mrf.mxu0 }
 0x11a   :  { %v565_v5 = vmax.f32 %v426_v3, 0.0 }
 0x11c   :  { %465 = vmatmul.bf16.gmra.mxu0 %v4393_v2 }
 0x121   :  { %v428_v4 = vpop.f32.mrf.mxu0 }
 0x122   :  { %v566_v6 = vmax.f32 %v428_v4, 0.0 }
 0x124   :  { %v622_v7 = vpack.c.bf16 %v566_v6, %v565_v5 }
 0x126   :  { %758 = vmatmul.bf16.gmra.mxu1 %v622_v7 }
 0x129   :  { %v431_v9 = vpop.f32.mrf.mxu0 }
 0x12a   :  { %v567_v11 = vmax.f32 %v431_v9, 0.0 }
 0x12c   :  { %470 = vmatmul.bf16.gmra.mxu0 %v4394_v8 }
 0x131   :  { %v433_v10 = vpop.f32.mrf.mxu0 }
 0x132   :  { %v568_v12 = vmax.f32 %v433_v10, 0.0 }
 0x133   :  { %v724_v13 = vpop.f32.mrf.mxu1 }
 0x134   :  { %v623_v15 = vpack.c.bf16 %v568_v12, %v567_v11  ;;  %v725_v16 = vadd.f32 %v4755_v14, %v724_v13  ;;  %v4399_v12 = vld [vmem:[#allocation4 + $0xa8] sm:$0xff] }
 0x136   :  { %763 = vmatmul.bf16.gmra.mxu1 %v623_v15  ;;  %v884_v20 = vpack.c.bf16 %v725_v16, %v725_v16 }
 0x138   :  { %v4759_v23 = vunpack.c.l.b16 %v884_v20 }
 0x139   :  { %v436_v18 = vpop.f32.mrf.mxu0 }
 0x13a   :  { %v569_v26 = vmax.f32 %v436_v18, 0.0 }
 0x13b   :  { %v726_v19 = vpop.f32.mrf.mxu1 }
 0x13c   :  { %v727_v21 = vadd.f32 %v4755_v14, %v726_v19  ;;  %475 = vmatmul.bf16.gmra.mxu0 %v4395_v17  ;;  %v4406_v19 = vld [vmem:[#allocation4 + $0xe0] sm:$0xff] }
 0x13d   :  { %530 = vmatmul.bf16.vlgmr.msra.gmra.mxu2 %v4406_v19 }
 0x13e   :  { %v885_v22 = vpack.c.bf16 %v727_v21, %v727_v21 }
 0x140   :  { %v4761_v24 = vunpack.c.l.b16 %v885_v22  ;;  %v4400_v22 = vld [vmem:[#allocation4 + $0xb0] sm:$0xff] }
 0x141   :  { %v438_v25 = vpop.f32.mrf.mxu0 }
 0x142   :  { %v570_v27 = vmax.f32 %v438_v25, 0.0  ;;  %v1044_v28 = vpack.c.b16 %v4761_v24, %v4759_v23 }
 0x143   :  { %v729_v29 = vpop.f32.mrf.mxu1 }
 0x144   :  { %v624_v30 = vpack.c.bf16 %v570_v27, %v569_v26  ;;  %v730_v31 = vadd.f32 %v4755_v14, %v729_v29 }
 0x146   :  { %768 = vmatmul.bf16.gmra.mxu1 %v624_v30  ;;  %v886_v35 = vpack.c.bf16 %v730_v31, %v730_v31  ;;  %v4407_v31 = vld [vmem:[#allocation4 + $0xe8] sm:$0xff] }
 0x148   :  { %v4767_v38 = vunpack.c.l.b16 %v886_v35 }
 0x149   :  { %v441_v33 = vpop.f32.mrf.mxu0 }
 0x14a   :  { %v571_v41 = vmax.f32 %v441_v33, 0.0 }
 0x14b   :  { %v731_v34 = vpop.f32.mrf.mxu1 }
 0x14c   :  { %v732_v36 = vadd.f32 %v4755_v14, %v731_v34  ;;  %480 = vmatmul.bf16.gmra.mxu0 %v4396_v32  ;;  %v4401_v34 = vld [vmem:[#allocation4 + $0xb8] sm:$0xff] }
 0x14d   :  { %535 = vmatmul.bf16.gmra.mxu2 %v4407_v31 }
 0x14e   :  { %v887_v37 = vpack.c.bf16 %v732_v36, %v732_v36 }
 0x150   :  { %v4769_v39 = vunpack.c.l.b16 %v887_v37 }
 0x151   :  { %v443_v40 = vpop.f32.mrf.mxu0 }
 0x152   :  { %v572_v42 = vmax.f32 %v443_v40, 0.0  ;;  %v1045_v43 = vpack.c.b16 %v4769_v39, %v4767_v38  ;;  %v4405_v39 = vld [vmem:[#allocation4 + $0xd8] sm:$0xff] }
 0x153   :  { %v734_v44 = vpop.f32.mrf.mxu1 }
 0x154   :  { %v625_v45 = vpack.c.bf16 %v572_v42, %v571_v41  ;;  %v735_v46 = vadd.f32 %v4755_v14, %v734_v44  ;;  %v4408_v42 = vld [vmem:[#allocation4 + $0xf0] sm:$0xff] }
 0x156   :  { %773 = vmatmul.bf16.gmra.mxu1 %v625_v45  ;;  %v888_v50 = vpack.c.bf16 %v735_v46, %v735_v46 }
 0x158   :  { %v4775_v53 = vunpack.c.l.b16 %v888_v50 }
 0x159   :  { %v446_v48 = vpop.f32.mrf.mxu0 }
 0x15a   :  { %v573_v56 = vmax.f32 %v446_v48, 0.0 }
 0x15b   :  { %v736_v49 = vpop.f32.mrf.mxu1 }
 0x15c   :  { %v737_v51 = vadd.f32 %v4755_v14, %v736_v49  ;;  %485 = vmatmul.bf16.gmra.mxu0 %v4397_v47  ;;  %v4402_v47 = vld [vmem:[#allocation4 + $0xc0] sm:$0xff] }
 0x15d   :  { %540 = vmatmul.bf16.gmra.mxu2 %v4408_v42 }
 0x15e   :  { %v889_v52 = vpack.c.bf16 %v737_v51, %v737_v51 }
 0x160   :  { %v4777_v54 = vunpack.c.l.b16 %v889_v52 }
 0x161   :  { %v448_v55 = vpop.f32.mrf.mxu0 }
 0x162   :  { %v574_v57 = vmax.f32 %v448_v55, 0.0  ;;  %v1046_v58 = vpack.c.b16 %v4777_v54, %v4775_v53 }
 0x163   :  { %v739_v59 = vpop.f32.mrf.mxu1 }
 0x164   :  { %v626_v60 = vpack.c.bf16 %v574_v57, %v573_v56  ;;  %v740_v61 = vadd.f32 %v4755_v14, %v739_v59 }
 0x166   :  { %778 = vmatmul.bf16.gmra.mxu1 %v626_v60  ;;  %v890_v1 = vpack.c.bf16 %v740_v61, %v740_v61 }
 0x168   :  { %v4783_v4 = vunpack.c.l.b16 %v890_v1 }
 0x169   :  { %v451_v63 = vpop.f32.mrf.mxu0 }
 0x16a   :  { %v575_v7 = vmax.f32 %v451_v63, 0.0 }
 0x16b   :  { %v741_v0 = vpop.f32.mrf.mxu1 }
 0x16c   :  { %v742_v2 = vadd.f32 %v4755_v14, %v741_v0  ;;  %490 = vmatmul.bf16.gmra.mxu0 %v4398_v62 }
 0x16e   :  { %v891_v3 = vpack.c.bf16 %v742_v2, %v742_v2 }
 0x170   :  { %v4785_v5 = vunpack.c.l.b16 %v891_v3 }
 0x171   :  { %v453_v6 = vpop.f32.mrf.mxu0 }
 0x172   :  { %v576_v8 = vmax.f32 %v453_v6, 0.0  ;;  %v1047_v9 = vpack.c.b16 %v4785_v5, %v4783_v4 }
 0x173   :  { %v4789_v10 = vpop.f32.mrf.mxu1 }
 0x174   :  { %v627_v11 = vpack.c.bf16 %v576_v8, %v575_v7 }
 0x176   :  { %783 = vmatmul.bf16.gmra.mxu1 %v627_v11  ;;  %v4409_v11 = vld [vmem:[#allocation4 + $0xf8] sm:$0xff] }
 0x177   :  { %545 = vmatmul.bf16.gmra.mxu2 %v4409_v11 }
 0x179   :  { %v456_v13 = vpop.f32.mrf.mxu0 }
 0x17a   :  { %v577_v17 = vmax.f32 %v456_v13, 0.0  ;;  %v745_v13 = vadd.f32 %v4755_v14, %v4789_v10 }
 0x17b   :  { %v746_v15 = vpop.f32.mrf.mxu1 }
 0x17c   :  { %495 = vmatmul.bf16.gmra.mxu0 %v4399_v12  ;;  %v747_v0 = vadd.f32 %v4755_v14, %v746_v15 }
 0x17e   :  { %v893_v19 = vpack.c.bf16 %v747_v0, %v747_v0 }
 0x181   :  { %v458_v16 = vpop.f32.mrf.mxu0 }
 0x182   :  { %v578_v18 = vmax.f32 %v458_v16, 0.0 }
 0x183   :  { %v749_v20 = vpop.f32.mrf.mxu1 }
 0x184   :  { %v628_v21 = vpack.c.bf16 %v578_v18, %v577_v17  ;;  %v750_v60 = vadd.f32 %v4755_v14, %v749_v20 }
 0x186   :  { %788 = vmatmul.bf16.gmra.mxu1 %v628_v21  ;;  %v894_v16 = vpack.c.bf16 %v750_v60, %v750_v60  ;;  %v892_v21 = vpack.c.bf16 %v745_v13, %v745_v13 }
 0x188   :  { %v1036_v10 = vunpack.c.l.b16 %v892_v21 }
 0x189   :  { %v461_v25 = vpop.f32.mrf.mxu0 }
 0x18a   :  { %v579_v29 = vmax.f32 %v461_v25, 0.0 }
 0x18b   :  { %v751_v26 = vpop.f32.mrf.mxu1 }
 0x18c   :  { %500 = vmatmul.bf16.gmra.mxu0 %v4400_v22  ;;  %v752_v56 = vadd.f32 %v4755_v14, %v751_v26  ;;  %v1038_v22 = vunpack.c.l.b16 %v894_v16  ;;  %v4403_v26 = vld [vmem:[#allocation4 + $0xc8] sm:$0xff] }
 0x18e   :  { %v895_v1 = vpack.c.bf16 %v752_v56, %v752_v56 }
 0x190   :  { %v1039_v20 = vunpack.c.l.b16 %v895_v1 }
 0x191   :  { %v463_v27 = vpop.f32.mrf.mxu0 }
 0x192   :  { %v580_v30 = vmax.f32 %v463_v27, 0.0 }
 0x193   :  { %v754_v32 = vpop.f32.mrf.mxu1 }
 0x194   :  { %v629_v33 = vpack.c.bf16 %v580_v30, %v579_v29  ;;  %v755_v51 = vadd.f32 %v4755_v14, %v754_v32  ;;  %v1037_v29 = vunpack.c.l.b16 %v893_v19  ;;  %v1049_v30 = vpack.c.b16 %v1039_v20, %v1038_v22 }
 0x196   :  { %793 = vmatmul.bf16.gmra.mxu1 %v629_v33  ;;  %v896_v61 = vpack.c.bf16 %v755_v51, %v755_v51 }
 0x198   :  { %v1040_v17 = vunpack.c.l.b16 %v896_v61 }
 0x199   :  { %v466_v35 = vpop.f32.mrf.mxu0 }
 0x19a   :  { %v581_v40 = vmax.f32 %v466_v35, 0.0  ;;  %v1048_v35 = vpack.c.b16 %v1037_v29, %v1036_v10 }
 0x19b   :  { %v756_v36 = vpop.f32.mrf.mxu1 }
 0x19c   :  { %505 = vmatmul.bf16.gmra.mxu0 %v4401_v34  ;;  %v757_v49 = vadd.f32 %v4755_v14, %v756_v36 }
 0x19e   :  { %v897_v57 = vpack.c.bf16 %v757_v49, %v757_v49 }
 0x1a0   :  { %v1041_v3 = vunpack.c.l.b16 %v897_v57 }
 0x1a1   :  { %v468_v37 = vpop.f32.mrf.mxu0 }
 0x1a2   :  { %v582_v41 = vmax.f32 %v468_v37, 0.0  ;;  %v1050_v15 = vpack.c.b16 %v1041_v3, %v1040_v17 }
 0x1a3   :  { %v759_v44 = vpop.f32.mrf.mxu1 }
 0x1a4   :  { %v630_v45 = vpack.c.bf16 %v582_v41, %v581_v40  ;;  %v760_v46 = vadd.f32 %v4755_v14, %v759_v44 }
 0x1a6   :  { %798 = vmatmul.bf16.gmra.mxu1 %v630_v45  ;;  %v898_v52 = vpack.c.bf16 %v760_v46, %v760_v46 }
 0x1a8   :  { %v1042_v62 = vunpack.c.l.b16 %v898_v52 }
 0x1a9   :  { %v471_v48 = vpop.f32.mrf.mxu0 }
 0x1aa   :  { %v583_v6 = vmax.f32 %v471_v48, 0.0  ;;  %v4404_v48 = vld [vmem:[#allocation4 + $0xd0] sm:$0xff] }
 0x1ab   :  { %v761_v50 = vpop.f32.mrf.mxu1 }
 0x1ac   :  { %v762_v55 = vadd.f32 %v4755_v14, %v761_v50  ;;  %510 = vmatmul.bf16.gmra.mxu0 %v4402_v47 }
 0x1ae   :  { %v899_v59 = vpack.c.bf16 %v762_v55, %v762_v55 }
 0x1b0   :  { %v1043_v63 = vunpack.c.l.b16 %v899_v59 }
 0x1b1   :  { %v473_v2 = vpop.f32.mrf.mxu0 }
 0x1b2   :  { %v584_v7 = vmax.f32 %v473_v2, 0.0  ;;  %v1051_v8 = vpack.c.b16 %v1043_v63, %v1042_v62 }
 0x1b3   :  { %v764_v12 = vpop.f32.mrf.mxu1 }
 0x1b4   :  { %v631_v18 = vpack.c.bf16 %v584_v7, %v583_v6  ;;  %1060 = vmatpush.bf16.msrb.mxu2 %v1051_v8  ;;  %v765_v25 = vadd.f32 %v4755_v14, %v764_v12 }
 0x1b6   :  { %803 = vmatmul.bf16.gmra.mxu1 %v631_v18  ;;  %v900_v32 = vpack.c.bf16 %v765_v25, %v765_v25 }
 0x1b8   :  { %1061 = vmatpush.bf16.msrb.mxu2 %v1050_v15  ;;  %v4802_v36 = vunpack.c.l.b16 %v900_v32 }
 0x1b9   :  { %v476_v27 = vpop.f32.mrf.mxu0 }
 0x1ba   :  { %v585_v41 = vmax.f32 %v476_v27, 0.0 }
 0x1bb   :  { %v766_v31 = vpop.f32.mrf.mxu1 }
 0x1bc   :  { %v767_v33 = vadd.f32 %v4755_v14, %v766_v31  ;;  %1062 = vmatpush.bf16.msrb.mxu2 %v1049_v30  ;;  %515 = vmatmul.bf16.gmra.mxu0 %v4403_v26 }
 0x1be   :  { %v901_v34 = vpack.c.bf16 %v767_v33, %v767_v33 }
 0x1c0   :  { %v4804_v37 = vunpack.c.l.b16 %v901_v34  ;;  %1063 = vmatpush.bf16.msrb.mxu2 %v1048_v35  ;;  %v531_v32 = vpop.f32.mrf.mxu2 }
 0x1c1   :  { %v478_v40 = vpop.f32.mrf.mxu0  ;;  %v607_v35 = vmax.f32 %v531_v32, 0.0 }
 0x1c2   :  { %v586_v42 = vmax.f32 %v478_v40, 0.0  ;;  %v1222_v44 = vpack.c.b16 %v4804_v37, %v4802_v36  ;;  %v4430_v36 = vld [vmem:[#allocation4 + $0x20] sm:$0xff] }
 0x1c3   :  { %v769_v45 = vpop.f32.mrf.mxu1 }
 0x1c4   :  { %v632_v46 = vpack.c.bf16 %v586_v42, %v585_v41  ;;  %1064 = vmatpush.bf16.msrb.mxu2 %v1047_v9  ;;  %v770_v47 = vadd.f32 %v4755_v14, %v769_v45 }
 0x1c6   :  { %808 = vmatmul.bf16.gmra.mxu1 %v632_v46  ;;  %v902_v51 = vpack.c.bf16 %v770_v47, %v770_v47 }
 0x1c8   :  { %1065 = vmatpush.bf16.msrb.mxu2 %v1046_v58  ;;  %v4819_v5 = vunpack.c.l.b16 %v902_v51  ;;  %v533_v40 = vpop.f32.mrf.mxu2 }
 0x1c9   :  { %v481_v49 = vpop.f32.mrf.mxu0  ;;  %v608_v41 = vmax.f32 %v533_v40, 0.0 }
 0x1ca   :  { %v587_v54 = vmax.f32 %v481_v49, 0.0 }
 0x1cb   :  { %v771_v50 = vpop.f32.mrf.mxu1  ;;  %v643_v47 = vpack.c.bf16 %v608_v41, %v607_v35 }
 0x1cc   :  { %v772_v52 = vadd.f32 %v4755_v14, %v771_v50  ;;  %1066 = vmatpush.bf16.msrb.mxu2 %v1045_v43  ;;  %520 = vmatmul.bf16.gmra.mxu0 %v4404_v48 }
 0x1cd   :  { %863 = vmatmul.bf16.vlgmr.msra.gmra.mxu3 %v643_v47 }
 0x1ce   :  { %v903_v4 = vpack.c.bf16 %v772_v52, %v772_v52 }
 0x1d0   :  { %v4821_v9 = vunpack.c.l.b16 %v903_v4  ;;  %1067 = vmatpush.bf16.msrb.mxu2 %v1044_v28  ;;  %v536_v50 = vpop.f32.mrf.mxu2 }
 0x1d1   :  { %v483_v53 = vpop.f32.mrf.mxu0  ;;  %v609_v4 = vmax.f32 %v536_v50, 0.0 }
 0x1d2   :  { %v588_v58 = vmax.f32 %v483_v53, 0.0  ;;  %v1223_v55 = vpack.c.b16 %v4821_v9, %v4819_v5 }
 0x1d3   :  { %v774_v56 = vpop.f32.mrf.mxu1 }
 0x1d4   :  { %v633_v57 = vpack.c.bf16 %v588_v58, %v587_v54  ;;  %v775_v38 = vadd.f32 %v4755_v14, %v774_v56 }
 0x1d6   :  { %813 = vmatmul.bf16.gmra.mxu1 %v633_v57  ;;  %v904_v60 = vpack.c.bf16 %v775_v38, %v775_v38 }
 0x1d8   :  { %v4830_v24 = vunpack.c.l.b16 %v904_v60  ;;  %v538_v53 = vpop.f32.mrf.mxu2 }
 0x1d9   :  { %v486_v43 = vpop.f32.mrf.mxu0  ;;  %v610_v54 = vmax.f32 %v538_v53, 0.0 }
 0x1da   :  { %v589_v63 = vmax.f32 %v486_v43, 0.0 }
 0x1db   :  { %v776_v59 = vpop.f32.mrf.mxu1  ;;  %v644_v38 = vpack.c.bf16 %v610_v54, %v609_v4 }
 0x1dc   :  { %v777_v61 = vadd.f32 %v4755_v14, %v776_v59  ;;  %525 = vmatmul.bf16.gmra.mxu0 %v4405_v39 }
 0x1dd   :  { %868 = vmatmul.bf16.gmra.mxu3 %v644_v38 }
 0x1de   :  { %v905_v23 = vpack.c.bf16 %v777_v61, %v777_v61 }
 0x1e0   :  { %v4832_v28 = vunpack.c.l.b16 %v905_v23  ;;  %v541_v59 = vpop.f32.mrf.mxu2  ;;  %v4426_v23 = vld [vmem:[#allocation4] sm:$0xff] }
 0x1e1   :  { %v488_v62 = vpop.f32.mrf.mxu0  ;;  %1068 = vmatmul.bf16.vlgmr.msrb.gmra.mxu2 %v4426_v23 }
 0x1e2   :  { %v590_v0 = vmax.f32 %v488_v62, 0.0  ;;  %v1224_v1 = vpack.c.b16 %v4832_v28, %v4830_v24 }
 0x1e3   :  { %v779_v2 = vpop.f32.mrf.mxu1 }
 0x1e4   :  { %v634_v3 = vpack.c.bf16 %v590_v0, %v589_v63  ;;  %v780_v6 = vadd.f32 %v4755_v14, %v779_v2 }
 0x1e6   :  { %818 = vmatmul.bf16.gmra.mxu1 %v634_v3  ;;  %v906_v11 = vpack.c.bf16 %v780_v6, %v780_v6 }
 0x1e8   :  { %v4838_v16 = vunpack.c.l.b16 %v906_v11  ;;  %v611_v11 = vmax.f32 %v541_v59, 0.0 }
 0x1e9   :  { %v491_v7 = vpop.f32.mrf.mxu0 }
 0x1ea   :  { %v591_v19 = vmax.f32 %v491_v7, 0.0 }
 0x1eb   :  { %v781_v8 = vpop.f32.mrf.mxu1 }
 0x1ec   :  { %v782_v12 = vadd.f32 %v4755_v14, %v781_v8 }
 0x1ee   :  { %v907_v13 = vpack.c.bf16 %v782_v12, %v782_v12 }
 0x1f0   :  { %v4840_v17 = vunpack.c.l.b16 %v907_v13 }
 0x1f1   :  { %v493_v18 = vpop.f32.mrf.mxu0 }
 0x1f2   :  { %v592_v20 = vmax.f32 %v493_v18, 0.0  ;;  %v1225_v15 = vpack.c.b16 %v4840_v17, %v4838_v16  ;;  %v543_v18 = vpop.f32.mrf.mxu2 }
 0x1f3   :  { %v4844_v21 = vpop.f32.mrf.mxu1 }
 0x1f4   :  { %v635_v22 = vpack.c.bf16 %v592_v20, %v591_v19  ;;  %v785_v40 = vadd.f32 %v4755_v14, %v4844_v21 }
 0x1f6   :  { %823 = vmatmul.bf16.gmra.mxu1 %v635_v22 }
 0x1f9   :  { %v496_v25 = vpop.f32.mrf.mxu0 }
 0x1fa   :  { %v593_v29 = vmax.f32 %v496_v25, 0.0  ;;  %v612_v25 = vmax.f32 %v543_v18, 0.0 }
 0x1fb   :  { %v786_v26 = vpop.f32.mrf.mxu1 }
 0x1fc   :  { %v645_v35 = vpack.c.bf16 %v612_v25, %v611_v11 }
 0x1fe   :  { %873 = vmatmul.bf16.gmra.mxu3 %v645_v35 }
 0x201   :  { %v498_v27 = vpop.f32.mrf.mxu0 }
 0x202   :  { %v594_v30 = vmax.f32 %v498_v27, 0.0  ;;  %v787_v27 = vadd.f32 %v4755_v14, %v786_v26  ;;  %v908_v26 = vpack.c.bf16 %v785_v40, %v785_v40 }
 0x203   :  { %v789_v31 = vpop.f32.mrf.mxu1 }
 0x204   :  { %v636_v10 = vpack.c.bf16 %v594_v30, %v593_v29  ;;  %v790_v12 = vadd.f32 %v4755_v14, %v789_v31  ;;  %v1214_v21 = vunpack.c.l.b16 %v908_v26 }
 0x206   :  { %828 = vmatmul.bf16.gmra.mxu1 %v636_v10  ;;  %v910_v31 = vpack.c.bf16 %v790_v12, %v790_v12  ;;  %v4432_v12 = vld [vmem:[#allocation4 + $0x30] sm:$0xff] }
 0x209   :  { %v501_v33 = vpop.f32.mrf.mxu0 }
 0x20a   :  { %v595_v45 = vmax.f32 %v501_v33, 0.0 }
 0x20b   :  { %v791_v34 = vpop.f32.mrf.mxu1 }
 0x20c   :  { %v792_v6 = vadd.f32 %v4755_v14, %v791_v34 }
 0x20e   :  { %v911_v29 = vpack.c.bf16 %v792_v6, %v792_v6 }
 0x211   :  { %v503_v42 = vpop.f32.mrf.mxu0 }
 0x212   :  { %v596_v46 = vmax.f32 %v503_v42, 0.0 }
 0x213   :  { %v794_v48 = vpop.f32.mrf.mxu1 }
 0x214   :  { %v637_v49 = vpack.c.bf16 %v596_v46, %v595_v45  ;;  %v795_v63 = vadd.f32 %v4755_v14, %v794_v48  ;;  %v909_v45 = vpack.c.bf16 %v787_v27, %v787_v27  ;;  %v1217_v46 = vunpack.c.l.b16 %v911_v29 }
 0x215   :  { %v1216_v48 = vunpack.c.l.b16 %v910_v31 }
 0x216   :  { %833 = vmatmul.bf16.gmra.mxu1 %v637_v49  ;;  %v912_v13 = vpack.c.bf16 %v795_v63, %v795_v63  ;;  %v546_v49 = vpop.f32.mrf.mxu2 }
 0x217   :  { %v1227_v4 = vpack.c.b16 %v1217_v46, %v1216_v48 }
 0x218   :  { %v1218_v41 = vunpack.c.l.b16 %v912_v13 }
 0x219   :  { %v506_v51 = vpop.f32.mrf.mxu0 }
 0x21a   :  { %v597_v56 = vmax.f32 %v506_v51, 0.0  ;;  %v4427_v51 = vld [vmem:[#allocation4 + $0x8] sm:$0xff] }
 0x21b   :  { %v796_v52 = vpop.f32.mrf.mxu1  ;;  %1073 = vmatmul.bf16.gmra.mxu2 %v4427_v51 }
 0x21c   :  { %v797_v62 = vadd.f32 %v4755_v14, %v796_v52  ;;  %v1215_v52 = vunpack.c.l.b16 %v909_v45 }
 0x21e   :  { %v913_v7 = vpack.c.bf16 %v797_v62, %v797_v62  ;;  %v1226_v54 = vpack.c.b16 %v1215_v52, %v1214_v21  ;;  %v4428_v62 = vld [vmem:[#allocation4 + $0x10] sm:$0xff] }
 0x220   :  { %v1219_v10 = vunpack.c.l.b16 %v913_v7  ;;  %v4431_v7 = vld [vmem:[#allocation4 + $0x28] sm:$0xff] }
 0x221   :  { %v508_v58 = vpop.f32.mrf.mxu0 }
 0x222   :  { %v598_v57 = vmax.f32 %v508_v58, 0.0  ;;  %v1228_v47 = vpack.c.b16 %v1219_v10, %v1218_v41  ;;  %v613_v58 = vmax.f32 %v546_v49, 0.0 }
 0x223   :  { %v799_v39 = vpop.f32.mrf.mxu1 }
 0x224   :  { %v638_v43 = vpack.c.bf16 %v598_v57, %v597_v56  ;;  %v800_v60 = vadd.f32 %v4755_v14, %v799_v39  ;;  %v548_v57 = vpop.f32.mrf.mxu2 }
 0x225   :  { %v614_v39 = vmax.f32 %v548_v57, 0.0 }
 0x226   :  { %838 = vmatmul.bf16.gmra.mxu1 %v638_v43  ;;  %v914_v2 = vpack.c.bf16 %v800_v60, %v800_v60 }
 0x227   :  { %v646_v60 = vpack.c.bf16 %v614_v39, %v613_v58 }
 0x228   :  { %v1220_v19 = vunpack.c.l.b16 %v914_v2 }
 0x229   :  { %v511_v61 = vpop.f32.mrf.mxu0  ;;  %878 = vmatmul.bf16.gmra.mxu3 %v646_v60 }
 0x22a   :  { %v599_v22 = vmax.f32 %v511_v61, 0.0 }
 0x22b   :  { %v801_v0 = vpop.f32.mrf.mxu1  ;;  %1078 = vmatmul.bf16.gmra.mxu2 %v4428_v62 }
 0x22c   :  { %v802_v3 = vadd.f32 %v4755_v14, %v801_v0 }
 0x22e   :  { %v915_v8 = vpack.c.bf16 %v802_v3, %v802_v3 }
 0x230   :  { %v1221_v20 = vunpack.c.l.b16 %v915_v8 }
 0x231   :  { %v513_v30 = vpop.f32.mrf.mxu0 }
 0x232   :  { %v1229_v32 = vpack.c.b16 %v1221_v20, %v1220_v19  ;;  %v600_v33 = vmax.f32 %v513_v30, 0.0  ;;  %v4433_v20 = vld [vmem:[#allocation4 + $0x38] sm:$0xff] }
 0x233   :  { %v4853_v34 = vpop.f32.mrf.mxu1 }
 0x234   :  { %1238 = vmatpush.bf16.msrb.mxu3 %v1229_v32  ;;  %v639_v42 = vpack.c.bf16 %v600_v33, %v599_v22 }
 0x236   :  { %843 = vmatmul.bf16.gmra.mxu1 %v639_v42 }
 0x238   :  { %1239 = vmatpush.bf16.msrb.mxu3 %v1228_v47 }
 0x239   :  { %v516_v50 = vpop.f32.mrf.mxu0 }
 0x23a   :  { %v601_v56 = vmax.f32 %v516_v50, 0.0 }
 0x23b   :  { %v4857_v53 = vpop.f32.mrf.mxu1 }
 0x23c   :  { %1240 = vmatpush.bf16.msrb.mxu3 %v1227_v4 }
 0x240   :  { %1241 = vmatpush.bf16.msrb.mxu3 %v1226_v54  ;;  %v4434_v54 = vld [vmem:[#allocation4 + $0x40] sm:$0xff] }
 0x241   :  { %v518_v38 = vpop.f32.mrf.mxu0 }
 0x242   :  { %v602_v43 = vmax.f32 %v518_v38, 0.0 }
 0x243   :  { %v4859_v59 = vpop.f32.mrf.mxu1 }
 0x244   :  { %1242 = vmatpush.bf16.msrb.mxu3 %v1225_v15  ;;  %v640_v61 = vpack.c.bf16 %v602_v43, %v601_v56 }
 0x246   :  { %848 = vmatmul.bf16.gmra.mxu1 %v640_v61 }
 0x248   :  { %1243 = vmatpush.bf16.msrb.mxu3 %v1224_v1  ;;  %v4429_v1 = vld [vmem:[#allocation4 + $0x18] sm:$0xff] }
 0x249   :  { %v521_v23 = vpop.f32.mrf.mxu0  ;;  %1083 = vmatmul.bf16.gmra.mxu2 %v4429_v1 }
 0x24a   :  { %v603_v16 = vmax.f32 %v521_v23, 0.0 }
 0x24b   :  { %v4867_v63 = vpop.f32.mrf.mxu1 }
 0x24c   :  { %1244 = vmatpush.bf16.msrb.mxu3 %v1223_v55 }
 0x250   :  { %1245 = vmatpush.bf16.msrb.mxu3 %v1222_v44  ;;  %v4879_v19 = vpop.f32.mrf.mxu3 }
 0x251   :  { %v523_v17 = vpop.f32.mrf.mxu0 }
 0x252   :  { %v604_v15 = vmax.f32 %v523_v17, 0.0 }
 0x253   :  { %v4875_v0 = vpop.f32.mrf.mxu1  ;;  %1246 = vmatmul.bf16.vlgmr.msrb.gmra.mxu3 %v4434_v54 }
 0x254   :  { %v641_v24 = vpack.c.bf16 %v604_v15, %v603_v16 }
 0x256   :  { %853 = vmatmul.bf16.gmra.mxu1 %v641_v24 }
 0x258   :  { %v4881_v25 = vpop.f32.mrf.mxu3 }
 0x259   :  { %v526_v28 = vpop.f32.mrf.mxu0  ;;  %1088 = vmatmul.bf16.gmra.mxu2 %v4430_v36 }
 0x25a   :  { %v605_v3 = vmax.f32 %v526_v28, 0.0 }
 0x25b   :  { %v4877_v2 = vpop.f32.mrf.mxu1 }
 0x25c   :  { %v817_v15 = vadd.f32 %v4755_v14, %v4877_v2  ;;  %v810_v2 = vadd.f32 %v4755_v14, %v4859_v59 }
 0x25e   :  { %v921_v36 = vpack.c.bf16 %v817_v15, %v817_v15 }
 0x260   :  { %v4883_v29 = vpop.f32.mrf.mxu3 }
 0x261   :  { %v528_v6 = vpop.f32.mrf.mxu0 }
 0x262   :  { %v606_v5 = vmax.f32 %v528_v6, 0.0  ;;  %v815_v6 = vadd.f32 %v4755_v14, %v4875_v0  ;;  %v807_v0 = vadd.f32 %v4755_v14, %v4857_v53 }
 0x263   :  { %v819_v9 = vpop.f32.mrf.mxu1 }
 0x264   :  { %v642_v55 = vpack.c.bf16 %v606_v5, %v605_v3  ;;  %v1069_v45 = vpop.f32.mrf.mxu2  ;;  %v820_v23 = vadd.f32 %v4755_v14, %v819_v9  ;;  %v812_v9 = vadd.f32 %v4755_v14, %v4867_v63  ;;  %v917_v59 = vpack.c.bf16 %v807_v0, %v807_v0 }
 0x265   :  { %1110 = vst.msk [vmem:[#allocation2] sm:$0xff] %vm1109_vm0, %v1069_v45 }
 0x266   :  { %858 = vmatmul.bf16.gmra.mxu1 %v642_v55  ;;  %v922_v5 = vpack.c.bf16 %v820_v23, %v820_v23 }
 0x268   :  { %v4891_v46 = vpop.f32.mrf.mxu3 }
 0x269   :  { %1093 = vmatmul.bf16.gmra.mxu2 %v4431_v7 }
 0x26b   :  { %v821_v37 = vpop.f32.mrf.mxu1 }
 0x26c   :  { %v822_v38 = vadd.f32 %v4755_v14, %v821_v37  ;;  %v1071_v61 = vpop.f32.mrf.mxu2 }
 0x26d   :  { %1111 = vst.msk [vmem:[#allocation2 + $0x10] sm:$0xff] %vm1109_vm0, %v1071_v61  ;;  %v4436_v61 = vld [vmem:[#allocation4 + $0x50] sm:$0xff] }
 0x26e   :  { %v923_v24 = vpack.c.bf16 %v822_v38, %v822_v38 }
 0x270   :  { %v1455_v37 = vunpack.c.l.b16 %v923_v24 }
 0x273   :  { %v824_v44 = vpop.f32.mrf.mxu1 }
 0x274   :  { %v825_v58 = vadd.f32 %v4755_v14, %v824_v44 }
 0x276   :  { %v924_v62 = vpack.c.bf16 %v825_v58, %v825_v58  ;;  %v872_v58 = vadd.f32 %v4755_v14, %v4891_v46  ;;  %v867_v46 = vadd.f32 %v4755_v14, %v4881_v25 }
 0x278   :  { %v1456_v55 = vunpack.c.l.b16 %v924_v62  ;;  %v943_v62 = vpack.c.bf16 %v872_v58, %v872_v58 }
 0x279   :  { %1098 = vmatmul.bf16.gmra.mxu2 %v4432_v12 }
 0x27b   :  { %v826_v8 = vpop.f32.mrf.mxu1 }
 0x27c   :  { %v827_v50 = vadd.f32 %v4755_v14, %v826_v8  ;;  %v920_v8 = vpack.c.bf16 %v815_v6, %v815_v6  ;;  %v1636_v6 = vunpack.c.l.b16 %v943_v62  ;;  %v4440_v62 = vld [vmem:[#allocation4 + $0x70] sm:$0xff] }
 0x27e   :  { %v925_v39 = vpack.c.bf16 %v827_v50, %v827_v50 }
 0x280   :  { %v1457_v28 = vunpack.c.l.b16 %v925_v39 }
 0x281   :  { %v874_v17 = vpop.f32.mrf.mxu3 }
 0x282   :  { %v1468_v44 = vpack.c.b16 %v1457_v28, %v1456_v55 }
 0x283   :  { %v829_v11 = vpop.f32.mrf.mxu1 }
 0x284   :  { %v830_v47 = vadd.f32 %v4755_v14, %v829_v11  ;;  %v1454_v11 = vunpack.c.l.b16 %v922_v5 }
 0x286   :  { %v926_v56 = vpack.c.bf16 %v830_v47, %v830_v47 }
 0x288   :  { %v1458_v16 = vunpack.c.l.b16 %v926_v56 }
 0x289   :  { %1103 = vmatmul.bf16.gmra.mxu2 %v4433_v20  ;;  %v876_v12 = vpop.f32.mrf.mxu3  ;;  %v1467_v20 = vpack.c.b16 %v1455_v37, %v1454_v11  ;;  %v4437_v11 = vld [vmem:[#allocation4 + $0x58] sm:$0xff] }
 0x28b   :  { %v831_v13 = vpop.f32.mrf.mxu1 }
 0x28c   :  { %v832_v31 = vadd.f32 %v4755_v14, %v831_v13  ;;  %v919_v13 = vpack.c.bf16 %v812_v9, %v812_v9  ;;  %v941_v9 = vpack.c.bf16 %v867_v46, %v867_v46 }
 0x28e   :  { %v927_v51 = vpack.c.bf16 %v832_v31, %v832_v31 }
 0x290   :  { %v1459_v43 = vunpack.c.l.b16 %v927_v51  ;;  %v4442_v51 = vld [vmem:[#allocation4 + $0x80] sm:$0xff] }
 0x292   :  { %v1469_v1 = vpack.c.b16 %v1459_v43, %v1458_v16 }
 0x293   :  { %v834_v18 = vpop.f32.mrf.mxu1 }
 0x294   :  { %v835_v33 = vadd.f32 %v4755_v14, %v834_v18  ;;  %v1453_v18 = vunpack.c.l.b16 %v921_v36 }
 0x296   :  { %v928_v26 = vpack.c.bf16 %v835_v33, %v835_v33 }
 0x298   :  { %v1460_v57 = vunpack.c.l.b16 %v928_v26  ;;  %v875_v26 = vadd.f32 %v4755_v14, %v874_v17 }
 0x29a   :  { %v944_v56 = vpack.c.bf16 %v875_v26, %v875_v26 }
 0x29b   :  { %v836_v22 = vpop.f32.mrf.mxu1 }
 0x29c   :  { %v837_v10 = vadd.f32 %v4755_v14, %v836_v22  ;;  %v4435_v22 = vld [vmem:[#allocation4 + $0x48] sm:$0xff]  ;;  %v1637_v16 = vunpack.c.l.b16 %v944_v56 }
 0x29d   :  { %1251 = vmatmul.bf16.gmra.mxu3 %v4435_v22 }
 0x29e   :  { %v929_v41 = vpack.c.bf16 %v837_v10, %v837_v10  ;;  %v1074_v7 = vpop.f32.mrf.mxu2  ;;  %v1452_v10 = vunpack.c.l.b16 %v920_v8 }
 0x29f   :  { %1112 = vst.msk [vmem:[#allocation2 + $0x20] sm:$0xff] %vm1109_vm0, %v1074_v7  ;;  %v1634_v7 = vunpack.c.l.b16 %v941_v9  ;;  %v4490_v9 = vld [vmem:[%s5536_s3] sm:$0xff] }
 0x2a0   :  { %v1461_v52 = vunpack.c.l.b16 %v929_v41  ;;  %v1466_v33 = vpack.c.b16 %v1453_v18, %v1452_v10  ;;  %v1449_v41 = vunpack.c.l.b16 %v917_v59 }
 0x2a2   :  { %v1470_v60 = vpack.c.b16 %v1461_v52, %v1460_v57 }
 0x2a3   :  { %v839_v27 = vpop.f32.mrf.mxu1 }
 0x2a4   :  { %v840_v30 = vadd.f32 %v4755_v14, %v839_v27  ;;  %v805_v27 = vadd.f32 %v4755_v14, %v4853_v34 }
 0x2a6   :  { %v930_v35 = vpack.c.bf16 %v840_v30, %v840_v30  ;;  %v918_v30 = vpack.c.bf16 %v810_v2, %v810_v2  ;;  %v916_v53 = vpack.c.bf16 %v805_v27, %v805_v27 }
 0x2a8   :  { %v1462_v48 = vunpack.c.l.b16 %v930_v35  ;;  %v1076_v35 = vpop.f32.mrf.mxu2  ;;  %v1448_v47 = vunpack.c.l.b16 %v916_v53 }
 0x2a9   :  { %1113 = vst.msk [vmem:[#allocation2 + $0x30] sm:$0xff] %vm1109_vm0, %v1076_v35 }
 0x2ab   :  { %v841_v32 = vpop.f32.mrf.mxu1 }
 0x2ac   :  { %v842_v40 = vadd.f32 %v4755_v14, %v841_v32  ;;  %v1451_v32 = vunpack.c.l.b16 %v919_v13  ;;  %v879_v31 = vpop.f32.mrf.mxu3 }
 0x2ad   :  { %v880_v34 = vadd.f32 %v4755_v14, %v879_v31  ;;  %1256 = vmatmul.bf16.gmra.mxu3 %v4436_v61  ;;  %v4446_v61 = vld [vmem:[#allocation4 + $0xa0] sm:$0xff] }
 0x2ae   :  { %v931_v42 = vpack.c.bf16 %v842_v40, %v842_v40  ;;  %v1450_v40 = vunpack.c.l.b16 %v918_v30 }
 0x2af   :  { %v946_v52 = vpack.c.bf16 %v880_v34, %v880_v34 }
 0x2b0   :  { %v1463_v49 = vunpack.c.l.b16 %v931_v42  ;;  %v1465_v42 = vpack.c.b16 %v1451_v32, %v1450_v40  ;;  %v1079_v50 = vpop.f32.mrf.mxu2  ;;  %v4563_v40 = vld [vmem:[%s5538_s5] ss:$0 sm:$0xff] }
 0x2b1   :  { %1114 = vst.msk [vmem:[#allocation2 + $0x40] sm:$0xff] %vm1109_vm0, %v1079_v50  ;;  %v1639_v43 = vunpack.c.l.b16 %v946_v52 }
 0x2b2   :  { %v1471_v4 = vpack.c.b16 %v1463_v49, %v1462_v48  ;;  %v877_v48 = vadd.f32 %v4755_v14, %v876_v12  ;;  %v1464_v49 = vpack.c.b16 %v1449_v41, %v1448_v47 }
 0x2b3   :  { %v4895_v21 = vpop.f32.mrf.mxu1 }
 0x2b4   :  { %1480 = vmatpush.bf16.msra.mxu2 %v1471_v4  ;;  %v870_v4 = vadd.f32 %v4755_v14, %v4883_v29  ;;  %v881_v54 = vpop.f32.mrf.mxu3  ;;  %v945_v57 = vpack.c.bf16 %v877_v48, %v877_v48  ;;  %v865_v29 = vadd.f32 %v4755_v14, %v4879_v19  ;;  %v4443_v19 = vld [vmem:[#allocation4 + $0x88] sm:$0xff]  ;;  %v845_v31 = vadd.f32 %v4563_v40, %v4895_v21 }
 0x2b5   :  { %v882_v38 = vadd.f32 %v4755_v14, %v881_v54 }
 0x2b6   :  { %v942_v23 = vpack.c.bf16 %v870_v4, %v870_v4  ;;  %v1638_v17 = vunpack.c.l.b16 %v945_v57  ;;  %v940_v55 = vpack.c.bf16 %v865_v29, %v865_v29  ;;  %v932_v48 = vpack.c.bf16 %v845_v31, %v845_v31  ;;  %v4494_v29 = vld [vmem:[%s5536_s3 + $0x20] sm:$0xff] }
 0x2b8   :  { %1481 = vmatpush.bf16.msra.mxu2 %v1470_v60  ;;  %v947_v60 = vpack.c.bf16 %v882_v38, %v882_v38  ;;  %v1081_v24 = vpop.f32.mrf.mxu2  ;;  %v1647_v5 = vpack.c.b16 %v1638_v17, %v1637_v16  ;;  %v4445_v38 = vld [vmem:[#allocation4 + $0x98] sm:$0xff]  ;;  %v4496_v16 = vld [vmem:[%s5536_s3 + $0x30] sm:$0xff] }
 0x2b9   :  { %1115 = vst.msk [vmem:[#allocation2 + $0x50] sm:$0xff] %vm1109_vm0, %v1081_v24  ;;  %v4447_v24 = vld [vmem:[#allocation4 + $0xa8] sm:$0xff] }
 0x2ba   :  { %v1640_v15 = vunpack.c.l.b16 %v947_v60 }
 0x2bb   :  { %v4903_v3 = vpop.f32.mrf.mxu1 }
 0x2bc   :  { %1482 = vmatpush.bf16.msra.mxu2 %v1469_v1  ;;  %v1648_v28 = vpack.c.b16 %v1640_v15, %v1639_v43  ;;  %v1635_v1 = vunpack.c.l.b16 %v942_v23  ;;  %v847_v41 = vadd.f32 %v4563_v40, %v4903_v3  ;;  %v1625_v3 = vunpack.c.l.b16 %v932_v48  ;;  %v4497_v23 = vld [vmem:[%s5536_s3 + $0x38] sm:$0xff]  ;;  %v4495_v15 = vld [vmem:[%s5536_s3 + $0x28] sm:$0xff] }
 0x2bd   :  { %1261 = vmatmul.bf16.gmra.mxu3 %v4437_v11 }
 0x2be   :  { %1657 = vmatpush.bf16.msra.mxu3 %v1648_v28  ;;  %v1646_v37 = vpack.c.b16 %v1636_v6, %v1635_v1  ;;  %v933_v50 = vpack.c.bf16 %v847_v41, %v847_v41  ;;  %v4493_v28 = vld [vmem:[%s5536_s3 + $0x18] sm:$0xff]  ;;  %v4492_v6 = vld [vmem:[%s5536_s3 + $0x10] sm:$0xff] }
 0x2bf   :  { %v4441_v1 = vld [vmem:[#allocation4 + $0x78] sm:$0xff] }
 0x2c0   :  { %1483 = vmatpush.bf16.msra.mxu2 %v1468_v44  ;;  %v1633_v44 = vunpack.c.l.b16 %v940_v55  ;;  %v1626_v54 = vunpack.c.l.b16 %v933_v50  ;;  %v4491_v55 = vld [vmem:[%s5536_s3 + $0x8] sm:$0xff]  ;;  %v4461_v41 = vld [vmem:[#allocation7 + $0x18] sm:$0xff] }
 0x2c2   :  { %1658 = vmatpush.bf16.msra.mxu3 %v1647_v5  ;;  %v1645_v25 = vpack.c.b16 %v1634_v7, %v1633_v44  ;;  %v1641_v56 = vpack.c.b16 %v1626_v54, %v1625_v3  ;;  %v4449_v7 = vld [vmem:[#allocation4 + $0xb8] sm:$0xff]  ;;  %v4504_v3 = vld [vmem:[%s5539_s6 + $0x30] sm:$0xff] }
 0x2c3   :  { %v4914_v63 = vpop.f32.mrf.mxu1  ;;  %v4457_v54 = vld [vmem:[#allocation4 + $0xf8] sm:$0xff] }
 0x2c4   :  { %1484 = vmatpush.bf16.msra.mxu2 %v1467_v20  ;;  %v850_v22 = vadd.f32 %v4755_v14, %v4914_v63 }
 0x2c6   :  { %1659 = vmatpush.bf16.msra.mxu3 %v1646_v37  ;;  %v934_v63 = vpack.c.bf16 %v850_v22, %v850_v22  ;;  %v4450_v37 = vld [vmem:[#allocation4 + $0xc0] sm:$0xff] }
 0x2c8   :  { %1485 = vmatpush.bf16.msra.mxu2 %v1466_v33 }
 0x2ca   :  { %1660 = vmatpush.bf16.msra.mxu3 %v1645_v25 }
 0x2cb   :  { %v4919_v45 = vpop.f32.mrf.mxu1 }
 0x2cc   :  { %1486 = vmatpush.bf16.msra.mxu2 %v1465_v42  ;;  %v1084_v2 = vpop.f32.mrf.mxu2  ;;  %v852_v30 = vadd.f32 %v4755_v14, %v4919_v45  ;;  %v4444_v42 = vld [vmem:[#allocation4 + $0x90] sm:$0xff] }
 0x2cd   :  { %1116 = vst.msk [vmem:[#allocation2 + $0x60] sm:$0xff] %vm1109_vm0, %v1084_v2 }
 0x2ce   :  { %v935_v45 = vpack.c.bf16 %v852_v30, %v852_v30  ;;  %v4453_v30 = vld [vmem:[#allocation4 + $0xd8] sm:$0xff] }
 0x2d0   :  { %1487 = vmatpush.bf16.msra.mxu2 %v1464_v49  ;;  %v4438_v49 = vld [vmem:[#allocation4 + $0x60] sm:$0xff]  ;;  %v1628_v52 = vunpack.c.l.b16 %v935_v45  ;;  %v4455_v45 = vld [vmem:[#allocation4 + $0xe8] sm:$0xff] }
 0x2d1   :  { %1266 = vmatmul.bf16.gmra.mxu3 %v4438_v49  ;;  %v4456_v49 = vld [vmem:[#allocation4 + $0xf0] sm:$0xff] }
 0x2d3   :  { %1488 = vmatmul.bf16.vlgmr.msra.gmra.mxu2 %v4442_v51  ;;  %v854_v39 = vpop.f32.mrf.mxu1  ;;  %v1627_v51 = vunpack.c.l.b16 %v934_v63 }
 0x2d4   :  { %v1086_v0 = vpop.f32.mrf.mxu2  ;;  %v855_v13 = vadd.f32 %v4755_v14, %v854_v39  ;;  %v4439_v39 = vld [vmem:[#allocation4 + $0x68] sm:$0xff]  ;;  %2106 = vmatpush.bf16.msrb.mxu2 %v4497_v23  ;;  %v4500_v23 = vld [vmem:[%s5539_s6 + $0x10] sm:$0xff] }
 0x2d5   :  { %1117 = vst.msk [vmem:[#allocation2 + $0x70] sm:$0xff] %vm1109_vm0, %v1086_v0  ;;  %v1642_v58 = vpack.c.b16 %v1628_v52, %v1627_v51  ;;  %v4452_v0 = vld [vmem:[#allocation4 + $0xd0] sm:$0xff]  ;;  %v4463_v51 = vld [vmem:[#allocation7 + $0x28] sm:$0xff] }
 0x2d6   :  { %v936_v10 = vpack.c.bf16 %v855_v13, %v855_v13  ;;  %v4982_v44 = vpop.f32.mrf.mxu3 }
 0x2d8   :  { %v1629_v34 = vunpack.c.l.b16 %v936_v10  ;;  %2107 = vmatpush.bf16.msrb.mxu2 %v4496_v16 }
 0x2db   :  { %v856_v36 = vpop.f32.mrf.mxu1 }
 0x2dc   :  { %v857_v18 = vadd.f32 %v4755_v14, %v856_v36  ;;  %v1089_v53 = vpop.f32.mrf.mxu2  ;;  %2108 = vmatpush.bf16.msrb.mxu2 %v4495_v15  ;;  %v4448_v36 = vld [vmem:[#allocation4 + $0xb0] sm:$0xff]  ;;  %v4498_v15 = vld [vmem:[%s5539_s6] sm:$0xff] }
 0x2dd   :  { %1118 = vst.msk [vmem:[#allocation2 + $0x80] sm:$0xff] %vm1109_vm0, %v1089_v53  ;;  %v4454_v53 = vld [vmem:[#allocation4 + $0xe0] sm:$0xff] }
 0x2de   :  { %v937_v59 = vpack.c.bf16 %v857_v18, %v857_v18  ;;  %v4984_v2 = vpop.f32.mrf.mxu3 }
 0x2e0   :  { %v1630_v47 = vunpack.c.l.b16 %v937_v59  ;;  %2109 = vmatpush.bf16.msrb.mxu2 %v4494_v29  ;;  %v4465_v29 = vld [vmem:[#allocation7 + $0x38] sm:$0xff] }
 0x2e1   :  { %1271 = vmatmul.bf16.gmra.mxu3 %v4439_v39  ;;  %v4464_v39 = vld [vmem:[#allocation7 + $0x30] sm:$0xff] }
 0x2e2   :  { %v1643_v4 = vpack.c.b16 %v1630_v47, %v1629_v34 }
 0x2e3   :  { %1493 = vmatmul.bf16.gmra.mxu2 %v4443_v19  ;;  %v859_v8 = vpop.f32.mrf.mxu1  ;;  %v4451_v19 = vld [vmem:[#allocation4 + $0xc8] sm:$0xff] }
 0x2e4   :  { %v860_v12 = vadd.f32 %v4755_v14, %v859_v8  ;;  %v1091_v21 = vpop.f32.mrf.mxu2  ;;  %2110 = vmatpush.bf16.msrb.mxu2 %v4493_v28  ;;  %v4458_v8 = vld [vmem:[#allocation7] sm:$0xff] }
 0x2e5   :  { %1119 = vst.msk [vmem:[#allocation2 + $0x90] sm:$0xff] %vm1109_vm0, %v1091_v21 }
 0x2e6   :  { %v938_v20 = vpack.c.bf16 %v860_v12, %v860_v12 }
 0x2e8   :  { %v1631_v33 = vunpack.c.l.b16 %v938_v20  ;;  %2111 = vmatpush.bf16.msrb.mxu2 %v4492_v6  ;;  %v4459_v20 = vld [vmem:[#allocation7 + $0x8] sm:$0xff] }
 0x2eb   :  { %v861_v27 = vpop.f32.mrf.mxu1 }
 0x2ec   :  { %v862_v32 = vadd.f32 %v4755_v14, %v861_v27  ;;  %v1094_v57 = vpop.f32.mrf.mxu2  ;;  %2112 = vmatpush.bf16.msrb.mxu2 %v4491_v55 }
 0x2ed   :  { %1120 = vst.msk [vmem:[#allocation2 + $0xa0] sm:$0xff] %vm1109_vm0, %v1094_v57 }
 0x2ee   :  { %v939_v35 = vpack.c.bf16 %v862_v32, %v862_v32  ;;  %v4460_v32 = vld [vmem:[#allocation7 + $0x10] sm:$0xff] }
 0x2f0   :  { %v1632_v26 = vunpack.c.l.b16 %v939_v35  ;;  %2113 = vmatpush.bf16.msrb.mxu2 %v4490_v9 }
 0x2f1   :  { %1276 = vmatmul.bf16.gmra.mxu3 %v4440_v62  ;;  %v4499_v62 = vld [vmem:[%s5539_s6 + $0x8] sm:$0xff] }
 0x2f2   :  { %v1644_v14 = vpack.c.b16 %v1632_v26, %v1631_v33  ;;  %v4462_v26 = vld [vmem:[#allocation7 + $0x20] sm:$0xff] }
 0x2f3   :  { %1498 = vmatmul.bf16.gmra.mxu2 %v4444_v42 }
 0x2f4   :  { %1661 = vmatpush.bf16.msra.mxu3 %v1644_v14  ;;  %v1096_v43 = vpop.f32.mrf.mxu2 }
 0x2f5   :  { %1121 = vst.msk [vmem:[#allocation2 + $0xb0] sm:$0xff] %vm1109_vm0, %v1096_v43  ;;  %v4501_v43 = vld [vmem:[%s5539_s6 + $0x18] sm:$0xff] }
 0x2f8   :  { %1662 = vmatpush.bf16.msra.mxu3 %v1643_v4  ;;  %v4505_v4 = vld [vmem:[%s5539_s6 + $0x38] sm:$0xff] }
 0x2fc   :  { %1663 = vmatpush.bf16.msra.mxu3 %v1642_v58  ;;  %v1099_v60 = vpop.f32.mrf.mxu2  ;;  %v4503_v58 = vld [vmem:[%s5539_s6 + $0x28] sm:$0xff] }
 0x2fd   :  { %1122 = vst.msk [vmem:[#allocation2 + $0xc0] sm:$0xff] %vm1109_vm0, %v1099_v60 }
 0x300   :  { %1664 = vmatpush.bf16.msra.mxu3 %v1641_v56 }
 0x301   :  { %1281 = vmatmul.bf16.gmra.mxu3 %v4441_v1  ;;  %v4466_v1 = vld [vmem:[#allocation7 + $0x40] sm:$0xff] }
 0x303   :  { %1503 = vmatmul.bf16.gmra.mxu2 %v4445_v38  ;;  %v4502_v38 = vld [vmem:[%s5539_s6 + $0x20] sm:$0xff] }
 0x304   :  { %v1101_v17 = vpop.f32.mrf.mxu2  ;;  %2439 = vmatpush.bf16.msrb.mxu3 %v4505_v4  ;;  %v4470_v4 = vld [vmem:[#allocation7 + $0x60] sm:$0xff] }
 0x305   :  { %1123 = vst.msk [vmem:[#allocation2 + $0xd0] sm:$0xff] %vm1109_vm0, %v1101_v17 }
 0x308   :  { %2440 = vmatpush.bf16.msrb.mxu3 %v4504_v3 }
 0x30c   :  { %v1104_v46 = vpop.f32.mrf.mxu2  ;;  %2441 = vmatpush.bf16.msrb.mxu3 %v4503_v58 }
 0x30d   :  { %1124 = vst.msk [vmem:[#allocation2 + $0xe0] sm:$0xff] %vm1109_vm0, %v1104_v46 }
 0x310   :  { %2442 = vmatpush.bf16.msrb.mxu3 %v4502_v38 }
 0x311   :  { %1665 = vmatmul.bf16.vlgmr.msra.gmra.mxu3 %v4450_v37 }
 0x313   :  { %1508 = vmatmul.bf16.gmra.mxu2 %v4446_v61 }
 0x314   :  { %v1106_v5 = vpop.f32.mrf.mxu2  ;;  %2443 = vmatpush.bf16.msrb.mxu3 %v4501_v43 }
 0x315   :  { %1125 = vst.msk [vmem:[#allocation2 + $0xf0] sm:$0xff] %vm1109_vm0, %v1106_v5 }
 0x318   :  { %2444 = vmatpush.bf16.msrb.mxu3 %v4500_v23 }
 0x31c   :  { %2445 = vmatpush.bf16.msrb.mxu3 %v4499_v62 }
 0x320   :  { %v4986_v25 = vpop.f32.mrf.mxu3  ;;  %2446 = vmatpush.bf16.msrb.mxu3 %v4498_v15 }
 0x321   :  { %1670 = vmatmul.bf16.gmra.mxu3 %v4451_v19 }
 0x323   :  { %1513 = vmatmul.bf16.gmra.mxu2 %v4447_v24 }
 0x328   :  { %v4988_v11 = vpop.f32.mrf.mxu3 }
 0x330   :  { %v4991_v13 = vpop.f32.mrf.mxu3 }
 0x331   :  { %1675 = vmatmul.bf16.gmra.mxu3 %v4452_v0 }
 0x333   :  { %1518 = vmatmul.bf16.gmra.mxu2 %v4448_v36 }
 0x338   :  { %v4994_v22 = vpop.f32.mrf.mxu3 }
 0x340   :  { %v4997_v10 = vpop.f32.mrf.mxu3 }
 0x341   :  { %1680 = vmatmul.bf16.gmra.mxu3 %v4453_v30 }
 0x343   :  { %1523 = vmatmul.bf16.gmra.mxu2 %v4449_v7  ;;  %v4467_v7 = vld [vmem:[#allocation7 + $0x48] sm:$0xff] }
 0x348   :  { %v5000_v33 = vpop.f32.mrf.mxu3 }
 0x351   :  { %1685 = vmatmul.bf16.gmra.mxu3 %v4454_v53 }
 0x353   :  { %2114 = vmatmul.bf16.vlgmr.msrb.gmra.mxu2 %v4458_v8 }
 0x354   :  { %v5003_v40 = vpop.f32.mrf.mxu3 }
 0x356   :  { %v1489_v12 = vpop.f32.mrf.mxu2 }
 0x357   :  { %1529 = vst.msk [vmem:[#allocation2 + $0x8] sm:$0xff] %vm1109_vm0, %v1489_v12 }
 0x35c   :  { %v5006_v63 = vpop.f32.mrf.mxu3 }
 0x35e   :  { %v1491_v18 = vpop.f32.mrf.mxu2 }
 0x35f   :  { %1530 = vst.msk [vmem:[#allocation2 + $0x18] sm:$0xff] %vm1109_vm0, %v1491_v18 }
 0x361   :  { %1690 = vmatmul.bf16.gmra.mxu3 %v4455_v45 }
 0x363   :  { %2119 = vmatmul.bf16.gmra.mxu2 %v4459_v20 }
 0x364   :  { %v5009_v34 = vpop.f32.mrf.mxu3 }
 0x366   :  { %v1494_v27 = vpop.f32.mrf.mxu2 }
 0x367   :  { %1531 = vst.msk [vmem:[#allocation2 + $0x28] sm:$0xff] %vm1109_vm0, %v1494_v27  ;;  %v4468_v27 = vld [vmem:[#allocation7 + $0x50] sm:$0xff] }
 0x36c   :  { %v5012_v48 = vpop.f32.mrf.mxu3 }
 0x36d   :  { %5542 = vst [vmem:[#allocation13_spill] sm:$0xff] %v5012_v48 }
 0x36e   :  { %v1496_v59 = vpop.f32.mrf.mxu2 }
 0x36f   :  { %1532 = vst.msk [vmem:[#allocation2 + $0x38] sm:$0xff] %vm1109_vm0, %v1496_v59 }
 0x371   :  { %1695 = vmatmul.bf16.gmra.mxu3 %v4456_v49 }
 0x373   :  { %2124 = vmatmul.bf16.gmra.mxu2 %v4460_v32 }
 0x374   :  { %v5016_v52 = vpop.f32.mrf.mxu3 }
 0x376   :  { %v1499_v35 = vpop.f32.mrf.mxu2 }
 0x377   :  { %1533 = vst.msk [vmem:[#allocation2 + $0x48] sm:$0xff] %vm1109_vm0, %v1499_v35 }
 0x37c   :  { %v5028_v56 = vpop.f32.mrf.mxu3 }
 0x37d   :  { %5543 = vst [vmem:[#allocation14_spill] sm:$0xff] %v5028_v56 }
 0x37e   :  { %v1501_v31 = vpop.f32.mrf.mxu2 }
 0x37f   :  { %1534 = vst.msk [vmem:[#allocation2 + $0x58] sm:$0xff] %vm1109_vm0, %v1501_v31 }
 0x381   :  { %1700 = vmatmul.bf16.gmra.mxu3 %v4457_v54 }
 0x383   :  { %2129 = vmatmul.bf16.gmra.mxu2 %v4461_v41 }
 0x384   :  { %v5037_v60 = vpop.f32.mrf.mxu3 }
 0x385   :  { %5544 = vst [vmem:[#allocation15_spill] sm:$0xff] %v5037_v60 }
 0x386   :  { %v1504_v42 = vpop.f32.mrf.mxu2 }
 0x387   :  { %1535 = vst.msk [vmem:[#allocation2 + $0x68] sm:$0xff] %vm1109_vm0, %v1504_v42  ;;  %v4469_v42 = vld [vmem:[#allocation7 + $0x58] sm:$0xff] }
 0x38c   :  { %v5046_v17 = vpop.f32.mrf.mxu3 }
 0x38d   :  { %5545 = vst [vmem:[#allocation16_spill] sm:$0xff] %v5046_v17 }
 0x38e   :  { %v1506_v47 = vpop.f32.mrf.mxu2 }
 0x38f   :  { %1536 = vst.msk [vmem:[#allocation2 + $0x78] sm:$0xff] %vm1109_vm0, %v1506_v47 }
 0x393   :  { %2134 = vmatmul.bf16.gmra.mxu2 %v4462_v26 }
 0x394   :  { %v5053_v24 = vpop.f32.mrf.mxu3 }
 0x396   :  { %v1509_v14 = vpop.f32.mrf.mxu2 }
 0x397   :  { %1537 = vst.msk [vmem:[#allocation2 + $0x88] sm:$0xff] %vm1109_vm0, %v1509_v14 }
 0x39c   :  { %v5056_v6 = vpop.f32.mrf.mxu3 }
 0x39e   :  { %v1511_v50 = vpop.f32.mrf.mxu2 }
 0x39f   :  { %1538 = vst.msk [vmem:[#allocation2 + $0x98] sm:$0xff] %vm1109_vm0, %v1511_v50 }
 0x3a3   :  { %2139 = vmatmul.bf16.gmra.mxu2 %v4463_v51 }
 0x3a4   :  { %v5058_v55 = vpop.f32.mrf.mxu3 }
 0x3a6   :  { %v1514_v21 = vpop.f32.mrf.mxu2 }
 0x3a7   :  { %1539 = vst.msk [vmem:[#allocation2 + $0xa8] sm:$0xff] %vm1109_vm0, %v1514_v21 }
 0x3ac   :  { %v5060_v12 = vpop.f32.mrf.mxu3 }
 0x3ae   :  { %v1516_v57 = vpop.f32.mrf.mxu2 }
 0x3af   :  { %1540 = vst.msk [vmem:[#allocation2 + $0xb8] sm:$0xff] %vm1109_vm0, %v1516_v57 }
 0x3b3   :  { %2144 = vmatmul.bf16.gmra.mxu2 %v4464_v39  ;;  %v4471_v39 = vld [vmem:[#allocation7 + $0x68] sm:$0xff] }
 0x3b4   :  { %v5062_v30 = vpop.f32.mrf.mxu3 }
 0x3b6   :  { %v1519_v61 = vpop.f32.mrf.mxu2 }
 0x3b7   :  { %1541 = vst.msk [vmem:[#allocation2 + $0xc8] sm:$0xff] %vm1109_vm0, %v1519_v61 }
 0x3bc   :  { %v5064_v35 = vpop.f32.mrf.mxu3 }
 0x3be   :  { %v1521_v16 = vpop.f32.mrf.mxu2 }
 0x3bf   :  { %1542 = vst.msk [vmem:[#allocation2 + $0xd8] sm:$0xff] %vm1109_vm0, %v1521_v16 }
 0x3c3   :  { %2149 = vmatmul.bf16.gmra.mxu2 %v4465_v29 }
 0x3c4   :  { %v5066_v47 = vpop.f32.mrf.mxu3 }
 0x3c6   :  { %v1524_v46 = vpop.f32.mrf.mxu2 }
 0x3c7   :  { %1543 = vst.msk [vmem:[#allocation2 + $0xe8] sm:$0xff] %vm1109_vm0, %v1524_v46  ;;  %v4472_v46 = vld [vmem:[#allocation7 + $0x70] sm:$0xff] }
 0x3cc   :  { %v5068_v49 = vpop.f32.mrf.mxu3 }
 0x3ce   :  { %v1526_v28 = vpop.f32.mrf.mxu2 }
 0x3cf   :  { %1544 = vst.msk [vmem:[#allocation2 + $0xf8] sm:$0xff] %vm1109_vm0, %v1526_v28 }
 0x3d3   :  { %2154 = vmatmul.bf16.gmra.mxu2 %v4466_v1 }
 0x3d4   :  { %v5070_v54 = vpop.f32.mrf.mxu3 }
 0x3d6   :  { %v2115_v5 = vpop.f32.mrf.mxu2 }
 0x3d7   :  { %v2275_v36 = vmax.f32 %v2115_v5, 0.0 }
 0x3dc   :  { %v5072_v61 = vpop.f32.mrf.mxu3 }
 0x3dd   :  { %5546 = vst [vmem:[#allocation17_spill] sm:$0xff] %v5072_v61 }
 0x3de   :  { %v2117_v9 = vpop.f32.mrf.mxu2 }
 0x3df   :  { %v2276_v37 = vmax.f32 %v2117_v9, 0.0 }
 0x3e1   :  { %v2339_v19 = vpack.c.bf16 %v2276_v37, %v2275_v36 }
 0x3e3   :  { %2159 = vmatmul.bf16.gmra.mxu2 %v4467_v7  ;;  %2447 = vmatmul.bf16.vlgmr.msrb.gmra.mxu3 %v2339_v19  ;;  %v4473_v7 = vld [vmem:[#allocation7 + $0x78] sm:$0xff] }
 0x3e4   :  { %v5074_v62 = vpop.f32.mrf.mxu3 }
 0x3e6   :  { %v2120_v8 = vpop.f32.mrf.mxu2 }
 0x3e7   :  { %v2277_v18 = vmax.f32 %v2120_v8, 0.0 }
 0x3ec   :  { %v5076_v1 = vpop.f32.mrf.mxu3 }
 0x3ed   :  { %5547 = vst [vmem:[#allocation18_spill] sm:$0xff] %v5076_v1 }
 0x3ee   :  { %v2122_v0 = vpop.f32.mrf.mxu2 }
 0x3ef   :  { %v2278_v20 = vmax.f32 %v2122_v0, 0.0 }
 0x3f1   :  { %v2340_v59 = vpack.c.bf16 %v2278_v20, %v2277_v18 }
 0x3f3   :  { %2164 = vmatmul.bf16.gmra.mxu2 %v4468_v27  ;;  %2452 = vmatmul.bf16.gmra.mxu3 %v2340_v59 }
 0x3f4   :  { %v5078_v19 = vpop.f32.mrf.mxu3 }
 0x3f5   :  { %5548 = vst [vmem:[#allocation19_spill] sm:$0xff] %v5078_v19 }
 0x3f6   :  { %v2125_v32 = vpop.f32.mrf.mxu2 }
 0x3f7   :  { %v2279_v31 = vmax.f32 %v2125_v32, 0.0  ;;  %v4474_v32 = vld [vmem:[#allocation7 + $0x80] sm:$0xff] }
 0x3fc   :  { %v5080_v18 = vpop.f32.mrf.mxu3 }
 0x3fd   :  { %5549 = vst [vmem:[#allocation20_spill] sm:$0xff] %v5080_v18 }
 0x3fe   :  { %v2127_v53 = vpop.f32.mrf.mxu2 }
 0x3ff   :  { %v2280_v41 = vmax.f32 %v2127_v53, 0.0 }
 0x401   :  { %v2341_v45 = vpack.c.bf16 %v2280_v41, %v2279_v31 }
 0x403   :  { %2169 = vmatmul.bf16.gmra.mxu2 %v4469_v42  ;;  %2457 = vmatmul.bf16.gmra.mxu3 %v2341_v45 }
 0x404   :  { %v5082_v31 = vpop.f32.mrf.mxu3 }
 0x405   :  { %5550 = vst [vmem:[#allocation21_spill] sm:$0xff] %v5082_v31 }
 0x406   :  { %v2130_v26 = vpop.f32.mrf.mxu2 }
 0x407   :  { %v2281_v50 = vmax.f32 %v2130_v26, 0.0 }
 0x40c   :  { %v5084_v42 = vpop.f32.mrf.mxu3 }
 0x40d   :  { %5551 = vst [vmem:[#allocation22_spill] sm:$0xff] %v5084_v42 }
 0x40e   :  { %v2132_v14 = vpop.f32.mrf.mxu2 }
 0x40f   :  { %v2282_v51 = vmax.f32 %v2132_v14, 0.0 }
 0x411   :  { %v2342_v21 = vpack.c.bf16 %v2282_v51, %v2281_v50  ;;  %v4475_v50 = vld [vmem:[#allocation7 + $0x88] sm:$0xff] }
 0x413   :  { %2174 = vmatmul.bf16.gmra.mxu2 %v4470_v4  ;;  %2462 = vmatmul.bf16.gmra.mxu3 %v2342_v21 }
 0x416   :  { %v2135_v3 = vpop.f32.mrf.mxu2 }
 0x417   :  { %v2283_v57 = vmax.f32 %v2135_v3, 0.0  ;;  %v5089_v3 = vld [vmem:[%s5540_s7] ss:$0 sm:$0xff]  ;;  %s4646_s7 = smov [#allocation9]  }
 0x41e   :  { %v2137_v58 = vpop.f32.mrf.mxu2 }
 0x41f   :  { %v2284_v38 = vmax.f32 %v2137_v58, 0.0 }
 0x421   :  { %v2343_v43 = vpack.c.bf16 %v2284_v38, %v2283_v57 }
 0x423   :  { %2179 = vmatmul.bf16.gmra.mxu2 %v4471_v39  ;;  %2467 = vmatmul.bf16.gmra.mxu3 %v2343_v43 }
 0x426   :  { %v2140_v23 = vpop.f32.mrf.mxu2 }
 0x427   :  { %v2285_v15 = vmax.f32 %v2140_v23, 0.0 }
 0x42e   :  { %v2142_v16 = vpop.f32.mrf.mxu2 }
 0x42f   :  { %v2286_v29 = vmax.f32 %v2142_v16, 0.0 }
 0x431   :  { %v2344_v28 = vpack.c.bf16 %v2286_v29, %v2285_v15  ;;  %v4476_v15 = vld [vmem:[#allocation7 + $0x90] sm:$0xff] }
 0x433   :  { %2184 = vmatmul.bf16.gmra.mxu2 %v4472_v46  ;;  %2472 = vmatmul.bf16.gmra.mxu3 %v2344_v28 }
 0x436   :  { %v2145_v5 = vpop.f32.mrf.mxu2 }
 0x437   :  { %v2287_v36 = vmax.f32 %v2145_v5, 0.0 }
 0x43e   :  { %v2147_v9 = vpop.f32.mrf.mxu2 }
 0x43f   :  { %v2288_v37 = vmax.f32 %v2147_v9, 0.0 }
 0x441   :  { %v2345_v8 = vpack.c.bf16 %v2288_v37, %v2287_v36 }
 0x443   :  { %2189 = vmatmul.bf16.gmra.mxu2 %v4473_v7  ;;  %2477 = vmatmul.bf16.gmra.mxu3 %v2345_v8 }
 0x446   :  { %v2150_v0 = vpop.f32.mrf.mxu2 }
 0x447   :  { %v2289_v27 = vmax.f32 %v2150_v0, 0.0 }
 0x44e   :  { %v2152_v20 = vpop.f32.mrf.mxu2 }
 0x44f   :  { %v2290_v59 = vmax.f32 %v2152_v20, 0.0 }
 0x451   :  { %v2346_v53 = vpack.c.bf16 %v2290_v59, %v2289_v27 }
 0x453   :  { %2194 = vmatmul.bf16.gmra.mxu2 %v4474_v32  ;;  %2482 = vmatmul.bf16.gmra.mxu3 %v2346_v53  ;;  %v4477_v53 = vld [vmem:[#allocation7 + $0x98] sm:$0xff] }
 0x456   :  { %v2155_v41 = vpop.f32.mrf.mxu2 }
 0x457   :  { %v2291_v26 = vmax.f32 %v2155_v41, 0.0 }
 0x45e   :  { %v2157_v45 = vpop.f32.mrf.mxu2 }
 0x45f   :  { %v2292_v14 = vmax.f32 %v2157_v45, 0.0 }
 0x461   :  { %v2347_v51 = vpack.c.bf16 %v2292_v14, %v2291_v26 }
 0x463   :  { %2199 = vmatmul.bf16.gmra.mxu2 %v4475_v50  ;;  %2487 = vmatmul.bf16.gmra.mxu3 %v2347_v51  ;;  %v4482_v50 = vld [vmem:[#allocation7 + $0xc0] sm:$0xff] }
 0x466   :  { %v2160_v4 = vpop.f32.mrf.mxu2  ;;  %v2448_v21 = vpop.f32.mrf.mxu3 }
 0x467   :  { %v2449_v58 = vadd.f32 %v5089_v3, %v2448_v21  ;;  %v2293_v39 = vmax.f32 %v2160_v4, 0.0 }
 0x469   :  { %v2608_v43 = vpack.c.bf16 %v2449_v58, %v2449_v58 }
 0x46b   :  { %v5093_v28 = vunpack.c.l.b16 %v2608_v43 }
 0x46e   :  { %v2162_v57 = vpop.f32.mrf.mxu2  ;;  %v2450_v38 = vpop.f32.mrf.mxu3 }
 0x46f   :  { %v2294_v23 = vmax.f32 %v2162_v57, 0.0  ;;  %v2451_v16 = vadd.f32 %v5089_v3, %v2450_v38 }
 0x471   :  { %v2348_v29 = vpack.c.bf16 %v2294_v23, %v2293_v39  ;;  %v2609_v46 = vpack.c.bf16 %v2451_v16, %v2451_v16  ;;  %v4478_v16 = vld [vmem:[#allocation7 + $0xa0] sm:$0xff] }
 0x473   :  { %v5095_v5 = vunpack.c.l.b16 %v2609_v46  ;;  %2204 = vmatmul.bf16.gmra.mxu2 %v4476_v15  ;;  %2492 = vmatmul.bf16.gmra.mxu3 %v2348_v29 }
 0x476   :  { %v2165_v36 = vpop.f32.mrf.mxu2  ;;  %v2453_v37 = vpop.f32.mrf.mxu3 }
 0x477   :  { %v2454_v7 = vadd.f32 %v5089_v3, %v2453_v37  ;;  %v2295_v20 = vmax.f32 %v2165_v36, 0.0 }
 0x479   :  { %v2610_v27 = vpack.c.bf16 %v2454_v7, %v2454_v7 }
 0x47b   :  { %v5101_v26 = vunpack.c.l.b16 %v2610_v27 }
 0x47e   :  { %v2167_v8 = vpop.f32.mrf.mxu2  ;;  %v2455_v0 = vpop.f32.mrf.mxu3 }
 0x47f   :  { %v2296_v59 = vmax.f32 %v2167_v8, 0.0  ;;  %v2456_v32 = vadd.f32 %v5089_v3, %v2455_v0 }
 0x481   :  { %v2349_v41 = vpack.c.bf16 %v2296_v59, %v2295_v20  ;;  %v2611_v45 = vpack.c.bf16 %v2456_v32, %v2456_v32 }
 0x483   :  { %v5103_v14 = vunpack.c.l.b16 %v2611_v45  ;;  %2209 = vmatmul.bf16.gmra.mxu2 %v4477_v53  ;;  %2497 = vmatmul.bf16.gmra.mxu3 %v2349_v41  ;;  %v4479_v45 = vld [vmem:[#allocation7 + $0xa8] sm:$0xff] }
 0x486   :  { %v2170_v51 = vpop.f32.mrf.mxu2  ;;  %v2458_v4 = vpop.f32.mrf.mxu3 }
 0x487   :  { %v2459_v21 = vadd.f32 %v5089_v3, %v2458_v4  ;;  %v2297_v38 = vmax.f32 %v2170_v51, 0.0 }
 0x489   :  { %v2612_v39 = vpack.c.bf16 %v2459_v21, %v2459_v21 }
 0x48b   :  { %v5109_v46 = vunpack.c.l.b16 %v2612_v39 }
 0x48e   :  { %v2172_v58 = vpop.f32.mrf.mxu2  ;;  %v2460_v57 = vpop.f32.mrf.mxu3 }
 0x48f   :  { %v2298_v43 = vmax.f32 %v2172_v58, 0.0  ;;  %v2461_v23 = vadd.f32 %v5089_v3, %v2460_v57 }
 0x491   :  { %v2350_v15 = vpack.c.bf16 %v2298_v43, %v2297_v38  ;;  %v2613_v29 = vpack.c.bf16 %v2461_v23, %v2461_v23 }
 0x493   :  { %v5111_v36 = vunpack.c.l.b16 %v2613_v29  ;;  %2214 = vmatmul.bf16.gmra.mxu2 %v4478_v16  ;;  %2502 = vmatmul.bf16.gmra.mxu3 %v2350_v15  ;;  %v4480_v29 = vld [vmem:[#allocation7 + $0xb0] sm:$0xff] }
 0x496   :  { %v2175_v7 = vpop.f32.mrf.mxu2  ;;  %v2463_v8 = vpop.f32.mrf.mxu3 }
 0x497   :  { %v2464_v0 = vadd.f32 %v5089_v3, %v2463_v8  ;;  %v2299_v59 = vmax.f32 %v2175_v7, 0.0 }
 0x499   :  { %v2614_v32 = vpack.c.bf16 %v2464_v0, %v2464_v0 }
 0x49b   :  { %v5117_v21 = vunpack.c.l.b16 %v2614_v32 }
 0x49e   :  { %v2177_v20 = vpop.f32.mrf.mxu2  ;;  %v2465_v27 = vpop.f32.mrf.mxu3 }
 0x49f   :  { %v2300_v53 = vmax.f32 %v2177_v20, 0.0  ;;  %v2466_v41 = vadd.f32 %v5089_v3, %v2465_v27 }
 0x4a1   :  { %v2351_v51 = vpack.c.bf16 %v2300_v53, %v2299_v59  ;;  %v2615_v4 = vpack.c.bf16 %v2466_v41, %v2466_v41  ;;  %v4481_v53 = vld [vmem:[#allocation7 + $0xb8] sm:$0xff] }
 0x4a3   :  { %v5119_v58 = vunpack.c.l.b16 %v2615_v4  ;;  %2219 = vmatmul.bf16.gmra.mxu2 %v4479_v45  ;;  %2507 = vmatmul.bf16.gmra.mxu3 %v2351_v51 }
 0x4a6   :  { %v2180_v38 = vpop.f32.mrf.mxu2  ;;  %v2468_v39 = vpop.f32.mrf.mxu3 }
 0x4a7   :  { %v2301_v16 = vmax.f32 %v2180_v38, 0.0 }
 0x4ae   :  { %v2182_v43 = vpop.f32.mrf.mxu2  ;;  %v2470_v23 = vpop.f32.mrf.mxu3 }
 0x4af   :  { %v2302_v15 = vmax.f32 %v2182_v43, 0.0 }
 0x4b1   :  { %v2352_v7 = vpack.c.bf16 %v2302_v15, %v2301_v16 }
 0x4b3   :  { %2224 = vmatmul.bf16.gmra.mxu2 %v4480_v29  ;;  %2512 = vmatmul.bf16.gmra.mxu3 %v2352_v7 }
 0x4b6   :  { %v2185_v8 = vpop.f32.mrf.mxu2  ;;  %v2473_v0 = vpop.f32.mrf.mxu3 }
 0x4b7   :  { %v2303_v59 = vmax.f32 %v2185_v8, 0.0  ;;  %v2474_v57 = vadd.f32 %v5089_v3, %v2473_v0 }
 0x4b9   :  { %v2618_v19 = vpack.c.bf16 %v2474_v57, %v2474_v57 }
 0x4be   :  { %v2187_v20 = vpop.f32.mrf.mxu2  ;;  %v2475_v27 = vpop.f32.mrf.mxu3 }
 0x4bf   :  { %v2304_v32 = vmax.f32 %v2187_v20, 0.0 }
 0x4c1   :  { %v2353_v41 = vpack.c.bf16 %v2304_v32, %v2303_v59 }
 0x4c3   :  { %2229 = vmatmul.bf16.gmra.mxu2 %v4481_v53  ;;  %2517 = vmatmul.bf16.gmra.mxu3 %v2353_v41 }
 0x4c6   :  { %v2190_v45 = vpop.f32.mrf.mxu2  ;;  %v2478_v51 = vpop.f32.mrf.mxu3 }
 0x4c7   :  { %v2305_v38 = vmax.f32 %v2190_v45, 0.0  ;;  %v2479_v20 = vadd.f32 %v5089_v3, %v2478_v51 }
 0x4ce   :  { %v2192_v4 = vpop.f32.mrf.mxu2  ;;  %v2480_v9 = vpop.f32.mrf.mxu3 }
 0x4cf   :  { %v2306_v43 = vmax.f32 %v2192_v4, 0.0  ;;  %v2481_v8 = vadd.f32 %v5089_v3, %v2480_v9  ;;  %v4483_v4 = vld [vmem:[#allocation7 + $0xc8] sm:$0xff] }
 0x4d1   :  { %v2354_v16 = vpack.c.bf16 %v2306_v43, %v2305_v38  ;;  %v2476_v38 = vadd.f32 %v5089_v3, %v2475_v27 }
 0x4d3   :  { %2234 = vmatmul.bf16.gmra.mxu2 %v4482_v50  ;;  %2522 = vmatmul.bf16.gmra.mxu3 %v2354_v16  ;;  %v2621_v50 = vpack.c.bf16 %v2481_v8, %v2481_v8  ;;  %v2619_v51 = vpack.c.bf16 %v2476_v38, %v2476_v38 }
 0x4d5   :  { %v2765_v60 = vunpack.c.l.b16 %v2621_v50  ;;  %v2763_v27 = vunpack.c.l.b16 %v2619_v51 }
 0x4d6   :  { %v2195_v15 = vpop.f32.mrf.mxu2  ;;  %v2483_v29 = vpop.f32.mrf.mxu3 }
 0x4d7   :  { %v2484_v7 = vadd.f32 %v5089_v3, %v2483_v29  ;;  %v2307_v53 = vmax.f32 %v2195_v15, 0.0  ;;  %v2620_v29 = vpack.c.bf16 %v2479_v20, %v2479_v20  ;;  %v2762_v20 = vunpack.c.l.b16 %v2618_v19 }
 0x4d9   :  { %v2622_v41 = vpack.c.bf16 %v2484_v7, %v2484_v7  ;;  %v2471_v7 = vadd.f32 %v5089_v3, %v2470_v23  ;;  %v2764_v31 = vunpack.c.l.b16 %v2620_v29 }
 0x4db   :  { %v2766_v42 = vunpack.c.l.b16 %v2622_v41  ;;  %v2774_v8 = vpack.c.b16 %v2765_v60, %v2764_v31  ;;  %v2617_v0 = vpack.c.bf16 %v2471_v7, %v2471_v7 }
 0x4de   :  { %v2197_v59 = vpop.f32.mrf.mxu2  ;;  %v2485_v32 = vpop.f32.mrf.mxu3 }
 0x4df   :  { %v2308_v37 = vmax.f32 %v2197_v59, 0.0  ;;  %v2486_v45 = vadd.f32 %v5089_v3, %v2485_v32 }
 0x4e1   :  { %v2355_v43 = vpack.c.bf16 %v2308_v37, %v2307_v53  ;;  %v2623_v16 = vpack.c.bf16 %v2486_v45, %v2486_v45  ;;  %v2469_v37 = vadd.f32 %v5089_v3, %v2468_v39  ;;  %v2773_v45 = vpack.c.b16 %v2763_v27, %v2762_v20 }
 0x4e3   :  { %v2767_v9 = vunpack.c.l.b16 %v2623_v16  ;;  %2239 = vmatmul.bf16.gmra.mxu2 %v4483_v4  ;;  %2527 = vmatmul.bf16.gmra.mxu3 %v2355_v43  ;;  %v2616_v41 = vpack.c.bf16 %v2469_v37, %v2469_v37  ;;  %v2761_v4 = vunpack.c.l.b16 %v2617_v0  ;;  %v4484_v16 = vld [vmem:[#allocation7 + $0xd0] sm:$0xff]  ;;  %v5553_v37 = vpack.c.b16 %v5111_v36, %v5109_v46 }
 0x4e4   :  { %v5555_v46 = vpack.c.b16 %v5095_v5, %v5093_v28 }
 0x4e5   :  { %v2775_v15 = vpack.c.b16 %v2767_v9, %v2766_v42  ;;  %v2760_v39 = vunpack.c.l.b16 %v2616_v41 }
 0x4e6   :  { %v2200_v59 = vpop.f32.mrf.mxu2  ;;  %v2488_v32 = vpop.f32.mrf.mxu3 }
 0x4e7   :  { %2784 = vmatpush.bf16.msrb.mxu0 %v2775_v15  ;;  %v2489_v53 = vadd.f32 %v5089_v3, %v2488_v32  ;;  %v2309_v23 = vmax.f32 %v2200_v59, 0.0  ;;  %v2772_v31 = vpack.c.b16 %v2761_v4, %v2760_v39  ;;  %v5552_v59 = vpack.c.b16 %v5119_v58, %v5117_v21 }
 0x4e8   :  { %v5554_v4 = vpack.c.b16 %v5103_v14, %v5101_v26 }
 0x4e9   :  { %v2624_v50 = vpack.c.bf16 %v2489_v53, %v2489_v53 }
 0x4eb   :  { %2785 = vmatpush.bf16.msrb.mxu0 %v2774_v8  ;;  %v5133_v19 = vunpack.c.l.b16 %v2624_v50 }
 0x4ee   :  { %v2202_v42 = vpop.f32.mrf.mxu2  ;;  %v2490_v38 = vpop.f32.mrf.mxu3 }
 0x4ef   :  { %v2310_v43 = vmax.f32 %v2202_v42, 0.0  ;;  %v2491_v57 = vadd.f32 %v5089_v3, %v2490_v38  ;;  %2786 = vmatpush.bf16.msrb.mxu0 %v2773_v45  ;;  %v4485_v45 = vld [vmem:[#allocation7 + $0xd8] sm:$0xff] }
 0x4f1   :  { %v2356_v29 = vpack.c.bf16 %v2310_v43, %v2309_v23  ;;  %v2625_v60 = vpack.c.bf16 %v2491_v57, %v2491_v57 }
 0x4f3   :  { %v5135_v9 = vunpack.c.l.b16 %v2625_v60  ;;  %2244 = vmatmul.bf16.gmra.mxu2 %v4484_v16  ;;  %2532 = vmatmul.bf16.gmra.mxu3 %v2356_v29  ;;  %v4486_v60 = vld [vmem:[#allocation7 + $0xe0] sm:$0xff] }
 0x4f4   :  { %2787 = vmatpush.bf16.msrb.mxu0 %v2772_v31 }
 0x4f6   :  { %v2205_v15 = vpop.f32.mrf.mxu2  ;;  %v2493_v7 = vpop.f32.mrf.mxu3 }
 0x4f7   :  { %v2494_v32 = vadd.f32 %v5089_v3, %v2493_v7  ;;  %v2311_v0 = vmax.f32 %v2205_v15, 0.0 }
 0x4f8   :  { %2788 = vmatpush.bf16.msrb.mxu0 %v5552_v59 }
 0x4f9   :  { %v2626_v20 = vpack.c.bf16 %v2494_v32, %v2494_v32 }
 0x4fb   :  { %v5150_v42 = vunpack.c.l.b16 %v2626_v20 }
 0x4fc   :  { %2789 = vmatpush.bf16.msrb.mxu0 %v5553_v37 }
 0x4fe   :  { %v2207_v27 = vpop.f32.mrf.mxu2  ;;  %v2495_v8 = vpop.f32.mrf.mxu3 }
 0x4ff   :  { %v2312_v53 = vmax.f32 %v2207_v27, 0.0  ;;  %v2496_v41 = vadd.f32 %v5089_v3, %v2495_v8 }
 0x500   :  { %2790 = vmatpush.bf16.msrb.mxu0 %v5554_v4 }
 0x501   :  { %v2357_v21 = vpack.c.bf16 %v2312_v53, %v2311_v0  ;;  %v2627_v58 = vpack.c.bf16 %v2496_v41, %v2496_v41 }
 0x503   :  { %v5152_v38 = vunpack.c.l.b16 %v2627_v58  ;;  %2249 = vmatmul.bf16.gmra.mxu2 %v4485_v45  ;;  %2537 = vmatmul.bf16.gmra.mxu3 %v2357_v21  ;;  %v4487_v45 = vld [vmem:[#allocation7 + $0xe8] sm:$0xff] }
 0x504   :  { %2791 = vmatpush.bf16.msrb.mxu0 %v5555_v46 }
 0x506   :  { %v2210_v23 = vpop.f32.mrf.mxu2  ;;  %v2498_v50 = vpop.f32.mrf.mxu3 }
 0x507   :  { %v2499_v26 = vadd.f32 %v5089_v3, %v2498_v50  ;;  %v2313_v57 = vmax.f32 %v2210_v23, 0.0 }
 0x509   :  { %v2628_v16 = vpack.c.bf16 %v2499_v26, %v2499_v26 }
 0x50b   :  { %v5161_v7 = vunpack.c.l.b16 %v2628_v16 }
 0x50e   :  { %v2212_v14 = vpop.f32.mrf.mxu2  ;;  %v2500_v43 = vpop.f32.mrf.mxu3 }
 0x50f   :  { %v2314_v39 = vmax.f32 %v2212_v14, 0.0  ;;  %v2501_v29 = vadd.f32 %v5089_v3, %v2500_v43 }
 0x511   :  { %v2358_v31 = vpack.c.bf16 %v2314_v39, %v2313_v57  ;;  %v2629_v15 = vpack.c.bf16 %v2501_v29, %v2501_v29  ;;  %v4488_v39 = vld [vmem:[#allocation7 + $0xf0] sm:$0xff] }
 0x513   :  { %v5163_v28 = vunpack.c.l.b16 %v2629_v15  ;;  %2254 = vmatmul.bf16.gmra.mxu2 %v4486_v60  ;;  %2542 = vmatmul.bf16.gmra.mxu3 %v2358_v31 }
 0x516   :  { %v2215_v59 = vpop.f32.mrf.mxu2  ;;  %v2503_v32 = vpop.f32.mrf.mxu3 }
 0x517   :  { %v2504_v37 = vadd.f32 %v5089_v3, %v2503_v32  ;;  %v2315_v0 = vmax.f32 %v2215_v59, 0.0 }
 0x519   :  { %v2630_v20 = vpack.c.bf16 %v2504_v37, %v2504_v37 }
 0x51b   :  { %v5169_v58 = vunpack.c.l.b16 %v2630_v20 }
 0x51e   :  { %v2217_v27 = vpop.f32.mrf.mxu2  ;;  %v2505_v8 = vpop.f32.mrf.mxu3 }
 0x51f   :  { %v2316_v53 = vmax.f32 %v2217_v27, 0.0  ;;  %v2506_v41 = vadd.f32 %v5089_v3, %v2505_v8  ;;  %v4489_v27 = vld [vmem:[#allocation7 + $0xf8] sm:$0xff] }
 0x521   :  { %v2359_v4 = vpack.c.bf16 %v2316_v53, %v2315_v0  ;;  %v2631_v21 = vpack.c.bf16 %v2506_v41, %v2506_v41 }
 0x523   :  { %v5171_v46 = vunpack.c.l.b16 %v2631_v21  ;;  %2259 = vmatmul.bf16.gmra.mxu2 %v4487_v45  ;;  %2547 = vmatmul.bf16.gmra.mxu3 %v2359_v4 }
 0x525   :  { %v2948_v23 = vpack.c.b16 %v5171_v46, %v5169_v58 }
 0x526   :  { %v2220_v50 = vpop.f32.mrf.mxu2  ;;  %v2508_v26 = vpop.f32.mrf.mxu3 }
 0x527   :  { %v2317_v57 = vmax.f32 %v2220_v50, 0.0 }
 0x52e   :  { %v2222_v14 = vpop.f32.mrf.mxu2  ;;  %v2510_v43 = vpop.f32.mrf.mxu3 }
 0x52f   :  { %v2318_v16 = vmax.f32 %v2222_v14, 0.0 }
 0x531   :  { %v2360_v29 = vpack.c.bf16 %v2318_v16, %v2317_v57 }
 0x533   :  { %2264 = vmatmul.bf16.gmra.mxu2 %v4488_v39  ;;  %2552 = vmatmul.bf16.gmra.mxu3 %v2360_v29 }
 0x536   :  { %v2225_v60 = vpop.f32.mrf.mxu2  ;;  %v2513_v31 = vpop.f32.mrf.mxu3 }
 0x537   :  { %v2319_v32 = vmax.f32 %v2225_v60, 0.0 }
 0x53e   :  { %v2227_v15 = vpop.f32.mrf.mxu2  ;;  %v2515_v59 = vpop.f32.mrf.mxu3 }
 0x53f   :  { %v2320_v37 = vmax.f32 %v2227_v15, 0.0 }
 0x541   :  { %v2361_v8 = vpack.c.bf16 %v2320_v37, %v2319_v32 }
 0x543   :  { %2269 = vmatmul.bf16.gmra.mxu2 %v4489_v27  ;;  %2557 = vmatmul.bf16.gmra.mxu3 %v2361_v8  ;;  %v2516_v8 = vadd.f32 %v5089_v3, %v2515_v59 }
 0x546   :  { %v2230_v0 = vpop.f32.mrf.mxu2  ;;  %v2518_v20 = vpop.f32.mrf.mxu3 }
 0x547   :  { %v2321_v45 = vmax.f32 %v2230_v0, 0.0  ;;  %v2519_v39 = vadd.f32 %v5089_v3, %v2518_v20  ;;  %v2511_v20 = vadd.f32 %v5089_v3, %v2510_v43 }
 0x54e   :  { %v2232_v53 = vpop.f32.mrf.mxu2  ;;  %v2520_v41 = vpop.f32.mrf.mxu3 }
 0x54f   :  { %v2322_v4 = vmax.f32 %v2232_v53, 0.0  ;;  %v2521_v16 = vadd.f32 %v5089_v3, %v2520_v41  ;;  %v2635_v41 = vpack.c.bf16 %v2516_v8, %v2516_v8 }
 0x551   :  { %v2362_v21 = vpack.c.bf16 %v2322_v4, %v2321_v45  ;;  %v2637_v0 = vpack.c.bf16 %v2521_v16, %v2521_v16  ;;  %v2514_v4 = vadd.f32 %v5089_v3, %v2513_v31  ;;  %v2633_v16 = vpack.c.bf16 %v2511_v20, %v2511_v20 }
 0x553   :  { %2562 = vmatmul.bf16.gmra.mxu3 %v2362_v21  ;;  %v2636_v21 = vpack.c.bf16 %v2519_v39, %v2519_v39  ;;  %v2942_v36 = vunpack.c.l.b16 %v2637_v0  ;;  %v2634_v5 = vpack.c.bf16 %v2514_v4, %v2514_v4 }
 0x555   :  { %v2941_v59 = vunpack.c.l.b16 %v2636_v21  ;;  %v2939_v39 = vunpack.c.l.b16 %v2634_v5 }
 0x556   :  { %v2235_v50 = vpop.f32.mrf.mxu2  ;;  %v2523_v14 = vpop.f32.mrf.mxu3 }
 0x557   :  { %v2524_v57 = vadd.f32 %v5089_v3, %v2523_v14  ;;  %v2323_v15 = vmax.f32 %v2235_v50, 0.0 }
 0x559   :  { %v2638_v32 = vpack.c.bf16 %v2524_v57, %v2524_v57  ;;  %v2509_v57 = vadd.f32 %v5089_v3, %v2508_v26 }
 0x55b   :  { %v2943_v14 = vunpack.c.l.b16 %v2638_v32  ;;  %v2632_v31 = vpack.c.bf16 %v2509_v57, %v2509_v57 }
 0x55d   :  { %v2937_v8 = vunpack.c.l.b16 %v2632_v31 }
 0x55e   :  { %v2237_v29 = vpop.f32.mrf.mxu2  ;;  %v2525_v60 = vpop.f32.mrf.mxu3 }
 0x55f   :  { %v2324_v37 = vmax.f32 %v2237_v29, 0.0  ;;  %v2526_v27 = vadd.f32 %v5089_v3, %v2525_v60 }
 0x561   :  { %v2363_v53 = vpack.c.bf16 %v2324_v37, %v2323_v15  ;;  %v2639_v45 = vpack.c.bf16 %v2526_v27, %v2526_v27  ;;  %v2940_v15 = vunpack.c.l.b16 %v2635_v41  ;;  %v2951_v37 = vpack.c.b16 %v2942_v36, %v2941_v59 }
 0x562   :  { %v2938_v27 = vunpack.c.l.b16 %v2633_v16 }
 0x563   :  { %v2944_v51 = vunpack.c.l.b16 %v2639_v45  ;;  %2567 = vmatmul.bf16.gmra.mxu3 %v2363_v53  ;;  %v2950_v43 = vpack.c.b16 %v2940_v15, %v2939_v39 }
 0x564   :  { %v2949_v20 = vpack.c.b16 %v2938_v27, %v2937_v8 }
 0x565   :  { %v2952_v50 = vpack.c.b16 %v2944_v51, %v2943_v14 }
 0x566   :  { %v2240_v29 = vpop.f32.mrf.mxu2  ;;  %v2528_v60 = vpop.f32.mrf.mxu3 }
 0x567   :  { %2961 = vmatpush.bf16.msrb.mxu1 %v2952_v50  ;;  %v2529_v32 = vadd.f32 %v5089_v3, %v2528_v60  ;;  %v2325_v53 = vmax.f32 %v2240_v29, 0.0  ;;  %v5556_v60 = vpack.c.b16 %v5163_v28, %v5161_v7  ;;  %v5558_v7 = vpack.c.b16 %v5135_v9, %v5133_v19  ;;  %v4514_v9 = vld [vmem:[#allocation7 + $0x40] sm:$0xff] }
 0x569   :  { %v2640_v26 = vpack.c.bf16 %v2529_v32, %v2529_v32  ;;  %v5557_v32 = vpack.c.b16 %v5152_v38, %v5150_v42 }
 0x56b   :  { %2962 = vmatpush.bf16.msrb.mxu1 %v2951_v37  ;;  %v5185_v36 = vunpack.c.l.b16 %v2640_v26 }
 0x56e   :  { %v2242_v0 = vpop.f32.mrf.mxu2  ;;  %v2530_v51 = vpop.f32.mrf.mxu3 }
 0x56f   :  { %v2326_v45 = vmax.f32 %v2242_v0, 0.0  ;;  %v2531_v4 = vadd.f32 %v5089_v3, %v2530_v51  ;;  %2963 = vmatpush.bf16.msrb.mxu1 %v2950_v43 }
 0x571   :  { %v2364_v21 = vpack.c.bf16 %v2326_v45, %v2325_v53  ;;  %v2641_v14 = vpack.c.bf16 %v2531_v4, %v2531_v4 }
 0x573   :  { %v5187_v5 = vunpack.c.l.b16 %v2641_v14  ;;  %2572 = vmatmul.bf16.gmra.mxu3 %v2364_v21  ;;  %2964 = vmatpush.bf16.msrb.mxu1 %v2949_v20 }
 0x576   :  { %v2245_v50 = vpop.f32.mrf.mxu2  ;;  %v2533_v57 = vpop.f32.mrf.mxu3 }
 0x577   :  { %2965 = vmatpush.bf16.msrb.mxu1 %v2948_v23  ;;  %v2534_v29 = vadd.f32 %v5089_v3, %v2533_v57  ;;  %v2327_v15 = vmax.f32 %v2245_v50, 0.0 }
 0x579   :  { %v2642_v37 = vpack.c.bf16 %v2534_v29, %v2534_v29 }
 0x57b   :  { %2966 = vmatpush.bf16.msrb.mxu1 %v5556_v60  ;;  %v5202_v46 = vunpack.c.l.b16 %v2642_v37 }
 0x57e   :  { %v2247_v59 = vpop.f32.mrf.mxu2  ;;  %v2535_v16 = vpop.f32.mrf.mxu3 }
 0x57f   :  { %v2328_v31 = vmax.f32 %v2247_v59, 0.0  ;;  %v2536_v39 = vadd.f32 %v5089_v3, %v2535_v16  ;;  %2967 = vmatpush.bf16.msrb.mxu1 %v5557_v32 }
 0x581   :  { %v2365_v27 = vpack.c.bf16 %v2328_v31, %v2327_v15  ;;  %v2643_v58 = vpack.c.bf16 %v2536_v39, %v2536_v39 }
 0x583   :  { %v5204_v23 = vunpack.c.l.b16 %v2643_v58  ;;  %2577 = vmatmul.bf16.gmra.mxu3 %v2365_v27  ;;  %2968 = vmatpush.bf16.msrb.mxu1 %v5558_v7  ;;  %v4515_v7 = vld [vmem:[#allocation7 + $0x48] sm:$0xff] }
 0x585   :  { %v3187_v28 = vpack.c.b16 %v5204_v23, %v5202_v46 }
 0x586   :  { %v2250_v43 = vpop.f32.mrf.mxu2  ;;  %v2538_v8 = vpop.f32.mrf.mxu3  ;;  %2969 = vmatmul.bf16.vlgmr.msrb.gmra.mxu1 %v4514_v9 }
 0x587   :  { %v2539_v0 = vadd.f32 %v5089_v3, %v2538_v8  ;;  %v2329_v51 = vmax.f32 %v2250_v43, 0.0 }
 0x589   :  { %v2644_v53 = vpack.c.bf16 %v2539_v0, %v2539_v0 }
 0x58b   :  { %v5213_v14 = vunpack.c.l.b16 %v2644_v53 }
 0x58e   :  { %v2252_v42 = vpop.f32.mrf.mxu2  ;;  %v2540_v38 = vpop.f32.mrf.mxu3 }
 0x58f   :  { %v2330_v26 = vmax.f32 %v2252_v42, 0.0  ;;  %v2541_v45 = vadd.f32 %v5089_v3, %v2540_v38 }
 0x591   :  { %v2366_v4 = vpack.c.bf16 %v2330_v26, %v2329_v51  ;;  %v2645_v21 = vpack.c.bf16 %v2541_v45, %v2541_v45  ;;  %v4516_v45 = vld [vmem:[#allocation7 + $0x50] sm:$0xff] }
 0x593   :  { %v5215_v19 = vunpack.c.l.b16 %v2645_v21  ;;  %2582 = vmatmul.bf16.gmra.mxu3 %v2366_v4 }
 0x595   :  { %v3188_v20 = vpack.c.b16 %v5215_v19, %v5213_v14  ;;  %v4521_v19 = vld [vmem:[#allocation7 + $0x78] sm:$0xff] }
 0x596   :  { %v2255_v50 = vpop.f32.mrf.mxu2  ;;  %v2543_v57 = vpop.f32.mrf.mxu3  ;;  %2974 = vmatmul.bf16.gmra.mxu1 %v4515_v7 }
 0x597   :  { %v2544_v29 = vadd.f32 %v5089_v3, %v2543_v57  ;;  %v2331_v16 = vmax.f32 %v2255_v50, 0.0 }
 0x599   :  { %v2646_v15 = vpack.c.bf16 %v2544_v29, %v2544_v29 }
 0x59b   :  { %v5221_v27 = vunpack.c.l.b16 %v2646_v15 }
 0x59e   :  { %v2257_v60 = vpop.f32.mrf.mxu2  ;;  %v2545_v59 = vpop.f32.mrf.mxu3 }
 0x59f   :  { %v2332_v37 = vmax.f32 %v2257_v60, 0.0  ;;  %v2546_v31 = vadd.f32 %v5089_v3, %v2545_v59  ;;  %v4517_v59 = vld [vmem:[#allocation7 + $0x58] sm:$0xff] }
 0x5a1   :  { %v2367_v39 = vpack.c.bf16 %v2332_v37, %v2331_v16  ;;  %v2647_v32 = vpack.c.bf16 %v2546_v31, %v2546_v31 }
 0x5a3   :  { %v5223_v58 = vunpack.c.l.b16 %v2647_v32  ;;  %2587 = vmatmul.bf16.gmra.mxu3 %v2367_v39 }
 0x5a5   :  { %v3189_v43 = vpack.c.b16 %v5223_v58, %v5221_v27  ;;  %v5559_v58 = vpack.c.b16 %v5187_v5, %v5185_v36 }
 0x5a6   :  { %v2260_v8 = vpop.f32.mrf.mxu2  ;;  %v2548_v0 = vpop.f32.mrf.mxu3  ;;  %2979 = vmatmul.bf16.gmra.mxu1 %v4516_v45 }
 0x5a7   :  { %v2333_v51 = vmax.f32 %v2260_v8, 0.0  ;;  %v4518_v8 = vld [vmem:[#allocation7 + $0x60] sm:$0xff] }
 0x5ae   :  { %v2262_v42 = vpop.f32.mrf.mxu2  ;;  %v2550_v38 = vpop.f32.mrf.mxu3 }
 0x5af   :  { %v2334_v53 = vmax.f32 %v2262_v42, 0.0 }
 0x5b1   :  { %v2368_v26 = vpack.c.bf16 %v2334_v53, %v2333_v51 }
 0x5b3   :  { %2592 = vmatmul.bf16.gmra.mxu3 %v2368_v26 }
 0x5b6   :  { %v2265_v4 = vpop.f32.mrf.mxu2  ;;  %v2553_v21 = vpop.f32.mrf.mxu3  ;;  %2984 = vmatmul.bf16.gmra.mxu1 %v4517_v59 }
 0x5b7   :  { %v2335_v57 = vmax.f32 %v2265_v4, 0.0  ;;  %v2554_v59 = vadd.f32 %v5089_v3, %v2553_v21 }
 0x5be   :  { %v2267_v9 = vpop.f32.mrf.mxu2  ;;  %v2555_v50 = vpop.f32.mrf.mxu3 }
 0x5bf   :  { %v2336_v29 = vmax.f32 %v2267_v9, 0.0 }
 0x5c1   :  { %v2369_v60 = vpack.c.bf16 %v2336_v29, %v2335_v57  ;;  %v2556_v57 = vadd.f32 %v5089_v3, %v2555_v50 }
 0x5c3   :  { %2597 = vmatmul.bf16.gmra.mxu3 %v2369_v60 }
 0x5c6   :  { %v2270_v16 = vpop.f32.mrf.mxu2  ;;  %v2558_v15 = vpop.f32.mrf.mxu3  ;;  %2989 = vmatmul.bf16.gmra.mxu1 %v4518_v8 }
 0x5c7   :  { %v2337_v39 = vmax.f32 %v2270_v16, 0.0  ;;  %v2559_v45 = vadd.f32 %v5089_v3, %v2558_v15  ;;  %v2549_v15 = vadd.f32 %v5089_v3, %v2548_v0 }
 0x5c9   :  { %v2652_v16 = vpack.c.bf16 %v2559_v45, %v2559_v45  ;;  %v2648_v21 = vpack.c.bf16 %v2549_v15, %v2549_v15 }
 0x5ce   :  { %v2272_v37 = vpop.f32.mrf.mxu2  ;;  %v2560_v31 = vpop.f32.mrf.mxu3 }
 0x5cf   :  { %v2338_v32 = vmax.f32 %v2272_v37, 0.0  ;;  %v2561_v53 = vadd.f32 %v5089_v3, %v2560_v31 }
 0x5d1   :  { %v2370_v7 = vpack.c.bf16 %v2338_v32, %v2337_v39  ;;  %v2653_v29 = vpack.c.bf16 %v2561_v53, %v2561_v53  ;;  %v2551_v32 = vadd.f32 %v5089_v3, %v2550_v38 }
 0x5d3   :  { %2602 = vmatmul.bf16.gmra.mxu3 %v2370_v7  ;;  %v2651_v7 = vpack.c.bf16 %v2556_v57, %v2556_v57  ;;  %v3183_v8 = vunpack.c.l.b16 %v2653_v29  ;;  %v2649_v50 = vpack.c.bf16 %v2551_v32, %v2551_v32 }
 0x5d5   :  { %v3181_v53 = vunpack.c.l.b16 %v2651_v7  ;;  %v3179_v38 = vunpack.c.l.b16 %v2649_v50 }
 0x5d6   :  { %v2563_v42 = vpop.f32.mrf.mxu3 }
 0x5d7   :  { %v2564_v51 = vadd.f32 %v5089_v3, %v2563_v42  ;;  %v4519_v42 = vld [vmem:[#allocation7 + $0x68] sm:$0xff] }
 0x5d8   :  { %2994 = vmatmul.bf16.gmra.mxu1 %v4519_v42 }
 0x5d9   :  { %v2654_v4 = vpack.c.bf16 %v2564_v51, %v2564_v51  ;;  %v2650_v51 = vpack.c.bf16 %v2554_v59, %v2554_v59 }
 0x5db   :  { %v3184_v37 = vunpack.c.l.b16 %v2654_v4  ;;  %v3180_v45 = vunpack.c.l.b16 %v2650_v51 }
 0x5dd   :  { %v3191_v57 = vpack.c.b16 %v3181_v53, %v3180_v45 }
 0x5de   :  { %v2565_v26 = vpop.f32.mrf.mxu3 }
 0x5df   :  { %v2566_v9 = vadd.f32 %v5089_v3, %v2565_v26  ;;  %v3182_v26 = vunpack.c.l.b16 %v2652_v16 }
 0x5e1   :  { %v2655_v60 = vpack.c.bf16 %v2566_v9, %v2566_v9  ;;  %v3192_v9 = vpack.c.b16 %v3183_v8, %v3182_v26 }
 0x5e3   :  { %v3185_v39 = vunpack.c.l.b16 %v2655_v60  ;;  %v3178_v60 = vunpack.c.l.b16 %v2648_v21 }
 0x5e5   :  { %v3193_v31 = vpack.c.b16 %v3185_v39, %v3184_v37  ;;  %v3190_v0 = vpack.c.b16 %v3179_v38, %v3178_v60  ;;  %v4507_v38 = vld [vmem:[#allocation7 + $0x8] sm:$0xff] }
 0x5e6   :  { %v2568_v41 = vpop.f32.mrf.mxu3 }
 0x5e7   :  { %3202 = vmatpush.bf16.msra.mxu0 %v3193_v31  ;;  %v2569_v4 = vadd.f32 %v5089_v3, %v2568_v41  ;;  %v4520_v41 = vld [vmem:[#allocation7 + $0x70] sm:$0xff] }
 0x5e8   :  { %2999 = vmatmul.bf16.gmra.mxu1 %v4520_v41 }
 0x5e9   :  { %v2656_v37 = vpack.c.bf16 %v2569_v4, %v2569_v4 }
 0x5eb   :  { %3203 = vmatpush.bf16.msra.mxu0 %v3192_v9  ;;  %v5237_v16 = vunpack.c.l.b16 %v2656_v37 }
 0x5ee   :  { %v2570_v29 = vpop.f32.mrf.mxu3 }
 0x5ef   :  { %v2571_v39 = vadd.f32 %v5089_v3, %v2570_v29  ;;  %3204 = vmatpush.bf16.msra.mxu0 %v3191_v57 }
 0x5f1   :  { %v2657_v59 = vpack.c.bf16 %v2571_v39, %v2571_v39 }
 0x5f3   :  { %v5239_v32 = vunpack.c.l.b16 %v2657_v59  ;;  %3205 = vmatpush.bf16.msra.mxu0 %v3190_v0 }
 0x5f6   :  { %v2573_v8 = vpop.f32.mrf.mxu3 }
 0x5f7   :  { %3206 = vmatpush.bf16.msra.mxu0 %v3189_v43  ;;  %v2574_v31 = vadd.f32 %v5089_v3, %v2573_v8  ;;  %v4506_v43 = vld [vmem:[#allocation7] sm:$0xff] }
 0x5f8   :  { %3004 = vmatmul.bf16.gmra.mxu1 %v4521_v19  ;;  %2792 = vmatmul.bf16.vlgmr.msrb.gmra.mxu0 %v4506_v43 }
 0x5f9   :  { %v2658_v15 = vpack.c.bf16 %v2574_v31, %v2574_v31 }
 0x5fb   :  { %3207 = vmatpush.bf16.msra.mxu0 %v3188_v20  ;;  %v5254_v50 = vunpack.c.l.b16 %v2658_v15  ;;  %v4508_v15 = vld [vmem:[#allocation7 + $0x10] sm:$0xff] }
 0x5fe   :  { %v2575_v42 = vpop.f32.mrf.mxu3 }
 0x5ff   :  { %v2576_v51 = vadd.f32 %v5089_v3, %v2575_v42  ;;  %3208 = vmatpush.bf16.msra.mxu0 %v3187_v28 }
 0x601   :  { %v2659_v26 = vpack.c.bf16 %v2576_v51, %v2576_v51 }
 0x603   :  { %v5256_v27 = vunpack.c.l.b16 %v2659_v26  ;;  %3209 = vmatpush.bf16.msra.mxu0 %v5559_v58  ;;  %v5269_v36 = vpop.f32.mrf.mxu1 }
 0x606   :  { %v2578_v20 = vpop.f32.mrf.mxu3 }
 0x607   :  { %v2579_v46 = vadd.f32 %v5089_v3, %v2578_v20  ;;  %v4509_v20 = vld [vmem:[#allocation7 + $0x18] sm:$0xff] }
 0x608   :  { %2797 = vmatmul.bf16.gmra.mxu0 %v4507_v38 }
 0x609   :  { %v2660_v28 = vpack.c.bf16 %v2579_v46, %v2579_v46 }
 0x60b   :  { %v5265_v21 = vunpack.c.l.b16 %v2660_v28  ;;  %v5274_v29 = vpop.f32.mrf.mxu1 }
 0x60e   :  { %v2580_v23 = vpop.f32.mrf.mxu3 }
 0x60f   :  { %v2581_v53 = vadd.f32 %v5089_v3, %v2580_v23 }
 0x611   :  { %v2661_v9 = vpack.c.bf16 %v2581_v53, %v2581_v53  ;;  %v4510_v53 = vld [vmem:[#allocation7 + $0x20] sm:$0xff] }
 0x613   :  { %v5267_v45 = vunpack.c.l.b16 %v2661_v9  ;;  %v5281_v8 = vpop.f32.mrf.mxu1 }
 0x616   :  { %v2583_v4 = vpop.f32.mrf.mxu3 }
 0x617   :  { %v2584_v57 = vadd.f32 %v5089_v3, %v2583_v4 }
 0x618   :  { %2802 = vmatmul.bf16.gmra.mxu0 %v4508_v15 }
 0x619   :  { %v2662_v37 = vpack.c.bf16 %v2584_v57, %v2584_v57 }
 0x61b   :  { %v5277_v59 = vunpack.c.l.b16 %v2662_v37  ;;  %v5285_v51 = vpop.f32.mrf.mxu1 }
 0x61e   :  { %v2585_v60 = vpop.f32.mrf.mxu3 }
 0x61f   :  { %v2586_v39 = vadd.f32 %v5089_v3, %v2585_v60  ;;  %v4511_v60 = vld [vmem:[#allocation7 + $0x28] sm:$0xff] }
 0x621   :  { %v2663_v0 = vpack.c.bf16 %v2586_v39, %v2586_v39 }
 0x623   :  { %v5279_v41 = vunpack.c.l.b16 %v2663_v0  ;;  %v5287_v58 = vpop.f32.mrf.mxu1 }
 0x626   :  { %v2588_v42 = vpop.f32.mrf.mxu3 }
 0x628   :  { %2807 = vmatmul.bf16.gmra.mxu0 %v4509_v20 }
 0x62b   :  { %v5289_v43 = vpop.f32.mrf.mxu1 }
 0x62e   :  { %v2590_v26 = vpop.f32.mrf.mxu3 }
 0x62f   :  { %v2591_v61 = vadd.f32 %v5089_v3, %v2590_v26 }
 0x633   :  { %v5291_v23 = vpop.f32.mrf.mxu1 }
 0x636   :  { %v2593_v19 = vpop.f32.mrf.mxu3 }
 0x637   :  { %v2594_v48 = vadd.f32 %v5089_v3, %v2593_v19 }
 0x638   :  { %2812 = vmatmul.bf16.gmra.mxu0 %v4510_v53 }
 0x63b   :  { %v5293_v9 = vpop.f32.mrf.mxu1 }
 0x63e   :  { %v2595_v46 = vpop.f32.mrf.mxu3 }
 0x63f   :  { %v2596_v14 = vadd.f32 %v5089_v3, %v2595_v46  ;;  %v4512_v46 = vld [vmem:[#allocation7 + $0x30] sm:$0xff] }
 0x641   :  { %v2667_v1 = vpack.c.bf16 %v2596_v14, %v2596_v14 }
 0x643   :  { %v5295_v38 = vpop.f32.mrf.mxu1 }
 0x646   :  { %v2598_v28 = vpop.f32.mrf.mxu3 }
 0x647   :  { %v2599_v20 = vadd.f32 %v5089_v3, %v2598_v28  ;;  %v2589_v28 = vadd.f32 %v5089_v3, %v2588_v42  ;;  %v4530_v42 = vld [vmem:[#allocation7 + $0xc0] sm:$0xff] }
 0x648   :  { %2817 = vmatmul.bf16.gmra.mxu0 %v4511_v60 }
 0x649   :  { %v2668_v56 = vpack.c.bf16 %v2599_v20, %v2599_v20 }
 0x64b   :  { %v5298_v39 = vpop.f32.mrf.mxu1 }
 0x64e   :  { %v2600_v4 = vpop.f32.mrf.mxu3 }
 0x64f   :  { %v2601_v0 = vadd.f32 %v5089_v3, %v2600_v4 }
 0x651   :  { %v2669_v5 = vpack.c.bf16 %v2601_v0, %v2601_v0  ;;  %v2665_v0 = vpack.c.bf16 %v2591_v61, %v2591_v61  ;;  %v4513_v61 = vld [vmem:[#allocation7 + $0x38] sm:$0xff] }
 0x653   :  { %v3360_v4 = vunpack.c.l.b16 %v2669_v5  ;;  %v3356_v26 = vunpack.c.l.b16 %v2665_v0  ;;  %v4534_v0 = vld [vmem:[#allocation7 + $0xe0] sm:$0xff] }
 0x656   :  { %v2603_v57 = vpop.f32.mrf.mxu3 }
 0x657   :  { %v2604_v37 = vadd.f32 %v5089_v3, %v2603_v57  ;;  %v2995_v57 = vpop.f32.mrf.mxu1 }
 0x658   :  { %3046 = vrot.lane.b32.xlu1 %v2995_v57, %s4643_s13  ;;  %2822 = vmatmul.bf16.gmra.mxu0 %v4512_v46  ;;  %v4522_v46 = vld [vmem:[#allocation7 + $0x80] sm:$0xff] }
 0x659   :  { %v2670_v7 = vpack.c.bf16 %v2604_v37, %v2604_v37  ;;  %v2666_v37 = vpack.c.bf16 %v2594_v48, %v2594_v48 }
 0x65b   :  { %v3361_v60 = vunpack.c.l.b16 %v2670_v7  ;;  %v2664_v7 = vpack.c.bf16 %v2589_v28, %v2589_v28  ;;  %v4533_v28 = vld [vmem:[#allocation7 + $0xd8] sm:$0xff] }
 0x65e   :  { %v2605_v15 = vpop.f32.mrf.mxu3 }
 0x65f   :  { %v2606_v53 = vadd.f32 %v5089_v3, %v2605_v15  ;;  %v3359_v15 = vunpack.c.l.b16 %v2668_v56  ;;  %v2997_v20 = vpop.f32.mrf.mxu1  ;;  %v5560_v56 = vpack.c.b16 %v5279_v41, %v5277_v59  ;;  %v5562_v3 = vpack.c.b16 %v5256_v27, %v5254_v50  ;;  %v4531_v50 = vld [vmem:[#allocation7 + $0xc8] sm:$0xff] }
 0x660   :  { %3048 = vrot.lane.b32.xlu2 %v2997_v20, %s4643_s13 }
 0x661   :  { %v2671_v31 = vpack.c.bf16 %v2606_v53, %v2606_v53  ;;  %v3358_v53 = vunpack.c.l.b16 %v2667_v1  ;;  %v3369_v19 = vpack.c.b16 %v3360_v4, %v3359_v15  ;;  %v5561_v1 = vpack.c.b16 %v5267_v45, %v5265_v21 }
 0x663   :  { %v3362_v17 = vunpack.c.l.b16 %v2671_v31  ;;  %v3357_v31 = vunpack.c.l.b16 %v2666_v37 }
 0x665   :  { %v3370_v18 = vpack.c.b16 %v3362_v17, %v3361_v60  ;;  %v3368_v14 = vpack.c.b16 %v3358_v53, %v3357_v31  ;;  %v3355_v17 = vunpack.c.l.b16 %v2664_v7  ;;  %v5563_v60 = vpack.c.b16 %v5239_v32, %v5237_v16  ;;  %v4532_v32 = vld [vmem:[#allocation7 + $0xd0] sm:$0xff]  ;;  %v4523_v7 = vld [vmem:[#allocation7 + $0x88] sm:$0xff] }
 0x666   :  { %v4535_v31 = vld [vmem:[#allocation7 + $0xe8] sm:$0xff] }
 0x667   :  { %3379 = vmatpush.bf16.msra.mxu1 %v3370_v18  ;;  %v3367_v5 = vpack.c.b16 %v3356_v26, %v3355_v17  ;;  %v3000_v48 = vpop.f32.mrf.mxu1  ;;  %v4536_v17 = vld [vmem:[#allocation7 + $0xf0] sm:$0xff] }
 0x668   :  { %3050 = vrot.lane.b32.xlu0 %v3000_v48, %s4643_s13  ;;  %2827 = vmatmul.bf16.gmra.mxu0 %v4513_v61  ;;  %v4537_v61 = vld [vmem:[#allocation7 + $0xf8] sm:$0xff] }
 0x66b   :  { %3380 = vmatpush.bf16.msra.mxu1 %v3369_v19 }
 0x66f   :  { %3381 = vmatpush.bf16.msra.mxu1 %v3368_v14  ;;  %v3002_v18 = vpop.f32.mrf.mxu1  ;;  %v4524_v14 = vld [vmem:[#allocation7 + $0x90] sm:$0xff] }
 0x670   :  { %3052 = vrot.lane.b32.xlu2 %v3002_v18, %s4643_s13 }
 0x673   :  { %3382 = vmatpush.bf16.msra.mxu1 %v3367_v5 }
 0x675   :  { %v2793_v41 = vpop.f32.mrf.mxu0 }
 0x676   :  { %2833 = vst.msk [vmem:[#allocation3] sm:$0xff] %vm1109_vm0, %v2793_v41 }
 0x677   :  { %3383 = vmatpush.bf16.msra.mxu1 %v5560_v56  ;;  %v3005_v59 = vpop.f32.mrf.mxu1  ;;  %v4525_v56 = vld [vmem:[#allocation7 + $0x98] sm:$0xff] }
 0x678   :  { %3054 = vrot.lane.b32.xlu1 %v3005_v59, %s4643_s13  ;;  %3210 = vmatmul.bf16.vlgmr.msra.gmra.mxu0 %v4522_v46 }
 0x67b   :  { %3384 = vmatpush.bf16.msra.mxu1 %v5561_v1 }
 0x67d   :  { %v2795_v45 = vpop.f32.mrf.mxu0 }
 0x67e   :  { %2834 = vst.msk [vmem:[#allocation3 + $0x10] sm:$0xff] %vm1109_vm0, %v2795_v45 }
 0x67f   :  { %3385 = vmatpush.bf16.msra.mxu1 %v5562_v3  ;;  %v3007_v21 = vpop.f32.mrf.mxu1 }
 0x680   :  { %3056 = vrot.lane.b32.xlu0 %v3007_v21, %s4643_s13 }
 0x683   :  { %3386 = vmatpush.bf16.msra.mxu1 %v5563_v60  ;;  %v4526_v60 = vld [vmem:[#allocation7 + $0xa0] sm:$0xff] }
 0x685   :  { %v2798_v27 = vpop.f32.mrf.mxu0 }
 0x686   :  { %3387 = vmatmul.bf16.vlgmr.msra.gmra.mxu1 %v4530_v42  ;;  %2835 = vst.msk [vmem:[#allocation3 + $0x20] sm:$0xff] %vm1109_vm0, %v2798_v27 }
 0x688   :  { %3215 = vmatmul.bf16.gmra.mxu0 %v4523_v7 }
 0x68d   :  { %v2800_v16 = vpop.f32.mrf.mxu0 }
 0x68e   :  { %2836 = vst.msk [vmem:[#allocation3 + $0x30] sm:$0xff] %vm1109_vm0, %v2800_v16 }
 0x695   :  { %v2803_v57 = vpop.f32.mrf.mxu0 }
 0x696   :  { %3392 = vmatmul.bf16.gmra.mxu1 %v4531_v50  ;;  %2837 = vst.msk [vmem:[#allocation3 + $0x40] sm:$0xff] %vm1109_vm0, %v2803_v57  ;;  %v4527_v57 = vld [vmem:[#allocation7 + $0xa8] sm:$0xff] }
 0x698   :  { %3220 = vmatmul.bf16.gmra.mxu0 %v4524_v14  ;;  %v4529_v14 = vld [vmem:[#allocation7 + $0xb8] sm:$0xff] }
 0x69d   :  { %v2805_v4 = vpop.f32.mrf.mxu0 }
 0x69e   :  { %2838 = vst.msk [vmem:[#allocation3 + $0x50] sm:$0xff] %vm1109_vm0, %v2805_v4 }
 0x6a5   :  { %v2808_v37 = vpop.f32.mrf.mxu0 }
 0x6a6   :  { %3397 = vmatmul.bf16.gmra.mxu1 %v4532_v32  ;;  %2839 = vst.msk [vmem:[#allocation3 + $0x60] sm:$0xff] %vm1109_vm0, %v2808_v37 }
 0x6a8   :  { %3225 = vmatmul.bf16.gmra.mxu0 %v4525_v56 }
 0x6ad   :  { %v2810_v15 = vpop.f32.mrf.mxu0 }
 0x6ae   :  { %2840 = vst.msk [vmem:[#allocation3 + $0x70] sm:$0xff] %vm1109_vm0, %v2810_v15 }
 0x6b5   :  { %v2813_v53 = vpop.f32.mrf.mxu0 }
 0x6b6   :  { %3402 = vmatmul.bf16.gmra.mxu1 %v4533_v28  ;;  %2841 = vst.msk [vmem:[#allocation3 + $0x80] sm:$0xff] %vm1109_vm0, %v2813_v53 }
 0x6b8   :  { %3230 = vmatmul.bf16.gmra.mxu0 %v4526_v60 }
 0x6ba   :  { %v3049_v59 = vpop.permute.xlu2 %3048 }
 0x6bd   :  { %v2815_v19 = vpop.f32.mrf.mxu0 }
 0x6be   :  { %2842 = vst.msk [vmem:[#allocation3 + $0x90] sm:$0xff] %vm1109_vm0, %v2815_v19 }
 0x6c5   :  { %v2818_v20 = vpop.f32.mrf.mxu0 }
 0x6c6   :  { %3407 = vmatmul.bf16.gmra.mxu1 %v4534_v0  ;;  %2843 = vst.msk [vmem:[#allocation3 + $0xa0] sm:$0xff] %vm1109_vm0, %v2818_v20  ;;  %v4528_v0 = vld [vmem:[#allocation7 + $0xb0] sm:$0xff] }
 0x6c8   :  { %3235 = vmatmul.bf16.gmra.mxu0 %v4527_v57 }
 0x6ca   :  { %v3047_v3 = vpop.permute.xlu1 %3046  ;;  %v3053_v50 = vpop.permute.xlu2 %3052 }
 0x6cb   :  { %3084 = vst.msk [vmem:[#allocation3 + $0xa0] sm:$0xff] %vm1351_vm1, %v3047_v3 }
 0x6cd   :  { %v2820_v26 = vpop.f32.mrf.mxu0 }
 0x6ce   :  { %2844 = vst.msk [vmem:[#allocation3 + $0xb0] sm:$0xff] %vm1109_vm0, %v2820_v26 }
 0x6cf   :  { %3085 = vst.msk [vmem:[#allocation3 + $0xb0] sm:$0xff] %vm1351_vm1, %v3049_v59 }
 0x6d2   :  { %v3560_v7 = vld [vmem:[#allocation3 + $0xa0] sm:$0xff] }
 0x6d5   :  { %v2823_v5 = vpop.f32.mrf.mxu0 }
 0x6d6   :  { %3412 = vmatmul.bf16.gmra.mxu1 %v4535_v31  ;;  %2845 = vst.msk [vmem:[#allocation3 + $0xc0] sm:$0xff] %vm1109_vm0, %v2823_v5  ;;  %v3562_v15 = vld [vmem:[#allocation3 + $0xb0] sm:$0xff] }
 0x6d8   :  { %3240 = vmatmul.bf16.gmra.mxu0 %v4528_v0 }
 0x6da   :  { %v3051_v18 = vpop.permute.xlu0 %3050 }
 0x6db   :  { %3086 = vst.msk [vmem:[#allocation3 + $0xc0] sm:$0xff] %vm1351_vm1, %v3051_v18 }
 0x6dd   :  { %v2825_v48 = vpop.f32.mrf.mxu0 }
 0x6de   :  { %2846 = vst.msk [vmem:[#allocation3 + $0xd0] sm:$0xff] %vm1109_vm0, %v2825_v48 }
 0x6df   :  { %3087 = vst.msk [vmem:[#allocation3 + $0xd0] sm:$0xff] %vm1351_vm1, %v3053_v50 }
 0x6e2   :  { %v3564_v37 = vld [vmem:[#allocation3 + $0xc0] sm:$0xff] }
 0x6e5   :  { %v2828_v1 = vpop.f32.mrf.mxu0 }
 0x6e6   :  { %3417 = vmatmul.bf16.gmra.mxu1 %v4536_v17  ;;  %2847 = vst.msk [vmem:[#allocation3 + $0xe0] sm:$0xff] %vm1109_vm0, %v2828_v1  ;;  %v3566_v4 = vld [vmem:[#allocation3 + $0xd0] sm:$0xff] }
 0x6e8   :  { %3245 = vmatmul.bf16.gmra.mxu0 %v4529_v14 }
 0x6ea   :  { %v3055_v45 = vpop.permute.xlu1 %3054 }
 0x6eb   :  { %3088 = vst.msk [vmem:[#allocation3 + $0xe0] sm:$0xff] %vm1351_vm1, %v3055_v45 }
 0x6ed   :  { %v2830_v42 = vpop.f32.mrf.mxu0 }
 0x6ee   :  { %2848 = vst.msk [vmem:[#allocation3 + $0xf0] sm:$0xff] %vm1109_vm0, %v2830_v42 }
 0x6f2   :  { %v3057_v41 = vpop.permute.xlu0 %3056  ;;  %v3568_v32 = vld [vmem:[#allocation3 + $0xe0] sm:$0xff] }
 0x6f3   :  { %3089 = vst.msk [vmem:[#allocation3 + $0xf0] sm:$0xff] %vm1351_vm1, %v3057_v41 }
 0x6f5   :  { %v3211_v26 = vpop.f32.mrf.mxu0 }
 0x6f6   :  { %3422 = vmatmul.bf16.gmra.mxu1 %v4537_v61  ;;  %3251 = vst.msk [vmem:[#allocation3 + $0x8] sm:$0xff] %vm1109_vm0, %v3211_v26  ;;  %v5573_v26 = vld [vmem:[#allocation22_spill] sm:$0xff] }
 0x6fa   :  { %v3570_v27 = vld [vmem:[#allocation3 + $0xf0] sm:$0xff] }
 0x6fb   :  { %3572 = vmatpush.xpose.msrb.mxu0 %v3570_v27 }
 0x6fd   :  { %v3213_v5 = vpop.f32.mrf.mxu0 }
 0x6fe   :  { %3252 = vst.msk [vmem:[#allocation3 + $0x18] sm:$0xff] %vm1109_vm0, %v3213_v5 }
 0x6ff   :  { %3573 = vmatpush.xpose.msrb.mxu0 %v3568_v32 }
 0x703   :  { %v5344_v21 = vpop.f32.mrf.mxu1  ;;  %3574 = vmatpush.xpose.msrb.mxu0 %v3566_v4 }
 0x705   :  { %v3216_v56 = vpop.f32.mrf.mxu0 }
 0x706   :  { %3253 = vst.msk [vmem:[#allocation3 + $0x28] sm:$0xff] %vm1109_vm0, %v3216_v56 }
 0x707   :  { %3575 = vmatpush.xpose.msrb.mxu0 %v3564_v37 }
 0x70b   :  { %v5349_v16 = vpop.f32.mrf.mxu1  ;;  %3576 = vmatpush.xpose.msrb.mxu0 %v3562_v15  ;;  %v5572_v15 = vld [vmem:[#allocation15_spill] sm:$0xff] }
 0x70d   :  { %v3218_v1 = vpop.f32.mrf.mxu0 }
 0x70e   :  { %3254 = vst.msk [vmem:[#allocation3 + $0x38] sm:$0xff] %vm1109_vm0, %v3218_v1 }
 0x70f   :  { %3577 = vmatpush.xpose.msrb.mxu0 %v3560_v7 }
 0x713   :  { %v5351_v28 = vpop.f32.mrf.mxu1 }
 0x715   :  { %v3221_v3 = vpop.f32.mrf.mxu0 }
 0x716   :  { %3255 = vst.msk [vmem:[#allocation3 + $0x48] sm:$0xff] %vm1109_vm0, %v3221_v3 }
 0x71b   :  { %v3395_v46 = vpop.f32.mrf.mxu1 }
 0x71d   :  { %v3223_v60 = vpop.f32.mrf.mxu0 }
 0x71e   :  { %3256 = vst.msk [vmem:[#allocation3 + $0x58] sm:$0xff] %vm1109_vm0, %v3223_v60 }
 0x723   :  { %v3398_v53 = vpop.f32.mrf.mxu1 }
 0x725   :  { %v3226_v41 = vpop.f32.mrf.mxu0 }
 0x726   :  { %3257 = vst.msk [vmem:[#allocation3 + $0x68] sm:$0xff] %vm1109_vm0, %v3226_v41 }
 0x72b   :  { %v3400_v19 = vpop.f32.mrf.mxu1 }
 0x72d   :  { %v3228_v50 = vpop.f32.mrf.mxu0 }
 0x72e   :  { %3258 = vst.msk [vmem:[#allocation3 + $0x78] sm:$0xff] %vm1109_vm0, %v3228_v50 }
 0x733   :  { %v3403_v31 = vpop.f32.mrf.mxu1 }
 0x735   :  { %v3231_v32 = vpop.f32.mrf.mxu0 }
 0x736   :  { %3259 = vst.msk [vmem:[#allocation3 + $0x88] sm:$0xff] %vm1109_vm0, %v3231_v32 }
 0x73b   :  { %v3405_v20 = vpop.f32.mrf.mxu1 }
 0x743   :  { %v3408_v17 = vpop.f32.mrf.mxu1 }
 0x74b   :  { %v3410_v48 = vpop.f32.mrf.mxu1 }
 0x753   :  { %v3413_v61 = vpop.f32.mrf.mxu1 }
 0x754   :  { %3464 = vrot.lane.b32.xlu2 %v3413_v61, %s4643_s13 }
 0x75b   :  { %v3415_v18 = vpop.f32.mrf.mxu1 }
 0x75c   :  { %3466 = vrot.lane.b32.xlu0 %v3415_v18, %s4643_s13 }
 0x763   :  { %v3418_v42 = vpop.f32.mrf.mxu1 }
 0x764   :  { %3468 = vrot.lane.b32.xlu1 %v3418_v42, %s4643_s13 }
 0x76b   :  { %v3420_v59 = vpop.f32.mrf.mxu1 }
 0x76c   :  { %3470 = vrot.lane.b32.xlu2 %v3420_v59, %s4643_s13 }
 0x773   :  { %v3423_v45 = vpop.f32.mrf.mxu1 }
 0x774   :  { %3042 = vrot.lane.b32.xlu2 %v5295_v38, %s4643_s13  ;;  %3472 = vrot.lane.b32.xlu1 %v3423_v45, %s4643_s13  ;;  %v3233_v38 = vpop.f32.mrf.mxu0 }
 0x775   :  { %3260 = vst.msk [vmem:[#allocation3 + $0x98] sm:$0xff] %vm1109_vm0, %v3233_v38 }
 0x77b   :  { %v3425_v27 = vpop.f32.mrf.mxu1 }
 0x77c   :  { %3458 = vrot.lane.b32.xlu2 %v3405_v20, %s4643_s13  ;;  %3462 = vrot.lane.b32.xlu1 %v3410_v48, %s4643_s13  ;;  %v3236_v57 = vpop.f32.mrf.mxu0 }
 0x77d   :  { %3474 = vrot.lane.b32.xlu0 %v3425_v27, %s4643_s13  ;;  %3261 = vst.msk [vmem:[#allocation3 + $0xa8] sm:$0xff] %vm1109_vm0, %v3236_v57 }
 0x784   :  { %3036 = vrot.lane.b32.xlu2 %v5289_v43, %s4643_s13  ;;  %3040 = vrot.lane.b32.xlu1 %v5293_v9, %s4643_s13  ;;  %v3238_v43 = vpop.f32.mrf.mxu0 }
 0x785   :  { %3044 = vrot.lane.b32.xlu0 %v5298_v39, %s4643_s13  ;;  %3262 = vst.msk [vmem:[#allocation3 + $0xb8] sm:$0xff] %vm1109_vm0, %v3238_v43 }
 0x78c   :  { %3452 = vrot.lane.b32.xlu2 %v3398_v53, %s4643_s13  ;;  %3456 = vrot.lane.b32.xlu1 %v3403_v31, %s4643_s13  ;;  %v3241_v9 = vpop.f32.mrf.mxu0 }
 0x78d   :  { %3460 = vrot.lane.b32.xlu0 %v3408_v17, %s4643_s13  ;;  %3263 = vst.msk [vmem:[#allocation3 + $0xc8] sm:$0xff] %vm1109_vm0, %v3241_v9 }
 0x794   :  { %3030 = vrot.lane.b32.xlu2 %v5281_v8, %s4643_s13  ;;  %3034 = vrot.lane.b32.xlu1 %v5287_v58, %s4643_s13  ;;  %v3243_v8 = vpop.f32.mrf.mxu0 }
 0x795   :  { %3038 = vrot.lane.b32.xlu0 %v5291_v23, %s4643_s13  ;;  %3264 = vst.msk [vmem:[#allocation3 + $0xd8] sm:$0xff] %vm1109_vm0, %v3243_v8  ;;  %v5571_v23 = vld [vmem:[#allocation19_spill] sm:$0xff] }
 0x79c   :  { %3446 = vrot.lane.b32.xlu2 %v5349_v16, %s4643_s13  ;;  %3450 = vrot.lane.b32.xlu1 %v3395_v46, %s4643_s13 }
 0x79d   :  { %3454 = vrot.lane.b32.xlu0 %v3400_v19, %s4643_s13 }
 0x7a4   :  { %1303 = vrot.lane.b32.xlu2 %v4982_v44, %s4643_s13  ;;  %3028 = vrot.lane.b32.xlu1 %v5274_v29, %s4643_s13  ;;  %v3246_v44 = vpop.f32.mrf.mxu0  ;;  %v5570_v29 = vld [vmem:[#allocation21_spill] sm:$0xff] }
 0x7a5   :  { %3032 = vrot.lane.b32.xlu0 %v5285_v51, %s4643_s13  ;;  %3265 = vst.msk [vmem:[#allocation3 + $0xe8] sm:$0xff] %vm1109_vm0, %v3246_v44 }
 0x7ac   :  { %1724 = vrot.lane.b32.xlu2 %v5056_v6, %s4643_s13  ;;  %3444 = vrot.lane.b32.xlu1 %v5344_v21, %s4643_s13  ;;  %v5564_v6 = vld [vmem:[#allocation20_spill] sm:$0xff] }
 0x7ad   :  { %3448 = vrot.lane.b32.xlu0 %v5351_v28, %s4643_s13 }
 0x7ae   :  { %v3465_v58 = vpop.permute.xlu2 %3464 }
 0x7af   :  { %3502 = vst.msk [vmem:[#allocation3 + $0xa8] sm:$0xff] %vm1351_vm1, %v3465_v58 }
 0x7b4   :  { %1309 = vrot.lane.b32.xlu2 %v4988_v11, %s4643_s13  ;;  %1305 = vrot.lane.b32.xlu1 %v4984_v2, %s4643_s13  ;;  %v3248_v11 = vpop.f32.mrf.mxu0 }
 0x7b5   :  { %3026 = vrot.lane.b32.xlu0 %v5269_v36, %s4643_s13  ;;  %3266 = vst.msk [vmem:[#allocation3 + $0xf8] sm:$0xff] %vm1109_vm0, %v3248_v11 }
 0x7b6   :  { %v3561_v20 = vld [vmem:[#allocation3 + $0xa8] sm:$0xff] }
 0x7bc   :  { %1730 = vrot.lane.b32.xlu2 %v5062_v30, %s4643_s13  ;;  %1726 = vrot.lane.b32.xlu1 %v5058_v55, %s4643_s13  ;;  %v5565_v55 = vld [vmem:[#allocation18_spill] sm:$0xff]  ;;  %v5567_v30 = vld [vmem:[#allocation16_spill] sm:$0xff] }
 0x7bd   :  { %1722 = vrot.lane.b32.xlu0 %v5053_v24, %s4643_s13 }
 0x7c4   :  { %1315 = vrot.lane.b32.xlu2 %v4997_v10, %s4643_s13  ;;  %1311 = vrot.lane.b32.xlu1 %v4991_v13, %s4643_s13 }
 0x7c5   :  { %1307 = vrot.lane.b32.xlu0 %v4986_v25, %s4643_s13 }
 0x7c6   :  { %v3471_v2 = vpop.permute.xlu2 %3470 }
 0x7c7   :  { %3505 = vst.msk [vmem:[#allocation3 + $0xd8] sm:$0xff] %vm1351_vm1, %v3471_v2 }
 0x7cc   :  { %1736 = vrot.lane.b32.xlu2 %v5068_v49, %s4643_s13  ;;  %1732 = vrot.lane.b32.xlu1 %v5064_v35, %s4643_s13  ;;  %v5568_v35 = vld [vmem:[#allocation14_spill] sm:$0xff] }
 0x7cd   :  { %1728 = vrot.lane.b32.xlu0 %v5060_v12, %s4643_s13 }
 0x7ce   :  { %v3043_v10 = vpop.permute.xlu2 %3042  ;;  %v3467_v13 = vpop.permute.xlu0 %3466  ;;  %v3567_v4 = vld [vmem:[#allocation3 + $0xd8] sm:$0xff] }
 0x7cf   :  { %3082 = vst.msk [vmem:[#allocation3 + $0x80] sm:$0xff] %vm1351_vm1, %v3043_v10 }
 0x7d0   :  { %3503 = vst.msk [vmem:[#allocation3 + $0xb8] sm:$0xff] %vm1351_vm1, %v3467_v13 }
 0x7d4   :  { %1321 = vrot.lane.b32.xlu2 %v5006_v63, %s4643_s13  ;;  %1317 = vrot.lane.b32.xlu1 %v5000_v33, %s4643_s13 }
 0x7d5   :  { %1313 = vrot.lane.b32.xlu0 %v4994_v22, %s4643_s13 }
 0x7d6   :  { %v3459_v25 = vpop.permute.xlu2 %3458  ;;  %v3469_v24 = vpop.permute.xlu1 %3468  ;;  %v3556_v46 = vld [vmem:[#allocation3 + $0x80] sm:$0xff] }
 0x7d7   :  { %3499 = vst.msk [vmem:[#allocation3 + $0x78] sm:$0xff] %vm1351_vm1, %v3459_v25  ;;  %v3563_v7 = vld [vmem:[#allocation3 + $0xb8] sm:$0xff] }
 0x7d8   :  { %3504 = vst.msk [vmem:[#allocation3 + $0xc8] sm:$0xff] %vm1351_vm1, %v3469_v24 }
 0x7dc   :  { %1742 = vrot.lane.b32.xlu2 %v5074_v62, %s4643_s13  ;;  %1738 = vrot.lane.b32.xlu1 %v5070_v54, %s4643_s13 }
 0x7dd   :  { %1734 = vrot.lane.b32.xlu0 %v5066_v47, %s4643_s13  ;;  %v5569_v47 = vld [vmem:[#allocation13_spill] sm:$0xff] }
 0x7de   :  { %v3037_v63 = vpop.permute.xlu2 %3036  ;;  %v3555_v59 = vld [vmem:[#allocation3 + $0x78] sm:$0xff] }
 0x7df   :  { %3079 = vst.msk [vmem:[#allocation3 + $0x50] sm:$0xff] %vm1351_vm1, %v3037_v63  ;;  %v3565_v37 = vld [vmem:[#allocation3 + $0xc8] sm:$0xff] }
 0x7e4   :  { %1327 = vrot.lane.b32.xlu2 %v5016_v52, %s4643_s13  ;;  %1323 = vrot.lane.b32.xlu1 %v5009_v34, %s4643_s13  ;;  %v5566_v52 = vld [vmem:[#allocation17_spill] sm:$0xff] }
 0x7e5   :  { %1319 = vrot.lane.b32.xlu0 %v5003_v40, %s4643_s13 }
 0x7e6   :  { %v3453_v22 = vpop.permute.xlu2 %3452  ;;  %v3473_v33 = vpop.permute.xlu1 %3472  ;;  %v3550_v61 = vld [vmem:[#allocation3 + $0x50] sm:$0xff] }
 0x7e7   :  { %3496 = vst.msk [vmem:[#allocation3 + $0x48] sm:$0xff] %vm1351_vm1, %v3453_v22 }
 0x7e8   :  { %3506 = vst.msk [vmem:[#allocation3 + $0xe8] sm:$0xff] %vm1351_vm1, %v3473_v33 }
 0x7ec   :  { %1748 = vrot.lane.b32.xlu2 %v5564_v6, %s4643_s13  ;;  %1744 = vrot.lane.b32.xlu1 %v5565_v55, %s4643_s13 }
 0x7ed   :  { %1740 = vrot.lane.b32.xlu0 %v5566_v52, %s4643_s13 }
 0x7ee   :  { %v3031_v12 = vpop.permute.xlu2 %3030  ;;  %v3463_v34 = vpop.permute.xlu1 %3462  ;;  %v3549_v43 = vld [vmem:[#allocation3 + $0x48] sm:$0xff] }
 0x7ef   :  { %3076 = vst.msk [vmem:[#allocation3 + $0x20] sm:$0xff] %vm1351_vm1, %v3031_v12  ;;  %v3475_v40 = vpop.permute.xlu0 %3474  ;;  %v3569_v51 = vld [vmem:[#allocation3 + $0xe8] sm:$0xff] }
 0x7f0   :  { %3501 = vst.msk [vmem:[#allocation3 + $0x98] sm:$0xff] %vm1351_vm1, %v3463_v34 }
 0x7f1   :  { %3507 = vst.msk [vmem:[#allocation3 + $0xf8] sm:$0xff] %vm1351_vm1, %v3475_v40 }
 0x7f4   :  { %1333 = vrot.lane.b32.xlu2 %v5567_v30, %s4643_s13  ;;  %1329 = vrot.lane.b32.xlu1 %v5568_v35, %s4643_s13 }
 0x7f5   :  { %1325 = vrot.lane.b32.xlu0 %v5569_v47, %s4643_s13 }
 0x7f6   :  { %v3447_v49 = vpop.permute.xlu2 %3446  ;;  %v3041_v54 = vpop.permute.xlu1 %3040  ;;  %v3544_v57 = vld [vmem:[#allocation3 + $0x20] sm:$0xff] }
 0x7f7   :  { %3493 = vst.msk [vmem:[#allocation3 + $0x18] sm:$0xff] %vm1351_vm1, %v3447_v49  ;;  %v3045_v62 = vpop.permute.xlu0 %3044  ;;  %v3559_v56 = vld [vmem:[#allocation3 + $0x98] sm:$0xff] }
 0x7f8   :  { %3081 = vst.msk [vmem:[#allocation3 + $0x70] sm:$0xff] %vm1351_vm1, %v3041_v54  ;;  %v3571_v36 = vld [vmem:[#allocation3 + $0xf8] sm:$0xff] }
 0x7f9   :  { %3083 = vst.msk [vmem:[#allocation3 + $0x90] sm:$0xff] %vm1351_vm1, %v3045_v62  ;;  %3637 = vmatpush.xpose.msrb.mxu1 %v3571_v36 }
 0x7fc   :  { %1750 = vrot.lane.b32.xlu1 %v5570_v29, %s4643_s13 }
 0x7fd   :  { %1746 = vrot.lane.b32.xlu0 %v5571_v23, %s4643_s13  ;;  %3638 = vmatpush.xpose.msrb.mxu1 %v3569_v51 }
 0x7fe   :  { %v1304_v39 = vpop.permute.xlu2 %1303  ;;  %v3457_v21 = vpop.permute.xlu1 %3456  ;;  %v3543_v63 = vld [vmem:[#allocation3 + $0x18] sm:$0xff] }
 0x7ff   :  { %1352 = vst.msk [vmem:[#allocation2] sm:$0xff] %vm1351_vm1, %v1304_v39  ;;  %v3461_v16 = vpop.permute.xlu0 %3460  ;;  %v3554_v31 = vld [vmem:[#allocation3 + $0x70] sm:$0xff] }
 0x800   :  { %3498 = vst.msk [vmem:[#allocation3 + $0x68] sm:$0xff] %vm1351_vm1, %v3457_v21  ;;  %v3558_v28 = vld [vmem:[#allocation3 + $0x90] sm:$0xff] }
 0x801   :  { %3500 = vst.msk [vmem:[#allocation3 + $0x88] sm:$0xff] %vm1351_vm1, %v3461_v16  ;;  %3639 = vmatpush.xpose.msrb.mxu1 %v3567_v4  ;;  %3578 = vmatpush.xpose.msrb.mxu0 %v3558_v28 }
 0x805   :  { %1331 = vrot.lane.b32.xlu0 %v5572_v15, %s4643_s13  ;;  %3640 = vmatpush.xpose.msrb.mxu1 %v3565_v37 }
 0x806   :  { %v1725_v0 = vpop.permute.xlu2 %1724  ;;  %v3035_v53 = vpop.permute.xlu1 %3034  ;;  %3579 = vmatpush.xpose.msrb.mxu0 %v3556_v46  ;;  %v3508_v22 = vld [vmem:[#allocation2] sm:$0xff] }
 0x807   :  { %1771 = vst.msk [vmem:[#allocation2 + $0x18] sm:$0xff] %vm1351_vm1, %v1725_v0  ;;  %v3039_v19 = vpop.permute.xlu0 %3038  ;;  %v3553_v41 = vld [vmem:[#allocation3 + $0x68] sm:$0xff] }
 0x808   :  { %3078 = vst.msk [vmem:[#allocation3 + $0x40] sm:$0xff] %vm1351_vm1, %v3035_v53  ;;  %v3557_v1 = vld [vmem:[#allocation3 + $0x88] sm:$0xff] }
 0x809   :  { %3080 = vst.msk [vmem:[#allocation3 + $0x60] sm:$0xff] %vm1351_vm1, %v3039_v19  ;;  %3641 = vmatpush.xpose.msrb.mxu1 %v3563_v7 }
 0x80a   :  { %3580 = vmatpush.xpose.msrb.mxu0 %v3554_v31 }
 0x80d   :  { %1752 = vrot.lane.b32.xlu0 %v5573_v26, %s4643_s13  ;;  %3642 = vmatpush.xpose.msrb.mxu1 %v3561_v20  ;;  %s3722_s13 = sshll.u32 %s4646_s7, 4  ;;  %s3723_s13 = int_to_ptr.vmem [resolvable:$true] %s3722_s13 }
 0x80e   :  { %v1310_v14 = vpop.permute.xlu2 %1309  ;;  %v3451_v17 = vpop.permute.xlu1 %3450  ;;  %v3511_v47 = vld [vmem:[#allocation2 + $0x18] sm:$0xff] }
 0x80f   :  { %1355 = vst.msk [vmem:[#allocation2 + $0x30] sm:$0xff] %vm1351_vm1, %v1310_v14  ;;  %v3455_v5 = vpop.permute.xlu0 %3454  ;;  %v3548_v60 = vld [vmem:[#allocation3 + $0x40] sm:$0xff] }
 0x810   :  { %3495 = vst.msk [vmem:[#allocation3 + $0x38] sm:$0xff] %vm1351_vm1, %v3451_v17  ;;  %v3552_v48 = vld [vmem:[#allocation3 + $0x60] sm:$0xff] }
 0x811   :  { %3497 = vst.msk [vmem:[#allocation3 + $0x58] sm:$0xff] %vm1351_vm1, %v3455_v5  ;;  %3581 = vmatpush.xpose.msrb.mxu0 %v3552_v48  ;;  %3643 = vmatpush.xpose.msrb.mxu1 %v3559_v56 }
 0x815   :  { %3582 = vmatpush.xpose.msrb.mxu0 %v3550_v61  ;;  %3644 = vmatpush.xpose.msrb.mxu1 %v3557_v1 }
 0x816   :  { %v1731_v18 = vpop.permute.xlu2 %1730  ;;  %v3029_v3 = vpop.permute.xlu1 %3028  ;;  %v3514_v51 = vld [vmem:[#allocation2 + $0x30] sm:$0xff] }
 0x817   :  { %1774 = vst.msk [vmem:[#allocation2 + $0x48] sm:$0xff] %vm1351_vm1, %v1731_v18  ;;  %v3033_v42 = vpop.permute.xlu0 %3032  ;;  %v3547_v2 = vld [vmem:[#allocation3 + $0x38] sm:$0xff] }
 0x818   :  { %3075 = vst.msk [vmem:[#allocation3 + $0x10] sm:$0xff] %vm1351_vm1, %v3029_v3  ;;  %v3551_v38 = vld [vmem:[#allocation3 + $0x58] sm:$0xff] }
 0x819   :  { %3077 = vst.msk [vmem:[#allocation3 + $0x30] sm:$0xff] %vm1351_vm1, %v3033_v42  ;;  %3583 = vmatpush.xpose.msrb.mxu0 %v3548_v60  ;;  %3645 = vmatpush.xpose.msrb.mxu1 %v3555_v59 }
 0x81d   :  { %3646 = vmatpush.xpose.msrb.mxu1 %v3553_v41 }
 0x81e   :  { %v1316_v45 = vpop.permute.xlu2 %1315  ;;  %v3445_v50 = vpop.permute.xlu1 %3444  ;;  %v3517_v15 = vld [vmem:[#allocation2 + $0x48] sm:$0xff] }
 0x81f   :  { %1358 = vst.msk [vmem:[#allocation2 + $0x60] sm:$0xff] %vm1351_vm1, %v1316_v45  ;;  %v3449_v27 = vpop.permute.xlu0 %3448  ;;  %v3542_v44 = vld [vmem:[#allocation3 + $0x10] sm:$0xff] }
 0x820   :  { %3492 = vst.msk [vmem:[#allocation3 + $0x8] sm:$0xff] %vm1351_vm1, %v3445_v50  ;;  %v3546_v32 = vld [vmem:[#allocation3 + $0x30] sm:$0xff] }
 0x821   :  { %3494 = vst.msk [vmem:[#allocation3 + $0x28] sm:$0xff] %vm1351_vm1, %v3449_v27  ;;  %3584 = vmatpush.xpose.msrb.mxu0 %v3546_v32  ;;  %3647 = vmatpush.xpose.msrb.mxu1 %v3551_v38 }
 0x825   :  { %3585 = vmatpush.xpose.msrb.mxu0 %v3544_v57  ;;  %3648 = vmatpush.xpose.msrb.mxu1 %v3549_v43 }
 0x826   :  { %v1737_v9 = vpop.permute.xlu2 %1736  ;;  %v1306_v8 = vpop.permute.xlu1 %1305  ;;  %v3520_v7 = vld [vmem:[#allocation2 + $0x60] sm:$0xff] }
 0x827   :  { %1777 = vst.msk [vmem:[#allocation2 + $0x78] sm:$0xff] %vm1351_vm1, %v1737_v9  ;;  %v3027_v58 = vpop.permute.xlu0 %3026  ;;  %v3541_v33 = vld [vmem:[#allocation3 + $0x8] sm:$0xff] }
 0x828   :  { %1353 = vst.msk [vmem:[#allocation2 + $0x10] sm:$0xff] %vm1351_vm1, %v1306_v8  ;;  %v3545_v11 = vld [vmem:[#allocation3 + $0x28] sm:$0xff] }
 0x829   :  { %3074 = vst.msk [vmem:[#allocation3] sm:$0xff] %vm1351_vm1, %v3027_v58  ;;  %3586 = vmatpush.xpose.msrb.mxu0 %v3542_v44  ;;  %3649 = vmatpush.xpose.msrb.mxu1 %v3547_v2 }
 0x82d   :  { %3650 = vmatpush.xpose.msrb.mxu1 %v3545_v11 }
 0x82e   :  { %v1322_v10 = vpop.permute.xlu2 %1321  ;;  %v1727_v13 = vpop.permute.xlu1 %1726  ;;  %v3523_v48 = vld [vmem:[#allocation2 + $0x78] sm:$0xff] }
 0x82f   :  { %1361 = vst.msk [vmem:[#allocation2 + $0x90] sm:$0xff] %vm1351_vm1, %v1322_v10  ;;  %v1723_v25 = vpop.permute.xlu0 %1722  ;;  %v3510_v34 = vld [vmem:[#allocation2 + $0x10] sm:$0xff] }
 0x830   :  { %1772 = vst.msk [vmem:[#allocation2 + $0x28] sm:$0xff] %vm1351_vm1, %v1727_v13  ;;  %v3540_v24 = vld [vmem:[#allocation3] sm:$0xff] }
 0x831   :  { %1770 = vst.msk [vmem:[#allocation2 + $0x8] sm:$0xff] %vm1351_vm1, %v1723_v25  ;;  %3587 = vmatpush.xpose.msrb.mxu0 %v3540_v24  ;;  %3651 = vmatpush.xpose.msrb.mxu1 %v3543_v63 }
 0x834   :  { %3588 = vmatmul.f32.vlgmr.msrb.gmra.mxu0 %v3508_v22 }
 0x835   :  { %3652 = vmatpush.xpose.msrb.mxu1 %v3541_v33 }
 0x836   :  { %v1743_v6 = vpop.permute.xlu2 %1742  ;;  %v1312_v55 = vpop.permute.xlu1 %1311  ;;  %v3526_v18 = vld [vmem:[#allocation2 + $0x90] sm:$0xff] }
 0x837   :  { %1780 = vst.msk [vmem:[#allocation2 + $0xa8] sm:$0xff] %vm1351_vm1, %v1743_v6  ;;  %v1308_v52 = vpop.permute.xlu0 %1307  ;;  %v3513_v29 = vld [vmem:[#allocation2 + $0x28] sm:$0xff] }
 0x838   :  { %1356 = vst.msk [vmem:[#allocation2 + $0x40] sm:$0xff] %vm1351_vm1, %v1312_v55  ;;  %v3509_v12 = vld [vmem:[#allocation2 + $0x8] sm:$0xff] }
 0x839   :  { %1354 = vst.msk [vmem:[#allocation2 + $0x20] sm:$0xff] %vm1351_vm1, %v1308_v52  ;;  %3653 = vmatmul.f32.vlgmr.msrb.gmra.mxu1 %v3509_v12 }
 0x83c   :  { %3591 = vmatmul.f32.gmra.mxu0 %v3510_v34 }
 0x83e   :  { %v1328_v40 = vpop.permute.xlu2 %1327  ;;  %v1733_v30 = vpop.permute.xlu1 %1732  ;;  %v3529_v59 = vld [vmem:[#allocation2 + $0xa8] sm:$0xff] }
 0x83f   :  { %1364 = vst.msk [vmem:[#allocation2 + $0xc0] sm:$0xff] %vm1351_vm1, %v1328_v40  ;;  %v1729_v35 = vpop.permute.xlu0 %1728  ;;  %v3516_v4 = vld [vmem:[#allocation2 + $0x40] sm:$0xff] }
 0x840   :  { %1775 = vst.msk [vmem:[#allocation2 + $0x58] sm:$0xff] %vm1351_vm1, %v1733_v30  ;;  %v3512_v49 = vld [vmem:[#allocation2 + $0x20] sm:$0xff] }
 0x841   :  { %1773 = vst.msk [vmem:[#allocation2 + $0x38] sm:$0xff] %vm1351_vm1, %v1729_v35  ;;  %3656 = vmatmul.f32.gmra.mxu1 %v3511_v47 }
 0x844   :  { %3594 = vmatmul.f32.gmra.mxu0 %v3512_v49 }
 0x846   :  { %v1749_v54 = vpop.permute.xlu2 %1748  ;;  %v1318_v62 = vpop.permute.xlu1 %1317  ;;  %v3532_v50 = vld [vmem:[#allocation2 + $0xc0] sm:$0xff] }
 0x847   :  { %1783 = vst.msk [vmem:[#allocation2 + $0xd8] sm:$0xff] %vm1351_vm1, %v1749_v54  ;;  %v1314_v36 = vpop.permute.xlu0 %1313  ;;  %v3519_v19 = vld [vmem:[#allocation2 + $0x58] sm:$0xff] }
 0x848   :  { %1359 = vst.msk [vmem:[#allocation2 + $0x70] sm:$0xff] %vm1351_vm1, %v1318_v62  ;;  %v3515_v16 = vld [vmem:[#allocation2 + $0x38] sm:$0xff] }
 0x849   :  { %1357 = vst.msk [vmem:[#allocation2 + $0x50] sm:$0xff] %vm1351_vm1, %v1314_v36  ;;  %3659 = vmatmul.f32.gmra.mxu1 %v3513_v29 }
 0x84c   :  { %3597 = vmatmul.f32.gmra.mxu0 %v3514_v51 }
 0x84e   :  { %v1334_v23 = vpop.permute.xlu2 %1333  ;;  %v1739_v39 = vpop.permute.xlu1 %1738  ;;  %v3535_v38 = vld [vmem:[#allocation2 + $0xd8] sm:$0xff] }
 0x84f   :  { %1367 = vst.msk [vmem:[#allocation2 + $0xf0] sm:$0xff] %vm1351_vm1, %v1334_v23  ;;  %v1735_v21 = vpop.permute.xlu0 %1734  ;;  %v3522_v14 = vld [vmem:[#allocation2 + $0x70] sm:$0xff] }
 0x850   :  { %1778 = vst.msk [vmem:[#allocation2 + $0x88] sm:$0xff] %vm1351_vm1, %v1739_v39  ;;  %v3518_v46 = vld [vmem:[#allocation2 + $0x50] sm:$0xff] }
 0x851   :  { %1776 = vst.msk [vmem:[#allocation2 + $0x68] sm:$0xff] %vm1351_vm1, %v1735_v21  ;;  %3662 = vmatmul.f32.gmra.mxu1 %v3515_v16 }
 0x854   :  { %3600 = vmatmul.f32.gmra.mxu0 %v3516_v4 }
 0x856   :  { %v1324_v28 = vpop.permute.xlu1 %1323  ;;  %v3538_v9 = vld [vmem:[#allocation2 + $0xf0] sm:$0xff] }
 0x857   :  { %1362 = vst.msk [vmem:[#allocation2 + $0xa0] sm:$0xff] %vm1351_vm1, %v1324_v28  ;;  %v1320_v37 = vpop.permute.xlu0 %1319  ;;  %v3525_v1 = vld [vmem:[#allocation2 + $0x88] sm:$0xff] }
 0x858   :  { %1360 = vst.msk [vmem:[#allocation2 + $0x80] sm:$0xff] %vm1351_vm1, %v1320_v37  ;;  %v3521_v26 = vld [vmem:[#allocation2 + $0x68] sm:$0xff] }
 0x859   :  { %3665 = vmatmul.f32.gmra.mxu1 %v3517_v15 }
 0x85c   :  { %3603 = vmatmul.f32.gmra.mxu0 %v3518_v46 }
 0x85e   :  { %v1745_v0 = vpop.permute.xlu1 %1744  ;;  %v3528_v60 = vld [vmem:[#allocation2 + $0xa0] sm:$0xff] }
 0x85f   :  { %1781 = vst.msk [vmem:[#allocation2 + $0xb8] sm:$0xff] %vm1351_vm1, %v1745_v0  ;;  %v1741_v53 = vpop.permute.xlu0 %1740  ;;  %v3524_v56 = vld [vmem:[#allocation2 + $0x80] sm:$0xff] }
 0x860   :  { %1779 = vst.msk [vmem:[#allocation2 + $0x98] sm:$0xff] %vm1351_vm1, %v1741_v53 }
 0x861   :  { %3668 = vmatmul.f32.gmra.mxu1 %v3519_v19 }
 0x864   :  { %3606 = vmatmul.f32.gmra.mxu0 %v3520_v7 }
 0x866   :  { %v1330_v31 = vpop.permute.xlu1 %1329  ;;  %v3531_v45 = vld [vmem:[#allocation2 + $0xb8] sm:$0xff] }
 0x867   :  { %1365 = vst.msk [vmem:[#allocation2 + $0xd0] sm:$0xff] %vm1351_vm1, %v1330_v31  ;;  %v1326_v20 = vpop.permute.xlu0 %1325  ;;  %v3527_v42 = vld [vmem:[#allocation2 + $0x98] sm:$0xff] }
 0x868   :  { %1363 = vst.msk [vmem:[#allocation2 + $0xb0] sm:$0xff] %vm1351_vm1, %v1326_v20 }
 0x869   :  { %3671 = vmatmul.f32.gmra.mxu1 %v3521_v26 }
 0x86c   :  { %3609 = vmatmul.f32.gmra.mxu0 %v3522_v14 }
 0x86e   :  { %v1751_v17 = vpop.permute.xlu1 %1750  ;;  %v3534_v32 = vld [vmem:[#allocation2 + $0xd0] sm:$0xff] }
 0x86f   :  { %1784 = vst.msk [vmem:[#allocation2 + $0xe8] sm:$0xff] %vm1351_vm1, %v1751_v17  ;;  %v1747_v5 = vpop.permute.xlu0 %1746  ;;  %v3530_v41 = vld [vmem:[#allocation2 + $0xb0] sm:$0xff] }
 0x870   :  { %1782 = vst.msk [vmem:[#allocation2 + $0xc8] sm:$0xff] %vm1351_vm1, %v1747_v5 }
 0x871   :  { %3674 = vmatmul.f32.gmra.mxu1 %v3523_v48 }
 0x874   :  { %3612 = vmatmul.f32.gmra.mxu0 %v3524_v56 }
 0x876   :  { %v3537_v43 = vld [vmem:[#allocation2 + $0xe8] sm:$0xff] }
 0x877   :  { %v1332_v61 = vpop.permute.xlu0 %1331  ;;  %v3533_v27 = vld [vmem:[#allocation2 + $0xc8] sm:$0xff] }
 0x878   :  { %1366 = vst.msk [vmem:[#allocation2 + $0xe0] sm:$0xff] %vm1351_vm1, %v1332_v61 }
 0x879   :  { %3677 = vmatmul.f32.gmra.mxu1 %v3525_v1 }
 0x87c   :  { %3615 = vmatmul.f32.gmra.mxu0 %v3526_v18 }
 0x87f   :  { %v1753_v3 = vpop.permute.xlu0 %1752  ;;  %v3536_v57 = vld [vmem:[#allocation2 + $0xe0] sm:$0xff] }
 0x880   :  { %1785 = vst.msk [vmem:[#allocation2 + $0xf8] sm:$0xff] %vm1351_vm1, %v1753_v3 }
 0x881   :  { %3680 = vmatmul.f32.gmra.mxu1 %v3527_v42 }
 0x884   :  { %3618 = vmatmul.f32.gmra.mxu0 %v3528_v60 }
 0x887   :  { %v3539_v8 = vld [vmem:[#allocation2 + $0xf8] sm:$0xff] }
 0x889   :  { %3683 = vmatmul.f32.gmra.mxu1 %v3529_v59 }
 0x88c   :  { %3621 = vmatmul.f32.gmra.mxu0 %v3530_v41 }
 0x891   :  { %3686 = vmatmul.f32.gmra.mxu1 %v3531_v45 }
 0x894   :  { %3624 = vmatmul.f32.gmra.mxu0 %v3532_v50 }
 0x899   :  { %3689 = vmatmul.f32.gmra.mxu1 %v3533_v27 }
 0x89c   :  { %3627 = vmatmul.f32.gmra.mxu0 %v3534_v32 }
 0x8a1   :  { %3692 = vmatmul.f32.gmra.mxu1 %v3535_v38 }
 0x8a4   :  { %3630 = vmatmul.f32.gmra.mxu0 %v3536_v57 }
 0x8a9   :  { %3695 = vmatmul.f32.gmra.mxu1 %v3537_v43 }
 0x8ac   :  { %3633 = vmatmul.f32.gmra.mxu0 %v3538_v9 }
 0x8b1   :  { %v3589_v58 = vpop.f32.mrf.mxu0  ;;  %3698 = vmatmul.f32.gmra.mxu1 %v3539_v8 }
 0x8b6   :  { %v3654_v44 = vpop.f32.mrf.mxu1 }
 0x8b7   :  { %v3655_v2 = vadd.f32 %v3654_v44, %v3589_v58 }
 0x8b9   :  { %3702 = vst [vmem:[#allocation9] sm:$0xff] %v3655_v2  ;;  %v3592_v11 = vpop.f32.mrf.mxu0 }
 0x8be   :  { %v3657_v10 = vpop.f32.mrf.mxu1 }
 0x8bf   :  { %v3658_v13 = vadd.f32 %v3657_v10, %v3592_v11 }
 0x8c1   :  { %3703 = vst [vmem:[#allocation9 + $0x8] sm:$0xff] %v3658_v13  ;;  %v3595_v25 = vpop.f32.mrf.mxu0 }
 0x8c6   :  { %v3660_v24 = vpop.f32.mrf.mxu1 }
 0x8c7   :  { %v3661_v63 = vadd.f32 %v3660_v24, %v3595_v25 }
 0x8c9   :  { %3704 = vst [vmem:[#allocation9 + $0x10] sm:$0xff] %v3661_v63  ;;  %v3598_v22 = vpop.f32.mrf.mxu0 }
 0x8ce   :  { %v3663_v33 = vpop.f32.mrf.mxu1 }
 0x8cf   :  { %v3664_v6 = vadd.f32 %v3663_v33, %v3598_v22 }
 0x8d1   :  { %3705 = vst [vmem:[#allocation9 + $0x18] sm:$0xff] %v3664_v6  ;;  %v3601_v55 = vpop.f32.mrf.mxu0 }
 0x8d6   :  { %v3666_v52 = vpop.f32.mrf.mxu1 }
 0x8d7   :  { %v3667_v12 = vadd.f32 %v3666_v52, %v3601_v55 }
 0x8d9   :  { %3706 = vst [vmem:[#allocation9 + $0x20] sm:$0xff] %v3667_v12  ;;  %v3604_v34 = vpop.f32.mrf.mxu0 }
 0x8de   :  { %v3669_v40 = vpop.f32.mrf.mxu1 }
 0x8df   :  { %v3670_v30 = vadd.f32 %v3669_v40, %v3604_v34 }
 0x8e1   :  { %3707 = vst [vmem:[#allocation9 + $0x28] sm:$0xff] %v3670_v30  ;;  %v3607_v35 = vpop.f32.mrf.mxu0 }
 0x8e6   :  { %v3672_v47 = vpop.f32.mrf.mxu1 }
 0x8e7   :  { %v3673_v49 = vadd.f32 %v3672_v47, %v3607_v35 }
 0x8e9   :  { %3708 = vst [vmem:[#allocation9 + $0x30] sm:$0xff] %v3673_v49  ;;  %v3610_v54 = vpop.f32.mrf.mxu0 }
 0x8ee   :  { %v3675_v62 = vpop.f32.mrf.mxu1 }
 0x8ef   :  { %v3676_v36 = vadd.f32 %v3675_v62, %v3610_v54 }
 0x8f1   :  { %3709 = vst [vmem:[#allocation9 + $0x38] sm:$0xff] %v3676_v36  ;;  %v3613_v29 = vpop.f32.mrf.mxu0 }
 0x8f6   :  { %v3678_v51 = vpop.f32.mrf.mxu1 }
 0x8f7   :  { %v3679_v23 = vadd.f32 %v3678_v51, %v3613_v29 }
 0x8f9   :  { %3710 = vst [vmem:[#allocation9 + $0x40] sm:$0xff] %v3679_v23  ;;  %v3616_v39 = vpop.f32.mrf.mxu0 }
 0x8fe   :  { %v3681_v21 = vpop.f32.mrf.mxu1 }
 0x8ff   :  { %v3682_v16 = vadd.f32 %v3681_v21, %v3616_v39 }
 0x901   :  { %3711 = vst [vmem:[#allocation9 + $0x48] sm:$0xff] %v3682_v16  ;;  %v3619_v4 = vpop.f32.mrf.mxu0 }
 0x906   :  { %v3684_v28 = vpop.f32.mrf.mxu1 }
 0x907   :  { %v3685_v37 = vadd.f32 %v3684_v28, %v3619_v4 }
 0x909   :  { %3712 = vst [vmem:[#allocation9 + $0x50] sm:$0xff] %v3685_v37  ;;  %v3622_v15 = vpop.f32.mrf.mxu0 }
 0x90e   :  { %v3687_v46 = vpop.f32.mrf.mxu1 }
 0x90f   :  { %v3688_v0 = vadd.f32 %v3687_v46, %v3622_v15 }
 0x911   :  { %3713 = vst [vmem:[#allocation9 + $0x58] sm:$0xff] %v3688_v0  ;;  %v3625_v53 = vpop.f32.mrf.mxu0 }
 0x916   :  { %v3690_v19 = vpop.f32.mrf.mxu1 }
 0x917   :  { %v3691_v7 = vadd.f32 %v3690_v19, %v3625_v53 }
 0x919   :  { %3714 = vst [vmem:[#allocation9 + $0x60] sm:$0xff] %v3691_v7  ;;  %v3628_v31 = vpop.f32.mrf.mxu0 }
 0x91e   :  { %v3693_v20 = vpop.f32.mrf.mxu1 }
 0x91f   :  { %v3694_v26 = vadd.f32 %v3693_v20, %v3628_v31 }
 0x921   :  { %3715 = vst [vmem:[#allocation9 + $0x68] sm:$0xff] %v3694_v26  ;;  %v3631_v14 = vpop.f32.mrf.mxu0 }
 0x926   :  { %v3696_v17 = vpop.f32.mrf.mxu1 }
 0x927   :  { %v3697_v5 = vadd.f32 %v3696_v17, %v3631_v14 }
 0x929   :  { %3716 = vst [vmem:[#allocation9 + $0x70] sm:$0xff] %v3697_v5  ;;  %v3634_v48 = vpop.f32.mrf.mxu0 }
 0x92e   :  { %v3699_v56 = vpop.f32.mrf.mxu1 }
 0x92f   :  { %v3700_v61 = vadd.f32 %v3699_v56, %v3634_v48 }
 0x931   :  { %3717 = vst [vmem:[#allocation9 + $0x78] sm:$0xff] %v3700_v61 }
 0x932   :  { %3730 = dma.vmem_to_hbm [thread:$0]  %s3723_s13, 2048, %s3725_s11, [#allocation6], %s4647_s2, %s4647_s2, %s4648_s12  }
 0x933   :  { %4640 = dma.done.wait [#allocation6], 2048  }
 0x934   :  { %4641 = vsyncadd [#allocation6], 4294965248 }
 0x935   :  { %3735 = vsyncpa [#allocation5], 1 }
 0x936   :  { %3736 = vsyncpa [#allocation8], 1 }
 0x937   :  { %3737 = vsyncpa [#allocation6], 1 }

</bundles_post_ra>
